<compile_context>
chip_gen: v5e
topology: v5e:2x2
jax: 0.10.0
libtpu: 0.0.40
codegen_flags: <defaults>
</compile_context>

<pallas_src>
import numpy as np

import jax
import jax.numpy as jnp
from jax.experimental import pallas as pl
from jax.experimental.pallas import tpu as pltpu


# ---------------------------------------------------------------------------
# One-time weight layout transforms (init time, NumPy — never on the hot path)
# ---------------------------------------------------------------------------
def _banded_conv_weights(w, h_in):
    """(Cout, Cin, kh, kw) conv weight -> (kw, Cout*Ho, Cin*H) banded matrices.

    With the activation stored as a 2-D slab X of shape (Cin*H, W)
    (row = c*H + y, col = x), a VALID stride-1 conv is
        out = sum_j  T[j] @ X[:, j:j+Wo]
    where T[j][co*Ho + y, c*H + y + i] = w[co, c, i, j].
    """
    w = np.asarray(w, np.float32)
    cout, cin, kh, kw = w.shape
    ho = h_in - kh + 1
    t = np.zeros((kw, cout * ho, cin * h_in), np.float32)
    y = np.arange(ho)
    rows = np.arange(cout)[:, None, None] * ho + y[None, None, :]      # (cout,1,ho)
    rows = np.broadcast_to(rows, (cout, cin, ho))
    for j in range(kw):
        for i in range(kh):
            cols = np.arange(cin)[None, :, None] * h_in + y[None, None, :] + i
            cols = np.broadcast_to(cols, (cout, cin, ho))
            vals = np.broadcast_to(w[:, :, i, j][:, :, None], (cout, cin, ho))
            t[j, rows, cols] = vals
    return t


def _pool_matrices(c, h, w):
    """AvgPool2d(2) on a (c*h, w) slab as  left @ X @ right  (0.5-valued)."""
    hp, wp = h // 2, w // 2
    left = np.zeros((c * hp, c * h), np.float32)
    r = np.arange(c * hp)
    left[r, 2 * r] = 0.5
    left[r, 2 * r + 1] = 0.5
    right = np.zeros((w, wp), np.float32)
    q = np.arange(wp)
    right[2 * q, q] = 0.5
    right[2 * q + 1, q] = 0.5
    return left, right


def prepare_params(params):
    """Transform PyTorch-layout LeNet5 params into the fused-kernel layout."""
    w1, b1 = np.asarray(params["conv1_w"]), np.asarray(params["conv1_b"])
    w2, b2 = np.asarray(params["conv2_w"]), np.asarray(params["conv2_b"])
    w3, b3 = np.asarray(params["conv3_w"]), np.asarray(params["conv3_b"])
    w4, b4 = np.asarray(params["fc4_w"]), np.asarray(params["fc4_b"])
    w5, b5 = np.asarray(params["fc5_w"]), np.asarray(params["fc5_b"])

    t3 = _banded_conv_weights(w3, 5)                          # (5, 120, 80)
    l1, r1 = _pool_matrices(6, 28, 28)                        # (84,168), (28,14)
    l2, r2 = _pool_matrices(16, 10, 10)                       # (80,160), (10,5)

    kp = {
        "t1": _banded_conv_weights(w1, 32),                   # (5, 168, 32)
        "b1": np.repeat(b1, 28)[:, None],                     # (168, 1)
        "pool1_l": l1, "pool1_r": r1,
        "t2": _banded_conv_weights(w2, 14),                   # (5, 160, 84)
        "b2": np.repeat(b2, 10)[:, None],                     # (160, 1)
        "pool2_l": l2, "pool2_r": r2,
        "t3t": np.ascontiguousarray(t3.transpose(0, 2, 1)),   # (5, 80, 120)
        "b3": b3[None, :],                                    # (1, 120)
        "w4t": np.ascontiguousarray(w4.T),                    # (120, 84)
        "b4": b4[None, :],                                    # (1, 84)
        "w5t": np.ascontiguousarray(w5.T),                    # (84, num_classes)
        "b5": b5[None, :],                                    # (1, num_classes)
    }
    return {k: jnp.asarray(v, jnp.float32) for k, v in kp.items()}


_WEIGHT_ORDER = ("t1", "b1", "pool1_l", "pool1_r",
                 "t2", "b2", "pool2_l", "pool2_r",
                 "t3t", "b3", "w4t", "b4", "w5t", "b5")


# ---------------------------------------------------------------------------
# Fused LeNet5 kernel: one grid step == one image, everything stays in VMEM.
# ---------------------------------------------------------------------------
def _lenet5_kernel(x_ref, t1_ref, b1_ref, l1_ref, r1_ref,
                   t2_ref, b2_ref, l2_ref, r2_ref,
                   t3t_ref, b3_ref, w4t_ref, b4_ref, w5t_ref, b5_ref,
                   o_ref):
    f32 = jnp.float32

    def conv_tanh(x2d, t_ref, b_ref):
        # x2d: (Cin*H, W); t_ref: (kw, Cout*Ho, Cin*H); b_ref: (Cout*Ho, 1)
        kw, rows, _ = t_ref.shape
        wo = x2d.shape[1] - kw + 1
        acc = jnp.zeros((rows, wo), f32)
        for j in range(kw):                          # kw = 5, fully unrolled
            acc += jnp.dot(t_ref[j], x2d[:, j:j + wo],
                           preferred_element_type=f32)
        return jnp.tanh(acc + b_ref[...])            # per-channel bias broadcast

    def avg_pool(x2d, l_ref, r_ref):
        y = jnp.dot(x2d, r_ref[...], preferred_element_type=f32)
        return jnp.dot(l_ref[...], y, preferred_element_type=f32)

    x = x_ref[0, 0]                                  # (32, 32) single-channel image

    h = conv_tanh(x, t1_ref, b1_ref)                 # conv1+tanh  -> (6*28, 28)
    h = avg_pool(h, l1_ref, r1_ref)                  # pool1       -> (6*14, 14)
    h = conv_tanh(h, t2_ref, b2_ref)                 # conv2+tanh  -> (16*10, 10)
    h = avg_pool(h, l2_ref, r2_ref)                  # pool2       -> (16*5, 5)

    # conv3 (5x5 VALID on a 5x5 field == dense layer).  Switch to row form so
    # the classifier matmuls are lane-dense (features on the lane axis).
    ht = jnp.transpose(h)                            # (5, 80)
    acc = jnp.zeros((1, t3t_ref.shape[2]), f32)
    for j in range(t3t_ref.shape[0]):
        acc += jnp.dot(ht[j:j + 1, :], t3t_ref[j],
                       preferred_element_type=f32)
    f = jnp.tanh(acc + b3_ref[...])                  # (1, 120)

    z = jnp.tanh(jnp.dot(f, w4t_ref[...], preferred_element_type=f32)
                 + b4_ref[...])                      # (1, 84)
    z = jnp.dot(z, w5t_ref[...], preferred_element_type=f32) + b5_ref[...]
    o_ref[0] = z                                     # (1, num_classes) logits row


def lenet5_forward(kparams, x, logits=True):
    """x: (B, 1, 32, 32) float32 -> (B, num_classes) logits (or probabilities)."""
    batch = x.shape[0]
    num_classes = kparams["w5t"].shape[1]
    weights = [kparams[k] for k in _WEIGHT_ORDER]

    def const_spec(a):
        nd = a.ndim                                  # full block, fetched once,
        return pl.BlockSpec(a.shape, lambda i, _n=nd: (0,) * _n)  # VMEM-resident

    out = pl.pallas_call(
        _lenet5_kernel,
        out_shape=jax.ShapeDtypeStruct((batch, 1, num_classes), jnp.float32),
        grid=(batch,),
        in_specs=[pl.BlockSpec((1, 1, 32, 32), lambda i: (i, 0, 0, 0))]
                 + [const_spec(a) for a in weights],
        out_specs=pl.BlockSpec((1, 1, num_classes), lambda i: (i, 0, 0)),
        compiler_params=pltpu.CompilerParams(
            dimension_semantics=("parallel",)),
    )(x, *weights)
    out = out.reshape(batch, num_classes)
    if not logits:
        out = jax.nn.softmax(out, axis=-1)           # tiny; done outside the kernel
    return out


# ---------------------------------------------------------------------------
# Parameters (deterministic, PyTorch-style uniform(-1/sqrt(fan_in), +..))
# ---------------------------------------------------------------------------
def init_params(key, num_classes):
    def uni(k, shape, fan_in):
        bound = float(fan_in) ** -0.5
        return jax.random.uniform(k, shape, jnp.float32, -bound, bound)

    ks = jax.random.split(key, 10)
    return {
        "conv1_w": uni(ks[0], (6, 1, 5, 5), 1 * 5 * 5),
        "conv1_b": uni(ks[1], (6,), 1 * 5 * 5),
        "conv2_w": uni(ks[2], (16, 6, 5, 5), 6 * 5 * 5),
        "conv2_b": uni(ks[3], (16,), 6 * 5 * 5),
        "conv3_w": uni(ks[4], (120, 16, 5, 5), 16 * 5 * 5),
        "conv3_b": uni(ks[5], (120,), 16 * 5 * 5),
        "fc4_w": uni(ks[6], (84, 120), 120),
        "fc4_b": uni(ks[7], (84,), 120),
        "fc5_w": uni(ks[8], (num_classes, 84), 84),
        "fc5_b": uni(ks[9], (num_classes,), 84),
    }


# Pure-JAX reference (original PyTorch layout) for the correctness check.
def lenet5_reference(params, x):
    prec = jax.lax.Precision.HIGHEST

    def conv(x, w, b):
        y = jax.lax.conv_general_dilated(
            x, w, (1, 1), "VALID",
            dimension_numbers=("NCHW", "OIHW", "NCHW"), precision=prec)
        return jnp.tanh(y + b.reshape(1, -1, 1, 1))

    def pool(x):
        b_, c, h, w = x.shape
        return x.reshape(b_, c, h // 2, 2, w // 2, 2).mean(axis=(3, 5))

    x = pool(conv(x, params["conv1_w"], params["conv1_b"]))
    x = pool(conv(x, params["conv2_w"], params["conv2_b"]))
    x = conv(x, params["conv3_w"], params["conv3_b"]).reshape(x.shape[0], 120)
    x = jnp.tanh(jnp.dot(x, params["fc4_w"].T, precision=prec) + params["fc4_b"])
    return jnp.dot(x, params["fc5_w"].T, precision=prec) + params["fc5_b"]


if __name__ == "__main__":
    num_classes = 10
    key = jax.random.PRNGKey(0)
    pkey, xkey = jax.random.split(key)
    params = init_params(pkey, num_classes)
    kparams = prepare_params(params)      # one-time weight layout transform

    # LeNet5 requires 32x32 inputs (conv3 reduces 5x5 -> 1x1).
    x = jax.random.normal(xkey, (2, 1, 32, 32), dtype=jnp.float32)

    fwd = jax.jit(lenet5_forward, static_argnames=("logits",))
    out = jax.block_until_ready(fwd(kparams, x, logits=True))
    assert out.shape == (2, num_classes), out.shape
    assert bool(jnp.all(jnp.isfinite(out)))

    # Tightened correctness check (was 5e-2): layout/ordering bugs produce O(1)
    # errors; 1e-3 leaves headroom only for MXU f32 pass differences.
    ref = jax.block_until_ready(lenet5_reference(params, x))
    err = float(jnp.max(jnp.abs(out - ref)))
    assert err < 1e-3, f"max abs err vs reference: {err}"

    # Probability (logits=False) path: softmax applied outside the kernel.
    probs = jax.block_until_ready(fwd(kparams, x, logits=False))
    assert probs.shape == (2, num_classes)
    assert bool(jnp.allclose(jnp.sum(probs, axis=1), 1.0, atol=1e-5))

    print("KERNEL_OK")
</pallas_src>

<mosaic_0001>
module attributes {stable_mosaic.version = 11 : i64} {
  func.func @_lenet5_kernel(%arg0: i32, %arg1: memref<1x1x32x32xf32, #tpu.memory_space<vmem>>, %arg2: memref<5x168x32xf32, #tpu.memory_space<vmem>>, %arg3: memref<168x1xf32, #tpu.memory_space<vmem>>, %arg4: memref<84x168xf32, #tpu.memory_space<vmem>>, %arg5: memref<28x14xf32, #tpu.memory_space<vmem>>, %arg6: memref<5x160x84xf32, #tpu.memory_space<vmem>>, %arg7: memref<160x1xf32, #tpu.memory_space<vmem>>, %arg8: memref<80x160xf32, #tpu.memory_space<vmem>>, %arg9: memref<10x5xf32, #tpu.memory_space<vmem>>, %arg10: memref<5x80x120xf32, #tpu.memory_space<vmem>>, %arg11: memref<1x120xf32, #tpu.memory_space<vmem>>, %arg12: memref<120x84xf32, #tpu.memory_space<vmem>>, %arg13: memref<1x84xf32, #tpu.memory_space<vmem>>, %arg14: memref<84x10xf32, #tpu.memory_space<vmem>>, %arg15: memref<1x10xf32, #tpu.memory_space<vmem>>, %arg16: memref<1x1x10xf32, #tpu.memory_space<vmem>>) attributes {dimension_semantics = [#tpu.dimension_semantics<parallel>], iteration_bounds = array<i64: 2>, scalar_prefetch = 0 : i64, scratch_operands = 0 : i64, tpu.core_type = #tpu.core_type<tc>, window_params = [{transform_indices = @transform_0, window_bounds = array<i64: 1, 1, 32, 32>}, {pipeline_mode = #tpu.pipeline_mode<synchronous>, transform_indices = @transform_1, window_bounds = array<i64: 5, 168, 32>}, {pipeline_mode = #tpu.pipeline_mode<synchronous>, transform_indices = @transform_2, window_bounds = array<i64: 168, 1>}, {pipeline_mode = #tpu.pipeline_mode<synchronous>, transform_indices = @transform_3, window_bounds = array<i64: 84, 168>}, {pipeline_mode = #tpu.pipeline_mode<synchronous>, transform_indices = @transform_4, window_bounds = array<i64: 28, 14>}, {pipeline_mode = #tpu.pipeline_mode<synchronous>, transform_indices = @transform_5, window_bounds = array<i64: 5, 160, 84>}, {pipeline_mode = #tpu.pipeline_mode<synchronous>, transform_indices = @transform_6, window_bounds = array<i64: 160, 1>}, {pipeline_mode = #tpu.pipeline_mode<synchronous>, transform_indices = @transform_7, window_bounds = array<i64: 80, 160>}, {pipeline_mode = #tpu.pipeline_mode<synchronous>, transform_indices = @transform_8, window_bounds = array<i64: 10, 5>}, {pipeline_mode = #tpu.pipeline_mode<synchronous>, transform_indices = @transform_9, window_bounds = array<i64: 5, 80, 120>}, {pipeline_mode = #tpu.pipeline_mode<synchronous>, transform_indices = @transform_10, window_bounds = array<i64: 1, 120>}, {pipeline_mode = #tpu.pipeline_mode<synchronous>, transform_indices = @transform_11, window_bounds = array<i64: 120, 84>}, {pipeline_mode = #tpu.pipeline_mode<synchronous>, transform_indices = @transform_12, window_bounds = array<i64: 1, 84>}, {pipeline_mode = #tpu.pipeline_mode<synchronous>, transform_indices = @transform_13, window_bounds = array<i64: 84, 10>}, {pipeline_mode = #tpu.pipeline_mode<synchronous>, transform_indices = @transform_14, window_bounds = array<i64: 1, 10>}, {transform_indices = @transform_15, window_bounds = array<i64: 1, 1, 10>}]} {
    %c0 = arith.constant 0 : index
    %c0_0 = arith.constant 0 : index
    %c0_1 = arith.constant 0 : index
    %c0_2 = arith.constant 0 : index
    %0 = vector.load %arg1[%c0, %c0_0, %c0_1, %c0_2] : memref<1x1x32x32xf32, #tpu.memory_space<vmem>>, vector<1x1x32x32xf32>
    %1 = vector.shape_cast %0 : vector<1x1x32x32xf32> to vector<32x32xf32>
    %cst = arith.constant 0.000000e+00 : f32
    %2 = vector.broadcast %cst : f32 to vector<168x28xf32>
    %c0_3 = arith.constant 0 : index
    %c0_4 = arith.constant 0 : index
    %c0_5 = arith.constant 0 : index
    %3 = vector.load %arg2[%c0_3, %c0_4, %c0_5] : memref<5x168x32xf32, #tpu.memory_space<vmem>>, vector<1x168x32xf32>
    %4 = vector.shape_cast %3 : vector<1x168x32xf32> to vector<168x32xf32>
    %5 = vector.extract_strided_slice %1 {offsets = [0, 0], sizes = [32, 28], strides = [1, 1]} : vector<32x32xf32> to vector<32x28xf32>
    %cst_6 = arith.constant dense<0.000000e+00> : vector<168x28xf32>
    %6 = tpu.matmul %4, %5, %cst_6 {dimension_numbers = #tpu.dot_dimension_numbers<[1], [0], [0], [1], [0, 0, 1, 1], [], []>} : vector<168x32xf32>, vector<32x28xf32>, vector<168x28xf32> -> vector<168x28xf32>
    %7 = arith.addf %2, %6 : vector<168x28xf32>
    %c1 = arith.constant 1 : index
    %c0_7 = arith.constant 0 : index
    %c0_8 = arith.constant 0 : index
    %8 = vector.load %arg2[%c1, %c0_7, %c0_8] : memref<5x168x32xf32, #tpu.memory_space<vmem>>, vector<1x168x32xf32>
    %9 = vector.shape_cast %8 : vector<1x168x32xf32> to vector<168x32xf32>
    %10 = vector.extract_strided_slice %1 {offsets = [0, 1], sizes = [32, 28], strides = [1, 1]} : vector<32x32xf32> to vector<32x28xf32>
    %cst_9 = arith.constant dense<0.000000e+00> : vector<168x28xf32>
    %11 = tpu.matmul %9, %10, %cst_9 {dimension_numbers = #tpu.dot_dimension_numbers<[1], [0], [0], [1], [0, 0, 1, 1], [], []>} : vector<168x32xf32>, vector<32x28xf32>, vector<168x28xf32> -> vector<168x28xf32>
    %12 = arith.addf %7, %11 : vector<168x28xf32>
    %c2 = arith.constant 2 : index
    %c0_10 = arith.constant 0 : index
    %c0_11 = arith.constant 0 : index
    %13 = vector.load %arg2[%c2, %c0_10, %c0_11] : memref<5x168x32xf32, #tpu.memory_space<vmem>>, vector<1x168x32xf32>
    %14 = vector.shape_cast %13 : vector<1x168x32xf32> to vector<168x32xf32>
    %15 = vector.extract_strided_slice %1 {offsets = [0, 2], sizes = [32, 28], strides = [1, 1]} : vector<32x32xf32> to vector<32x28xf32>
    %cst_12 = arith.constant dense<0.000000e+00> : vector<168x28xf32>
    %16 = tpu.matmul %14, %15, %cst_12 {dimension_numbers = #tpu.dot_dimension_numbers<[1], [0], [0], [1], [0, 0, 1, 1], [], []>} : vector<168x32xf32>, vector<32x28xf32>, vector<168x28xf32> -> vector<168x28xf32>
    %17 = arith.addf %12, %16 : vector<168x28xf32>
    %c3 = arith.constant 3 : index
    %c0_13 = arith.constant 0 : index
    %c0_14 = arith.constant 0 : index
    %18 = vector.load %arg2[%c3, %c0_13, %c0_14] : memref<5x168x32xf32, #tpu.memory_space<vmem>>, vector<1x168x32xf32>
    %19 = vector.shape_cast %18 : vector<1x168x32xf32> to vector<168x32xf32>
    %20 = vector.extract_strided_slice %1 {offsets = [0, 3], sizes = [32, 28], strides = [1, 1]} : vector<32x32xf32> to vector<32x28xf32>
    %cst_15 = arith.constant dense<0.000000e+00> : vector<168x28xf32>
    %21 = tpu.matmul %19, %20, %cst_15 {dimension_numbers = #tpu.dot_dimension_numbers<[1], [0], [0], [1], [0, 0, 1, 1], [], []>} : vector<168x32xf32>, vector<32x28xf32>, vector<168x28xf32> -> vector<168x28xf32>
    %22 = arith.addf %17, %21 : vector<168x28xf32>
    %c4 = arith.constant 4 : index
    %c0_16 = arith.constant 0 : index
    %c0_17 = arith.constant 0 : index
    %23 = vector.load %arg2[%c4, %c0_16, %c0_17] : memref<5x168x32xf32, #tpu.memory_space<vmem>>, vector<1x168x32xf32>
    %24 = vector.shape_cast %23 : vector<1x168x32xf32> to vector<168x32xf32>
    %25 = vector.extract_strided_slice %1 {offsets = [0, 4], sizes = [32, 28], strides = [1, 1]} : vector<32x32xf32> to vector<32x28xf32>
    %cst_18 = arith.constant dense<0.000000e+00> : vector<168x28xf32>
    %26 = tpu.matmul %24, %25, %cst_18 {dimension_numbers = #tpu.dot_dimension_numbers<[1], [0], [0], [1], [0, 0, 1, 1], [], []>} : vector<168x32xf32>, vector<32x28xf32>, vector<168x28xf32> -> vector<168x28xf32>
    %27 = arith.addf %22, %26 : vector<168x28xf32>
    %c0_19 = arith.constant 0 : index
    %c0_20 = arith.constant 0 : index
    %28 = vector.load %arg3[%c0_19, %c0_20] : memref<168x1xf32, #tpu.memory_space<vmem>>, vector<168x1xf32>
    %29 = vector.broadcast %28 : vector<168x1xf32> to vector<168x28xf32>
    %30 = arith.addf %27, %29 : vector<168x28xf32>
    %31 = math.tanh %30 : vector<168x28xf32>
    %c0_21 = arith.constant 0 : index
    %c0_22 = arith.constant 0 : index
    %32 = vector.load %arg5[%c0_21, %c0_22] : memref<28x14xf32, #tpu.memory_space<vmem>>, vector<28x14xf32>
    %cst_23 = arith.constant dense<0.000000e+00> : vector<168x14xf32>
    %33 = tpu.matmul %31, %32, %cst_23 {dimension_numbers = #tpu.dot_dimension_numbers<[1], [0], [0], [1], [0, 0, 1, 1], [], []>} : vector<168x28xf32>, vector<28x14xf32>, vector<168x14xf32> -> vector<168x14xf32>
    %c0_24 = arith.constant 0 : index
    %c0_25 = arith.constant 0 : index
    %34 = vector.load %arg4[%c0_24, %c0_25] : memref<84x168xf32, #tpu.memory_space<vmem>>, vector<84x168xf32>
    %cst_26 = arith.constant dense<0.000000e+00> : vector<84x14xf32>
    %35 = tpu.matmul %34, %33, %cst_26 {dimension_numbers = #tpu.dot_dimension_numbers<[1], [0], [0], [1], [0, 0, 1, 1], [], []>} : vector<84x168xf32>, vector<168x14xf32>, vector<84x14xf32> -> vector<84x14xf32>
    %cst_27 = arith.constant 0.000000e+00 : f32
    %36 = vector.broadcast %cst_27 : f32 to vector<160x10xf32>
    %c0_28 = arith.constant 0 : index
    %c0_29 = arith.constant 0 : index
    %c0_30 = arith.constant 0 : index
    %37 = vector.load %arg6[%c0_28, %c0_29, %c0_30] : memref<5x160x84xf32, #tpu.memory_space<vmem>>, vector<1x160x84xf32>
    %38 = vector.shape_cast %37 : vector<1x160x84xf32> to vector<160x84xf32>
    %39 = vector.extract_strided_slice %35 {offsets = [0, 0], sizes = [84, 10], strides = [1, 1]} : vector<84x14xf32> to vector<84x10xf32>
    %cst_31 = arith.constant dense<0.000000e+00> : vector<160x10xf32>
    %40 = tpu.matmul %38, %39, %cst_31 {dimension_numbers = #tpu.dot_dimension_numbers<[1], [0], [0], [1], [0, 0, 1, 1], [], []>} : vector<160x84xf32>, vector<84x10xf32>, vector<160x10xf32> -> vector<160x10xf32>
    %41 = arith.addf %36, %40 : vector<160x10xf32>
    %c1_32 = arith.constant 1 : index
    %c0_33 = arith.constant 0 : index
    %c0_34 = arith.constant 0 : index
    %42 = vector.load %arg6[%c1_32, %c0_33, %c0_34] : memref<5x160x84xf32, #tpu.memory_space<vmem>>, vector<1x160x84xf32>
    %43 = vector.shape_cast %42 : vector<1x160x84xf32> to vector<160x84xf32>
    %44 = vector.extract_strided_slice %35 {offsets = [0, 1], sizes = [84, 10], strides = [1, 1]} : vector<84x14xf32> to vector<84x10xf32>
    %cst_35 = arith.constant dense<0.000000e+00> : vector<160x10xf32>
    %45 = tpu.matmul %43, %44, %cst_35 {dimension_numbers = #tpu.dot_dimension_numbers<[1], [0], [0], [1], [0, 0, 1, 1], [], []>} : vector<160x84xf32>, vector<84x10xf32>, vector<160x10xf32> -> vector<160x10xf32>
    %46 = arith.addf %41, %45 : vector<160x10xf32>
    %c2_36 = arith.constant 2 : index
    %c0_37 = arith.constant 0 : index
    %c0_38 = arith.constant 0 : index
    %47 = vector.load %arg6[%c2_36, %c0_37, %c0_38] : memref<5x160x84xf32, #tpu.memory_space<vmem>>, vector<1x160x84xf32>
    %48 = vector.shape_cast %47 : vector<1x160x84xf32> to vector<160x84xf32>
    %49 = vector.extract_strided_slice %35 {offsets = [0, 2], sizes = [84, 10], strides = [1, 1]} : vector<84x14xf32> to vector<84x10xf32>
    %cst_39 = arith.constant dense<0.000000e+00> : vector<160x10xf32>
    %50 = tpu.matmul %48, %49, %cst_39 {dimension_numbers = #tpu.dot_dimension_numbers<[1], [0], [0], [1], [0, 0, 1, 1], [], []>} : vector<160x84xf32>, vector<84x10xf32>, vector<160x10xf32> -> vector<160x10xf32>
    %51 = arith.addf %46, %50 : vector<160x10xf32>
    %c3_40 = arith.constant 3 : index
    %c0_41 = arith.constant 0 : index
    %c0_42 = arith.constant 0 : index
    %52 = vector.load %arg6[%c3_40, %c0_41, %c0_42] : memref<5x160x84xf32, #tpu.memory_space<vmem>>, vector<1x160x84xf32>
    %53 = vector.shape_cast %52 : vector<1x160x84xf32> to vector<160x84xf32>
    %54 = vector.extract_strided_slice %35 {offsets = [0, 3], sizes = [84, 10], strides = [1, 1]} : vector<84x14xf32> to vector<84x10xf32>
    %cst_43 = arith.constant dense<0.000000e+00> : vector<160x10xf32>
    %55 = tpu.matmul %53, %54, %cst_43 {dimension_numbers = #tpu.dot_dimension_numbers<[1], [0], [0], [1], [0, 0, 1, 1], [], []>} : vector<160x84xf32>, vector<84x10xf32>, vector<160x10xf32> -> vector<160x10xf32>
    %56 = arith.addf %51, %55 : vector<160x10xf32>
    %c4_44 = arith.constant 4 : index
    %c0_45 = arith.constant 0 : index
    %c0_46 = arith.constant 0 : index
    %57 = vector.load %arg6[%c4_44, %c0_45, %c0_46] : memref<5x160x84xf32, #tpu.memory_space<vmem>>, vector<1x160x84xf32>
    %58 = vector.shape_cast %57 : vector<1x160x84xf32> to vector<160x84xf32>
    %59 = vector.extract_strided_slice %35 {offsets = [0, 4], sizes = [84, 10], strides = [1, 1]} : vector<84x14xf32> to vector<84x10xf32>
    %cst_47 = arith.constant dense<0.000000e+00> : vector<160x10xf32>
    %60 = tpu.matmul %58, %59, %cst_47 {dimension_numbers = #tpu.dot_dimension_numbers<[1], [0], [0], [1], [0, 0, 1, 1], [], []>} : vector<160x84xf32>, vector<84x10xf32>, vector<160x10xf32> -> vector<160x10xf32>
    %61 = arith.addf %56, %60 : vector<160x10xf32>
    %c0_48 = arith.constant 0 : index
    %c0_49 = arith.constant 0 : index
    %62 = vector.load %arg7[%c0_48, %c0_49] : memref<160x1xf32, #tpu.memory_space<vmem>>, vector<160x1xf32>
    %63 = vector.broadcast %62 : vector<160x1xf32> to vector<160x10xf32>
    %64 = arith.addf %61, %63 : vector<160x10xf32>
    %65 = math.tanh %64 : vector<160x10xf32>
    %c0_50 = arith.constant 0 : index
    %c0_51 = arith.constant 0 : index
    %66 = vector.load %arg9[%c0_50, %c0_51] : memref<10x5xf32, #tpu.memory_space<vmem>>, vector<10x5xf32>
    %cst_52 = arith.constant dense<0.000000e+00> : vector<160x5xf32>
    %67 = tpu.matmul %65, %66, %cst_52 {dimension_numbers = #tpu.dot_dimension_numbers<[1], [0], [0], [1], [0, 0, 1, 1], [], []>} : vector<160x10xf32>, vector<10x5xf32>, vector<160x5xf32> -> vector<160x5xf32>
    %c0_53 = arith.constant 0 : index
    %c0_54 = arith.constant 0 : index
    %68 = vector.load %arg8[%c0_53, %c0_54] : memref<80x160xf32, #tpu.memory_space<vmem>>, vector<80x160xf32>
    %cst_55 = arith.constant dense<0.000000e+00> : vector<80x5xf32>
    %69 = tpu.matmul %68, %67, %cst_55 {dimension_numbers = #tpu.dot_dimension_numbers<[1], [0], [0], [1], [0, 0, 1, 1], [], []>} : vector<80x160xf32>, vector<160x5xf32>, vector<80x5xf32> -> vector<80x5xf32>
    %70 = tpu.transpose %69, [1, 0] : vector<80x5xf32> -> vector<5x80xf32>
    %cst_56 = arith.constant 0.000000e+00 : f32
    %71 = vector.broadcast %cst_56 : f32 to vector<1x120xf32>
    %72 = vector.extract_strided_slice %70 {offsets = [0, 0], sizes = [1, 80], strides = [1, 1]} : vector<5x80xf32> to vector<1x80xf32>
    %c0_57 = arith.constant 0 : index
    %c0_58 = arith.constant 0 : index
    %c0_59 = arith.constant 0 : index
    %73 = vector.load %arg10[%c0_57, %c0_58, %c0_59] : memref<5x80x120xf32, #tpu.memory_space<vmem>>, vector<1x80x120xf32>
    %74 = vector.shape_cast %73 : vector<1x80x120xf32> to vector<80x120xf32>
    %cst_60 = arith.constant dense<0.000000e+00> : vector<1x120xf32>
    %75 = tpu.matmul %72, %74, %cst_60 {dimension_numbers = #tpu.dot_dimension_numbers<[1], [0], [0], [1], [0, 0, 1, 1], [], []>} : vector<1x80xf32>, vector<80x120xf32>, vector<1x120xf32> -> vector<1x120xf32>
    %76 = arith.addf %71, %75 : vector<1x120xf32>
    %77 = vector.extract_strided_slice %70 {offsets = [1, 0], sizes = [1, 80], strides = [1, 1]} : vector<5x80xf32> to vector<1x80xf32>
    %c1_61 = arith.constant 1 : index
    %c0_62 = arith.constant 0 : index
    %c0_63 = arith.constant 0 : index
    %78 = vector.load %arg10[%c1_61, %c0_62, %c0_63] : memref<5x80x120xf32, #tpu.memory_space<vmem>>, vector<1x80x120xf32>
    %79 = vector.shape_cast %78 : vector<1x80x120xf32> to vector<80x120xf32>
    %cst_64 = arith.constant dense<0.000000e+00> : vector<1x120xf32>
    %80 = tpu.matmul %77, %79, %cst_64 {dimension_numbers = #tpu.dot_dimension_numbers<[1], [0], [0], [1], [0, 0, 1, 1], [], []>} : vector<1x80xf32>, vector<80x120xf32>, vector<1x120xf32> -> vector<1x120xf32>
    %81 = arith.addf %76, %80 : vector<1x120xf32>
    %82 = vector.extract_strided_slice %70 {offsets = [2, 0], sizes = [1, 80], strides = [1, 1]} : vector<5x80xf32> to vector<1x80xf32>
    %c2_65 = arith.constant 2 : index
    %c0_66 = arith.constant 0 : index
    %c0_67 = arith.constant 0 : index
    %83 = vector.load %arg10[%c2_65, %c0_66, %c0_67] : memref<5x80x120xf32, #tpu.memory_space<vmem>>, vector<1x80x120xf32>
    %84 = vector.shape_cast %83 : vector<1x80x120xf32> to vector<80x120xf32>
    %cst_68 = arith.constant dense<0.000000e+00> : vector<1x120xf32>
    %85 = tpu.matmul %82, %84, %cst_68 {dimension_numbers = #tpu.dot_dimension_numbers<[1], [0], [0], [1], [0, 0, 1, 1], [], []>} : vector<1x80xf32>, vector<80x120xf32>, vector<1x120xf32> -> vector<1x120xf32>
    %86 = arith.addf %81, %85 : vector<1x120xf32>
    %87 = vector.extract_strided_slice %70 {offsets = [3, 0], sizes = [1, 80], strides = [1, 1]} : vector<5x80xf32> to vector<1x80xf32>
    %c3_69 = arith.constant 3 : index
    %c0_70 = arith.constant 0 : index
    %c0_71 = arith.constant 0 : index
    %88 = vector.load %arg10[%c3_69, %c0_70, %c0_71] : memref<5x80x120xf32, #tpu.memory_space<vmem>>, vector<1x80x120xf32>
    %89 = vector.shape_cast %88 : vector<1x80x120xf32> to vector<80x120xf32>
    %cst_72 = arith.constant dense<0.000000e+00> : vector<1x120xf32>
    %90 = tpu.matmul %87, %89, %cst_72 {dimension_numbers = #tpu.dot_dimension_numbers<[1], [0], [0], [1], [0, 0, 1, 1], [], []>} : vector<1x80xf32>, vector<80x120xf32>, vector<1x120xf32> -> vector<1x120xf32>
    %91 = arith.addf %86, %90 : vector<1x120xf32>
    %92 = vector.extract_strided_slice %70 {offsets = [4, 0], sizes = [1, 80], strides = [1, 1]} : vector<5x80xf32> to vector<1x80xf32>
    %c4_73 = arith.constant 4 : index
    %c0_74 = arith.constant 0 : index
    %c0_75 = arith.constant 0 : index
    %93 = vector.load %arg10[%c4_73, %c0_74, %c0_75] : memref<5x80x120xf32, #tpu.memory_space<vmem>>, vector<1x80x120xf32>
    %94 = vector.shape_cast %93 : vector<1x80x120xf32> to vector<80x120xf32>
    %cst_76 = arith.constant dense<0.000000e+00> : vector<1x120xf32>
    %95 = tpu.matmul %92, %94, %cst_76 {dimension_numbers = #tpu.dot_dimension_numbers<[1], [0], [0], [1], [0, 0, 1, 1], [], []>} : vector<1x80xf32>, vector<80x120xf32>, vector<1x120xf32> -> vector<1x120xf32>
    %96 = arith.addf %91, %95 : vector<1x120xf32>
    %c0_77 = arith.constant 0 : index
    %c0_78 = arith.constant 0 : index
    %97 = vector.load %arg11[%c0_77, %c0_78] : memref<1x120xf32, #tpu.memory_space<vmem>>, vector<1x120xf32>
    %98 = arith.addf %96, %97 : vector<1x120xf32>
    %99 = math.tanh %98 : vector<1x120xf32>
    %c0_79 = arith.constant 0 : index
    %c0_80 = arith.constant 0 : index
    %100 = vector.load %arg12[%c0_79, %c0_80] : memref<120x84xf32, #tpu.memory_space<vmem>>, vector<120x84xf32>
    %cst_81 = arith.constant dense<0.000000e+00> : vector<1x84xf32>
    %101 = tpu.matmul %99, %100, %cst_81 {dimension_numbers = #tpu.dot_dimension_numbers<[1], [0], [0], [1], [0, 0, 1, 1], [], []>} : vector<1x120xf32>, vector<120x84xf32>, vector<1x84xf32> -> vector<1x84xf32>
    %c0_82 = arith.constant 0 : index
    %c0_83 = arith.constant 0 : index
    %102 = vector.load %arg13[%c0_82, %c0_83] : memref<1x84xf32, #tpu.memory_space<vmem>>, vector<1x84xf32>
    %103 = arith.addf %101, %102 : vector<1x84xf32>
    %104 = math.tanh %103 : vector<1x84xf32>
    %c0_84 = arith.constant 0 : index
    %c0_85 = arith.constant 0 : index
    %105 = vector.load %arg14[%c0_84, %c0_85] : memref<84x10xf32, #tpu.memory_space<vmem>>, vector<84x10xf32>
    %cst_86 = arith.constant dense<0.000000e+00> : vector<1x10xf32>
    %106 = tpu.matmul %104, %105, %cst_86 {dimension_numbers = #tpu.dot_dimension_numbers<[1], [0], [0], [1], [0, 0, 1, 1], [], []>} : vector<1x84xf32>, vector<84x10xf32>, vector<1x10xf32> -> vector<1x10xf32>
    %c0_87 = arith.constant 0 : index
    %c0_88 = arith.constant 0 : index
    %107 = vector.load %arg15[%c0_87, %c0_88] : memref<1x10xf32, #tpu.memory_space<vmem>>, vector<1x10xf32>
    %108 = arith.addf %106, %107 : vector<1x10xf32>
    %c0_89 = arith.constant 0 : index
    %c0_90 = arith.constant 0 : index
    %c0_91 = arith.constant 0 : index
    %109 = vector.load %arg16[%c0_89, %c0_90, %c0_91] : memref<1x1x10xf32, #tpu.memory_space<vmem>>, vector<1x1x10xf32>
    %110 = vector.shape_cast %109 : vector<1x1x10xf32> to vector<1x10xf32>
    %111 = vector.shape_cast %108 : vector<1x10xf32> to vector<1x1x10xf32>
    tpu.vector_store %arg16[%c0_89, %c0_90, %c0_91], %111 {strides = array<i32>} : memref<1x1x10xf32, #tpu.memory_space<vmem>>, vector<1x1x10xf32>,
    return
  }
  func.func @transform_0(%arg0: i32) -> (i32, i32, i32, i32) {
    %c0_i32 = arith.constant 0 : i32
    %c0_i32_0 = arith.constant 0 : i32
    %c0_i32_1 = arith.constant 0 : i32
    %c0_i32_2 = arith.constant 0 : i32
    return %arg0, %c0_i32, %c0_i32_0, %c0_i32_1 : i32, i32, i32, i32
  }
  func.func @transform_1(%arg0: i32) -> (i32, i32, i32) {
    %c0_i32 = arith.constant 0 : i32
    %c0_i32_0 = arith.constant 0 : i32
    %c0_i32_1 = arith.constant 0 : i32
    %c0_i32_2 = arith.constant 0 : i32
    return %c0_i32, %c0_i32_0, %c0_i32_1 : i32, i32, i32
  }
  func.func @transform_2(%arg0: i32) -> (i32, i32) {
    %c0_i32 = arith.constant 0 : i32
    %c0_i32_0 = arith.constant 0 : i32
    %c0_i32_1 = arith.constant 0 : i32
    return %c0_i32, %c0_i32_0 : i32, i32
  }
  func.func @transform_3(%arg0: i32) -> (i32, i32) {
    %c0_i32 = arith.constant 0 : i32
    %c0_i32_0 = arith.constant 0 : i32
    %c0_i32_1 = arith.constant 0 : i32
    return %c0_i32, %c0_i32_0 : i32, i32
  }
  func.func @transform_4(%arg0: i32) -> (i32, i32) {
    %c0_i32 = arith.constant 0 : i32
    %c0_i32_0 = arith.constant 0 : i32
    %c0_i32_1 = arith.constant 0 : i32
    return %c0_i32, %c0_i32_0 : i32, i32
  }
  func.func @transform_5(%arg0: i32) -> (i32, i32, i32) {
    %c0_i32 = arith.constant 0 : i32
    %c0_i32_0 = arith.constant 0 : i32
    %c0_i32_1 = arith.constant 0 : i32
    %c0_i32_2 = arith.constant 0 : i32
    return %c0_i32, %c0_i32_0, %c0_i32_1 : i32, i32, i32
  }
  func.func @transform_6(%arg0: i32) -> (i32, i32) {
    %c0_i32 = arith.constant 0 : i32
    %c0_i32_0 = arith.constant 0 : i32
    %c0_i32_1 = arith.constant 0 : i32
    return %c0_i32, %c0_i32_0 : i32, i32
  }
  func.func @transform_7(%arg0: i32) -> (i32, i32) {
    %c0_i32 = arith.constant 0 : i32
    %c0_i32_0 = arith.constant 0 : i32
    %c0_i32_1 = arith.constant 0 : i32
    return %c0_i32, %c0_i32_0 : i32, i32
  }
  func.func @transform_8(%arg0: i32) -> (i32, i32) {
    %c0_i32 = arith.constant 0 : i32
    %c0_i32_0 = arith.constant 0 : i32
    %c0_i32_1 = arith.constant 0 : i32
    return %c0_i32, %c0_i32_0 : i32, i32
  }
  func.func @transform_9(%arg0: i32) -> (i32, i32, i32) {
    %c0_i32 = arith.constant 0 : i32
    %c0_i32_0 = arith.constant 0 : i32
    %c0_i32_1 = arith.constant 0 : i32
    %c0_i32_2 = arith.constant 0 : i32
    return %c0_i32, %c0_i32_0, %c0_i32_1 : i32, i32, i32
  }
  func.func @transform_10(%arg0: i32) -> (i32, i32) {
    %c0_i32 = arith.constant 0 : i32
    %c0_i32_0 = arith.constant 0 : i32
    %c0_i32_1 = arith.constant 0 : i32
    return %c0_i32, %c0_i32_0 : i32, i32
  }
  func.func @transform_11(%arg0: i32) -> (i32, i32) {
    %c0_i32 = arith.constant 0 : i32
    %c0_i32_0 = arith.constant 0 : i32
    %c0_i32_1 = arith.constant 0 : i32
    return %c0_i32, %c0_i32_0 : i32, i32
  }
  func.func @transform_12(%arg0: i32) -> (i32, i32) {
    %c0_i32 = arith.constant 0 : i32
    %c0_i32_0 = arith.constant 0 : i32
    %c0_i32_1 = arith.constant 0 : i32
    return %c0_i32, %c0_i32_0 : i32, i32
  }
  func.func @transform_13(%arg0: i32) -> (i32, i32) {
    %c0_i32 = arith.constant 0 : i32
    %c0_i32_0 = arith.constant 0 : i32
    %c0_i32_1 = arith.constant 0 : i32
    return %c0_i32, %c0_i32_0 : i32, i32
  }
  func.func @transform_14(%arg0: i32) -> (i32, i32) {
    %c0_i32 = arith.constant 0 : i32
    %c0_i32_0 = arith.constant 0 : i32
    %c0_i32_1 = arith.constant 0 : i32
    return %c0_i32, %c0_i32_0 : i32, i32
  }
  func.func @transform_15(%arg0: i32) -> (i32, i32, i32) {
    %c0_i32 = arith.constant 0 : i32
    %c0_i32_0 = arith.constant 0 : i32
    %c0_i32_1 = arith.constant 0 : i32
    return %arg0, %c0_i32, %c0_i32_0 : i32, i32, i32
  }
}

</mosaic_0001>

<bundles_post_ra>
// kernel: lenet5_forward.1
= control target key start
LH: loop header
LB: loop body
LE: loop exit
PB: predicated region body
PF: predicated region fallthrough
CT: control target
= control target key end

     0   :  { %s6314_s0 = inlined_call_operand.vmem [shape: f32[2,1,32,32], index: 0, kind: input, shape index: {}]   ;;  %s6315_s1 = inlined_call_operand.vmem [shape: f32[5,168,32], index: 1, kind: input, shape index: {}]   ;;  %s6316_s2 = inlined_call_operand.vmem [shape: f32[168,1], index: 2, kind: input, shape index: {}]   ;;  %s6317_s3 = inlined_call_operand.vmem [shape: f32[84,168], index: 3, kind: input, shape index: {}]   ;;  %s6318_s4 = inlined_call_operand.vmem [shape: f32[28,14], index: 4, kind: input, shape index: {}]   ;;  %s6319_s5 = inlined_call_operand.vmem [shape: f32[5,160,84], index: 5, kind: input, shape index: {}]   ;;  %s6320_s6 = inlined_call_operand.vmem [shape: f32[160,1], index: 6, kind: input, shape index: {}]   ;;  %s6321_s7 = inlined_call_operand.vmem [shape: f32[80,160], index: 7, kind: input, shape index: {}]   ;;  %s6322_s8 = inlined_call_operand.vmem [shape: f32[10,5], index: 8, kind: input, shape index: {}]   ;;  %s6323_s9 = inlined_call_operand.vmem [shape: f32[5,80,120], index: 9, kind: input, shape index: {}]   ;;  %s6324_s10 = inlined_call_operand.vmem [shape: f32[1,120], index: 10, kind: input, shape index: {}]   ;;  %s6325_s11 = inlined_call_operand.vmem [shape: f32[120,84], index: 11, kind: input, shape index: {}]   ;;  %s6326_s12 = inlined_call_operand.vmem [shape: f32[1,84], index: 12, kind: input, shape index: {}]   ;;  %s6327_s13 = inlined_call_operand.vmem [shape: f32[84,10], index: 13, kind: input, shape index: {}]   ;;  %s6328_s14 = inlined_call_operand.vmem [shape: f32[1,10], index: 14, kind: input, shape index: {}]   ;;  %s6329_s15 = inlined_call_operand.hbm [shape: f32[2,1,10], index: 15, kind: output, shape index: {}]  }
   0x1   :  { %6341 = sst [smem:[#allocation8_spill]] %s6314_s0 }
   0x2   :  { %6342 = sst [smem:[#allocation9_spill]] %s6315_s1 }
   0x3   :  { %6343 = sst [smem:[#allocation10_spill]] %s6316_s2 }
   0x4   :  { %20 = vsyncpa [#allocation3], 0 }
   0x5   :  { %22 = vsyncpa [#allocation3 + $0x1], 0  ;;  %s4634_s18 = smov 0   ;;  %s4636_s19 = smov 0  }
   0x6   :  { %s4638_s20 = smov 0   ;;  %s4640_s21 = smov 0  }
   0x7 LB: > { %6344 = sst [smem:[#allocation5_spill]] %s4543_s20  ;;  %s4655_s22 = sadd.s32 4294967295, %s4547_s21   ;;  %s4547_s21 = sphi %s4640_s21, %s6356_s21   ;;  %s4543_s20 = sphi %s4638_s20, %s6358_s20   ;;  %s4539_s19 = sphi %s4636_s19, %s6360_s19   ;;  %s4535_s18 = sphi %s4634_s18, %s6359_s18  }
   0x8   : > { %s3716_s23 = sadd.s32 4294967294, %s4547_s21   ;;  %s4659_s24 = sadd.s32 1, %s4547_s21  }
   0x9   : > { %6345 = sst [smem:[#allocation6_spill]] %s4659_s24  ;;  %s355_s25 = sadd.s32 1, %s4543_s20 }
   0xa   : > { %s352_s26 = ssub.s32 %s4547_s21, %s4659_s24  ;;  %p365_p0 = scmp.ne.s32.totalorder %s4543_s20, %s4539_s19 }
   0xb   : > { %p353_p1 = scmp.eq.s32.totalorder %s352_s26, 0  ;;  %p366_p2 = scmp.eq.s32.totalorder %s4655_s22, 1 }
   0xc   : > { %p371_p3 = scmp.ne.s32.totalorder %s4539_s19, %s4535_s18  ;;  %p372_p4 = scmp.eq.s32.totalorder %s3716_s23, 1 }
   0xd   : > { %s4670_s27 = scalar_select %p353_p1, %s4543_s20, %s355_s25  }
   0xe   : > { %p4672_p5 = por %p366_p2, %p365_p0  ;;  %p4676_p6 = por %p372_p4, %p371_p3 }
   0xf   : > { %6346 = sst [smem:[#allocation7_spill]] %s4670_s27  ;;  %p3719_p7 = scmp.ge.s32.totalorder %s4547_s21, 1 }
  0x10   : > { %p440_p8 = scmp.lt.s32.totalorder %s4547_s21, 3 }
  0x12   : > { %p441_p9 = pnand %p3719_p7, %p440_p8 }
  0x13   : > { %p487_p10 = scmp.lt.s32.totalorder (!%p441_p9), %s4655_s22, 1  ;;  %s6349_s0 = sld [smem:[#allocation8_spill]] (!%p441_p9) }
  0x14   : > { %444 = sbr.rel (%p441_p9) target bundleno = 2412 (0x96c), region = 80  ;;  %s6330_s26 = smov (!%p441_p9), 126  }
  0x15   : > { %s6334_s27 = smov (!%p441_p9), 127   ;;  %s6350_s1 = sld [smem:[#allocation9_spill]] (!%p441_p9) }
  0x16   : > { %s6337_s17 = smov (!%p441_p9), 124   ;;  %s6351_s2 = sld [smem:[#allocation10_spill]] (!%p441_p9) }
  0x17   : > { %s6352_s20 = smov (!%p441_p9), 127   ;;  %s6353_s24 = smov (!%p441_p9), 124  }
  0x19   : > { %s488_s30 = scalar_select %p487_p10, %s4655_s22, 1  ;;  %vm555_vm0 = vcmask 261120   ;;  %vm1672_vm1 = vcmask 1043456   ;;  %vm1608_vm2 = vcmask 228352   ;;  %vm1778_vm3 = vcmask 326656  }
  0x1a   : > { %vm1996_vm4 = vcmask 687104   ;;  %vm3134_vm5 = vcmask 1041408   ;;  %vm3073_vm6 = vcmask 80896   ;;  %vm3414_vm7 = vcmask 654336  }
  0x1b   : > { %s4210_s16 = sshll.u32 %s488_s30, 5  ;;  %s6332_s30 = smov 125   ;;  %v496_v6 = vld [vmem:[%s6350_s1] sm:$0xff]  ;;  %v497_v7 = vld [vmem:[%s6350_s1 + $0x8] sm:$0xff]  ;;  %v498_v9 = vld [vmem:[%s6350_s1 + $0x10] sm:$0xff]  ;;  %vm3583_vm8 = vcmask 982016  }
  0x1c   : > { %s491_s25 = scalar_lea.vmem %s6349_s0, %s4210_s16  ;;  %v499_v18 = vld [vmem:[%s6350_s1 + $0x18] sm:$0xff]  ;;  %v3785_v19 = vld [vmem:[%s6350_s1 + $0x150] sm:$0xff]  ;;  %v3722_v27 = vld [vmem:[%s6350_s1 + $0xa8] sm:$0xff]  ;;  %vm3646_vm9 = vcmask 73728  }
  0x1d   : > { %v494_v0 = vld [vmem:[%s491_s25 + $0x10] sm:$0xff]  ;;  %v495_v1 = vld [vmem:[%s491_s25 + $0x18] sm:$0xff]  ;;  %v492_v3 = vld [vmem:[%s491_s25] sm:$0xff] }
  0x1e   : > { %v4687_v2 = vpack.i.bf16 %v494_v0, %v495_v1  ;;  %v493_v4 = vld [vmem:[%s491_s25 + $0x8] sm:$0xff]  ;;  %774 = vmatpush.msra.mxu1 %v495_v1  ;;  %v500_v30 = vld [vmem:[%s6350_s1 + $0x20] sm:$0xff]  ;;  %v3786_v31 = vld [vmem:[%s6350_s1 + $0x158] sm:$0xff]  ;;  %s485_s25 = sand.u32 1, %s4539_s19  }
  0x1f   : > { %v4689_v5 = vpack.i.bf16 %v492_v3, %v493_v4  ;;  %v3827_v32 = vld [vmem:[%s6350_s1 + $0x1f8] sm:$0xff]  ;;  %v3723_v33 = vld [vmem:[%s6350_s1 + $0xb0] sm:$0xff]  ;;  %v501_v34 = vld [vmem:[%s6350_s1 + $0x28] sm:$0xff]  ;;  %s3649_s23 = scalar_lea.sflag [#allocation3], %s485_s25 }
  0x20   : > { %4267 = vrot.lane.b32.xlu1 %v4687_v2, %s6330_s26  ;;  %4257 = vrot.lane.b32.xlu0 %v4687_v2, %s6334_s27  ;;  %v3787_v35 = vld [vmem:[%s6350_s1 + $0x160] sm:$0xff]  ;;  %v3724_v37 = vld [vmem:[%s6350_s1 + $0xb8] sm:$0xff] }
  0x21   : > { %4277 = vrot.lane.b32.xlu2 %v4689_v5, %s6330_s26  ;;  %775 = vmatpush.msra.mxu1 %v494_v0  ;;  %v3828_v36 = vld [vmem:[%s6350_s1 + $0x200] sm:$0xff]  ;;  %v502_v38 = vld [vmem:[%s6350_s1 + $0x30] sm:$0xff]  ;;  %v3788_v39 = vld [vmem:[%s6350_s1 + $0x168] sm:$0xff] }
  0x22   : > { %v3829_v40 = vld [vmem:[%s6350_s1 + $0x208] sm:$0xff]  ;;  %v3725_v41 = vld [vmem:[%s6350_s1 + $0xc0] sm:$0xff]  ;;  %v503_v42 = vld [vmem:[%s6350_s1 + $0x38] sm:$0xff] }
  0x23   : > { %776 = vmatpush.msra.mxu1 %v493_v4  ;;  %v3789_v43 = vld [vmem:[%s6350_s1 + $0x170] sm:$0xff]  ;;  %v3726_v45 = vld [vmem:[%s6350_s1 + $0xc8] sm:$0xff]  ;;  %v504_v46 = vld [vmem:[%s6350_s1 + $0x40] sm:$0xff] }
  0x24   : > { %v3830_v44 = vld [vmem:[%s6350_s1 + $0x210] sm:$0xff]  ;;  %v3790_v47 = vld [vmem:[%s6350_s1 + $0x178] sm:$0xff]  ;;  %v505_v50 = vld [vmem:[%s6350_s1 + $0x48] sm:$0xff] }
  0x25   : > { %777 = vmatpush.msra.mxu1 %v492_v3  ;;  %v3831_v48 = vld [vmem:[%s6350_s1 + $0x218] sm:$0xff]  ;;  %v3727_v49 = vld [vmem:[%s6350_s1 + $0xd0] sm:$0xff]  ;;  %v3791_v51 = vld [vmem:[%s6350_s1 + $0x180] sm:$0xff] }
  0x26   : > { %3764 = vmatmul.msk.f32.vlgmr.msra.gmra.mxu1 %vm555_vm0, %v496_v6  ;;  %v3832_v52 = vld [vmem:[%s6350_s1 + $0x220] sm:$0xff]  ;;  %v3728_v53 = vld [vmem:[%s6350_s1 + $0xd8] sm:$0xff]  ;;  %v506_v54 = vld [vmem:[%s6350_s1 + $0x50] sm:$0xff] }
  0x27   : > { %v3792_v55 = vld [vmem:[%s6350_s1 + $0x188] sm:$0xff]  ;;  %v3729_v57 = vld [vmem:[%s6350_s1 + $0xe0] sm:$0xff]  ;;  %v507_v58 = vld [vmem:[%s6350_s1 + $0x58] sm:$0xff] }
  0x28   : > { %4272 = vrot.lane.b32.xlu1 %v4687_v2, %s6332_s30  ;;  %4262 = vrot.lane.b32.xlu0 %v4689_v5, %s6334_s27  ;;  %v3833_v56 = vld [vmem:[%s6350_s1 + $0x228] sm:$0xff]  ;;  %v3793_v59 = vld [vmem:[%s6350_s1 + $0x190] sm:$0xff]  ;;  %s3657_s27 = scalar_lea.hbm %s6329_s15, %s4655_s22 }
  0x29   : > { %4282 = vrot.lane.b32.xlu2 %v4689_v5, %s6332_s30  ;;  %v3834_v60 = vld [vmem:[%s6350_s1 + $0x230] sm:$0xff]  ;;  %v3730_v61 = vld [vmem:[%s6350_s1 + $0xe8] sm:$0xff]  ;;  %v508_v62 = vld [vmem:[%s6350_s1 + $0x60] sm:$0xff]  ;;  %s6355_s30 = smov 126   ;;  %s3661_s26 = sshll.u32 %s3657_s27, 4  ;;  %s3662_s26 = int_to_ptr.hbm [resolvable:$true] %s3661_s26 }
  0x2a   : > { %v3794_v63 = vld [vmem:[%s6350_s1 + $0x198] sm:$0xff]  ;;  %v3731_v1 = vld [vmem:[%s6350_s1 + $0xf0] sm:$0xff]  ;;  %v3795_v3 = vld [vmem:[%s6350_s1 + $0x1a0] sm:$0xff] }
  0x2b   : > { %v3835_v0 = vld [vmem:[%s6350_s1 + $0x238] sm:$0xff]  ;;  %v3836_v4 = vld [vmem:[%s6350_s1 + $0x240] sm:$0xff]  ;;  %v510_v6 = vld [vmem:[%s6350_s1 + $0x70] sm:$0xff] }
  0x2e   : > { %3765 = vmatmul.msk.f32.gmra.mxu1 %vm555_vm0, %v497_v7  ;;  %v3796_v7 = vld [vmem:[%s6350_s1 + $0x1a8] sm:$0xff] }
  0x30   : > { %4287 = vrot.lane.b32.xlu0 %v4687_v2, %s6337_s17  ;;  %4292 = vrot.lane.b32.xlu1 %v4689_v5, %s6337_s17  ;;  %v509_v2 = vld [vmem:[%s6350_s1 + $0x68] sm:$0xff]  ;;  %v3732_v5 = vld [vmem:[%s6350_s1 + $0xf8] sm:$0xff]  ;;  %s6354_s17 = smov 125  }
  0x36   : > { %3766 = vmatmul.msk.f32.gmra.mxu1 %vm555_vm0, %v498_v9  ;;  %v3733_v9 = vld [vmem:[%s6350_s1 + $0x100] sm:$0xff] }
  0x3e   : > { %3767 = vmatmul.msk.f32.gmra.mxu1 %vm555_vm0, %v499_v18  ;;  %v513_v18 = vld [vmem:[%s6350_s1 + $0x88] sm:$0xff] }
  0x46   : > { %3768 = vmatmul.msk.f32.gmra.mxu1 %vm555_vm0, %v500_v30  ;;  %v515_v30 = vld [vmem:[%s6350_s1 + $0x98] sm:$0xff] }
  0x4e   : > { %3769 = vmatmul.msk.f32.gmra.mxu1 %vm555_vm0, %v501_v34  ;;  %v1440_v34 = vld [vmem:[%s6351_s2 + $0x20] sm:$0xff] }
  0x56   : > { %3770 = vmatmul.msk.f32.gmra.mxu1 %vm555_vm0, %v502_v38  ;;  %v3738_v38 = vld [vmem:[%s6350_s1 + $0x128] sm:$0xff] }
  0x5e   : > { %3771 = vmatmul.msk.f32.gmra.mxu1 %vm555_vm0, %v503_v42 }
  0x66   : > { %3772 = vmatmul.msk.f32.gmra.mxu1 %vm555_vm0, %v504_v46 }
  0x6e   : > { %3773 = vmatmul.msk.f32.gmra.mxu1 %vm555_vm0, %v505_v50 }
  0x76   : > { %3774 = vmatmul.msk.f32.gmra.mxu1 %vm555_vm0, %v506_v54  ;;  %v1446_v54 = vld [vmem:[%s6351_s2 + $0x50] sm:$0xff] }
  0x7b   : > { %v4278_v8 = vpop.permute.xlu2 %4277 }
  0x7c   : > { %v4279_v16 = vunpack.i.l.bf16 %v4278_v8  ;;  %v4280_v17 = vunpack.i.h.bf16 %v4278_v8  ;;  %v3837_v8 = vld [vmem:[%s6350_s1 + $0x248] sm:$0xff] }
  0x7e   : > { %3775 = vmatmul.msk.f32.gmra.mxu1 %vm555_vm0, %v507_v58  ;;  %v3740_v58 = vld [vmem:[%s6350_s1 + $0x138] sm:$0xff] }
  0x83   : > { %v4283_v20 = vpop.permute.xlu2 %4282 }
  0x84   : > { %v4284_v28 = vunpack.i.l.bf16 %v4283_v20  ;;  %v4285_v29 = vunpack.i.h.bf16 %v4283_v20  ;;  %v3840_v20 = vld [vmem:[%s6350_s1 + $0x260] sm:$0xff] }
  0x86   : > { %3776 = vmatmul.msk.f32.gmra.mxu1 %vm555_vm0, %v508_v62  ;;  %v1447_v62 = vld [vmem:[%s6351_s2 + $0x58] sm:$0xff] }
  0x8e   : > { %3777 = vmatmul.msk.f32.gmra.mxu1 %vm555_vm0, %v509_v2  ;;  %v3805_v2 = vld [vmem:[%s6350_s1 + $0x1f0] sm:$0xff] }
  0x92   : > { %v4268_v10 = vpop.permute.xlu1 %4267  ;;  %v4258_v11 = vpop.permute.xlu0 %4257 }
  0x93   : > { %v4259_v12 = vunpack.i.l.bf16 %v4258_v11  ;;  %v4269_v13 = vunpack.i.l.bf16 %v4268_v10  ;;  %v4270_v14 = vunpack.i.h.bf16 %v4268_v10  ;;  %v4260_v15 = vunpack.i.h.bf16 %v4258_v11  ;;  %v511_v10 = vld [vmem:[%s6350_s1 + $0x78] sm:$0xff]  ;;  %v3797_v11 = vld [vmem:[%s6350_s1 + $0x1b0] sm:$0xff] }
  0x95   : > { %631 = vmatpush.msra.mxu0 %v4259_v12  ;;  %951 = vmatpush.msra.mxu2 %v4269_v13  ;;  %v3838_v12 = vld [vmem:[%s6350_s1 + $0x250] sm:$0xff]  ;;  %v3734_v13 = vld [vmem:[%s6350_s1 + $0x108] sm:$0xff] }
  0x96   : > { %3778 = vmatmul.msk.f32.gmra.mxu1 %vm555_vm0, %v510_v6  ;;  %v1454_v6 = vld [vmem:[%s6351_s2 + $0x90] sm:$0xff] }
  0x97   : > { %632 = vmatpush.msra.mxu0 %v4260_v15  ;;  %952 = vmatpush.msra.mxu2 %v4270_v14  ;;  %v512_v14 = vld [vmem:[%s6350_s1 + $0x80] sm:$0xff]  ;;  %v3798_v15 = vld [vmem:[%s6350_s1 + $0x1b8] sm:$0xff] }
  0x99   : > { %953 = vmatpush.msra.mxu2 %v4279_v16  ;;  %v3839_v16 = vld [vmem:[%s6350_s1 + $0x258] sm:$0xff] }
  0x9a   : > { %v4273_v21 = vpop.permute.xlu1 %4272  ;;  %v4263_v22 = vpop.permute.xlu0 %4262 }
  0x9b   : > { %954 = vmatpush.msra.mxu2 %v4280_v17  ;;  %v4264_v23 = vunpack.i.l.bf16 %v4263_v22  ;;  %v4274_v24 = vunpack.i.l.bf16 %v4273_v21  ;;  %v4275_v25 = vunpack.i.h.bf16 %v4273_v21  ;;  %v4265_v26 = vunpack.i.h.bf16 %v4263_v22  ;;  %v3735_v17 = vld [vmem:[%s6350_s1 + $0x110] sm:$0xff]  ;;  %v3736_v21 = vld [vmem:[%s6350_s1 + $0x118] sm:$0xff] }
  0x9c   : > { %3806 = vmatmul.msk.f32.vlgmr.msra.gmra.mxu2 %vm555_vm0, %v3785_v19  ;;  %v3799_v19 = vld [vmem:[%s6350_s1 + $0x1c0] sm:$0xff]  ;;  %v514_v22 = vld [vmem:[%s6350_s1 + $0x90] sm:$0xff] }
  0x9d   : > { %633 = vmatpush.msra.mxu0 %v4264_v23  ;;  %1149 = vmatpush.msra.mxu3 %v4274_v24  ;;  %v3800_v23 = vld [vmem:[%s6350_s1 + $0x1c8] sm:$0xff] }
  0x9e   : > { %3779 = vmatmul.msk.f32.gmra.mxu1 %vm555_vm0, %v511_v10  ;;  %v3841_v24 = vld [vmem:[%s6350_s1 + $0x268] sm:$0xff]  ;;  %v1455_v10 = vld [vmem:[%s6351_s2 + $0x98] sm:$0xff] }
  0x9f   : > { %634 = vmatpush.msra.mxu0 %v4265_v26  ;;  %1150 = vmatpush.msra.mxu3 %v4275_v25  ;;  %v4553_v25 = vmov 0   ;;  %v1438_v26 = vld [vmem:[%s6351_s2 + $0x10] sm:$0xff] }
  0xa0   : > { %3743 = vmatmul.msk.f32.vlgmr.msra.gmra.mxu0 %vm555_vm0, %v3722_v27  ;;  %4298 = vset.pattern.permute.xlu1 %v4553_v25  ;;  %v1436_v27 = vld [vmem:[%s6351_s2] sm:$0xff] }
  0xa1   : > { %1151 = vmatpush.msra.mxu3 %v4284_v28  ;;  %4297 = vset.pattern.permute.xlu0 %v4553_v25  ;;  %v1437_v28 = vld [vmem:[%s6351_s2 + $0x8] sm:$0xff] }
  0xa2   : > { %4296 = vset.pattern.permute.xlu2 %v4553_v25  ;;  %1469 = vperm.xlu1 %4298, %v1438_v26   ;;  %v4293_v42 = vpop.permute.xlu1 %4292  ;;  %v3875_v26 = vld [vmem:[%s6350_s1 + $0x2d0] sm:$0xff] }
  0xa3   : > { %1152 = vmatpush.msra.mxu3 %v4285_v29  ;;  %v3737_v29 = vld [vmem:[%s6350_s1 + $0x120] sm:$0xff]  ;;  %1459 = vperm.xlu2 %4296, %v1436_v27   ;;  %v4295_v46 = vunpack.i.h.bf16 %v4293_v42 }
  0xa4   : > { %3807 = vmatmul.msk.f32.gmra.mxu2 %vm555_vm0, %v3786_v31  ;;  %3848 = vmatmul.msk.f32.vlgmr.msra.gmra.mxu3 %vm555_vm0, %v3827_v32  ;;  %v3801_v31 = vld [vmem:[%s6350_s1 + $0x1d0] sm:$0xff] }
  0xa5   : > { %1464 = vperm.xlu0 %4297, %v1437_v28   ;;  %v3842_v32 = vld [vmem:[%s6350_s1 + $0x270] sm:$0xff]  ;;  %v3876_v28 = vld [vmem:[%s6350_s1 + $0x2d8] sm:$0xff] }
  0xa6   : > { %3780 = vmatmul.msk.f32.gmra.mxu1 %vm555_vm0, %v512_v14  ;;  %v1456_v14 = vld [vmem:[%s6351_s2 + $0xa0] sm:$0xff] }
  0xa8   : > { %3744 = vmatmul.msk.f32.gmra.mxu0 %vm555_vm0, %v3723_v33  ;;  %v4288_v33 = vpop.permute.xlu0 %4287 }
  0xaa   : > { %1479 = vperm.xlu1 %4298, %v1440_v34   ;;  %v3878_v34 = vld [vmem:[%s6350_s1 + $0x2e8] sm:$0xff] }
  0xac   : > { %3808 = vmatmul.msk.f32.gmra.mxu2 %vm555_vm0, %v3787_v35  ;;  %3849 = vmatmul.msk.f32.gmra.mxu3 %vm555_vm0, %v3828_v36  ;;  %v1439_v35 = vld [vmem:[%s6351_s2 + $0x18] sm:$0xff]  ;;  %v1442_v36 = vld [vmem:[%s6351_s2 + $0x30] sm:$0xff] }
  0xad   : > { %1474 = vperm.xlu2 %4296, %v1439_v35   ;;  %1489 = vperm.xlu0 %4297, %v1442_v36  }
  0xae   : > { %3781 = vmatmul.msk.f32.gmra.mxu1 %vm555_vm0, %v513_v18  ;;  %v3871_v18 = vld [vmem:[%s6350_s1 + $0x2b0] sm:$0xff] }
  0xb0   : > { %3745 = vmatmul.msk.f32.gmra.mxu0 %vm555_vm0, %v3724_v37 }
  0xb4   : > { %3809 = vmatmul.msk.f32.gmra.mxu2 %vm555_vm0, %v3788_v39  ;;  %3850 = vmatmul.msk.f32.gmra.mxu3 %vm555_vm0, %v3829_v40  ;;  %v4289_v39 = vunpack.i.l.bf16 %v4288_v33  ;;  %v4290_v40 = vunpack.i.h.bf16 %v4288_v33 }
  0xb6   : > { %3782 = vmatmul.msk.f32.gmra.mxu1 %vm555_vm0, %v514_v22  ;;  %1347 = vmatpush.msrb.mxu0 %v4289_v39  ;;  %v3873_v22 = vld [vmem:[%s6350_s1 + $0x2c0] sm:$0xff] }
  0xb8   : > { %3746 = vmatmul.msk.f32.gmra.mxu0 %vm555_vm0, %v3725_v41  ;;  %v516_v41 = vld [vmem:[%s6350_s1 + $0xa0] sm:$0xff] }
  0xb9   : > { %1348 = vmatpush.msrb.mxu0 %v4290_v40 }
  0xbc   : > { %3810 = vmatmul.msk.f32.gmra.mxu2 %vm555_vm0, %v3789_v43  ;;  %3851 = vmatmul.msk.f32.gmra.mxu3 %vm555_vm0, %v3830_v44  ;;  %v3802_v43 = vld [vmem:[%s6350_s1 + $0x1d8] sm:$0xff] }
  0xbd   : > { %v3843_v44 = vld [vmem:[%s6350_s1 + $0x278] sm:$0xff] }
  0xbe   : > { %3783 = vmatmul.msk.f32.gmra.mxu1 %vm555_vm0, %v515_v30 }
  0xc0   : > { %3747 = vmatmul.msk.f32.gmra.mxu0 %vm555_vm0, %v3726_v45  ;;  %v4294_v45 = vunpack.i.l.bf16 %v4293_v42 }
  0xc2   : > { %1349 = vmatpush.msrb.mxu0 %v4294_v45 }
  0xc4   : > { %3811 = vmatmul.msk.f32.gmra.mxu2 %vm555_vm0, %v3790_v47  ;;  %3852 = vmatmul.msk.f32.gmra.mxu3 %vm555_vm0, %v3831_v48  ;;  %v1443_v47 = vld [vmem:[%s6351_s2 + $0x38] sm:$0xff]  ;;  %v1441_v48 = vld [vmem:[%s6351_s2 + $0x28] sm:$0xff] }
  0xc5   : > { %1494 = vperm.xlu1 %4298, %v1443_v47   ;;  %1484 = vperm.xlu2 %4296, %v1441_v48   ;;  %v3881_v47 = vld [vmem:[%s6350_s1 + $0x300] sm:$0xff] }
  0xc6   : > { %3784 = vmatmul.msk.f32.gmra.mxu1 %vm555_vm0, %v516_v41  ;;  %1350 = vmatpush.msrb.mxu0 %v4295_v46 }
  0xc8   : > { %3748 = vmatmul.msk.f32.gmra.mxu0 %vm555_vm0, %v3727_v49  ;;  %v1445_v49 = vld [vmem:[%s6351_s2 + $0x48] sm:$0xff] }
  0xc9   : > { %1504 = vperm.xlu0 %4297, %v1445_v49   ;;  %v1607_v49 = vld [vmem:[%s6318_s4 + $0x18] sm:$0xf] }
  0xca   : > { %3911 = vmatpush.msk.msrb.mxu1 %vm1672_vm1, %v1607_v49 }
  0xcc   : > { %3812 = vmatmul.msk.f32.gmra.mxu2 %vm555_vm0, %v3791_v51  ;;  %3853 = vmatmul.msk.f32.gmra.mxu3 %vm555_vm0, %v3832_v52  ;;  %v3739_v51 = vld [vmem:[%s6350_s1 + $0x130] sm:$0xff]  ;;  %v3803_v52 = vld [vmem:[%s6350_s1 + $0x1e0] sm:$0xff] }
  0xcd   : > { %1509 = vperm.xlu1 %4298, %v1446_v54  }
  0xd0   : > { %3749 = vmatmul.msk.f32.gmra.mxu0 %vm555_vm0, %v3728_v53  ;;  %v3844_v53 = vld [vmem:[%s6350_s1 + $0x280] sm:$0xff] }
  0xd4   : > { %3813 = vmatmul.msk.f32.gmra.mxu2 %vm555_vm0, %v3792_v55  ;;  %3854 = vmatmul.msk.f32.gmra.mxu3 %vm555_vm0, %v3833_v56  ;;  %v1444_v55 = vld [vmem:[%s6351_s2 + $0x40] sm:$0xff] }
  0xd5   : > { %v1448_v56 = vld [vmem:[%s6351_s2 + $0x60] sm:$0xff]  ;;  %1499 = vperm.xlu2 %4296, %v1444_v55   ;;  %v3882_v55 = vld [vmem:[%s6350_s1 + $0x308] sm:$0xff] }
  0xd6   : > { %1519 = vperm.xlu0 %4297, %v1448_v56   ;;  %v1605_v56 = vld [vmem:[%s6318_s4 + $0x8] sm:$0xff] }
  0xd8   : > { %3750 = vmatmul.msk.f32.gmra.mxu0 %vm555_vm0, %v3729_v57 }
  0xdc   : > { %3814 = vmatmul.msk.f32.gmra.mxu2 %vm555_vm0, %v3793_v59  ;;  %3855 = vmatmul.msk.f32.gmra.mxu3 %vm555_vm0, %v3834_v60  ;;  %v3804_v59 = vld [vmem:[%s6350_s1 + $0x1e8] sm:$0xff] }
  0xdd   : > { %v3845_v60 = vld [vmem:[%s6350_s1 + $0x288] sm:$0xff]  ;;  %1514 = vperm.xlu2 %4296, %v1447_v62   ;;  %v3883_v62 = vld [vmem:[%s6350_s1 + $0x310] sm:$0xff] }
  0xe0   : > { %3751 = vmatmul.msk.f32.gmra.mxu0 %vm555_vm0, %v3730_v61  ;;  %v1449_v61 = vld [vmem:[%s6351_s2 + $0x68] sm:$0xff] }
  0xe1   : > { %1524 = vperm.xlu1 %4298, %v1449_v61  }
  0xe4   : > { %3815 = vmatmul.msk.f32.gmra.mxu2 %vm555_vm0, %v3794_v63  ;;  %3856 = vmatmul.msk.f32.gmra.mxu3 %vm555_vm0, %v3835_v0  ;;  %v1451_v63 = vld [vmem:[%s6351_s2 + $0x78] sm:$0xff] }
  0xe5   : > { %1534 = vperm.xlu0 %4297, %v1451_v63  }
  0xe8   : > { %3752 = vmatmul.msk.f32.gmra.mxu0 %vm555_vm0, %v3731_v1  ;;  %v3741_v1 = vld [vmem:[%s6350_s1 + $0x140] sm:$0xff] }
  0xec   : > { %3816 = vmatmul.msk.f32.gmra.mxu2 %vm555_vm0, %v3795_v3  ;;  %3857 = vmatmul.msk.f32.gmra.mxu3 %vm555_vm0, %v3836_v4  ;;  %v3846_v3 = vld [vmem:[%s6350_s1 + $0x290] sm:$0xff]  ;;  %v1452_v4 = vld [vmem:[%s6351_s2 + $0x80] sm:$0xff] }
  0xed   : > { %1539 = vperm.xlu1 %4298, %v1452_v4   ;;  %1549 = vperm.xlu0 %4297, %v1454_v6  }
  0xf0   : > { %3753 = vmatmul.msk.f32.gmra.mxu0 %vm555_vm0, %v3732_v5  ;;  %v1450_v5 = vld [vmem:[%s6351_s2 + $0x70] sm:$0xff] }
  0xf1   : > { %1529 = vperm.xlu2 %4296, %v1450_v5  }
  0xf4   : > { %3817 = vmatmul.msk.f32.gmra.mxu2 %vm555_vm0, %v3796_v7  ;;  %3858 = vmatmul.msk.f32.gmra.mxu3 %vm555_vm0, %v3837_v8  ;;  %v3742_v8 = vld [vmem:[%s6350_s1 + $0x148] sm:$0xff] }
  0xf5   : > { %1554 = vperm.xlu1 %4298, %v1455_v10  }
  0xf8   : > { %3754 = vmatmul.msk.f32.gmra.mxu0 %vm555_vm0, %v3733_v9  ;;  %v3847_v9 = vld [vmem:[%s6350_s1 + $0x298] sm:$0xff] }
  0xfc   : > { %3818 = vmatmul.msk.f32.gmra.mxu2 %vm555_vm0, %v3797_v11  ;;  %3859 = vmatmul.msk.f32.gmra.mxu3 %vm555_vm0, %v3838_v12  ;;  %v1453_v11 = vld [vmem:[%s6351_s2 + $0x88] sm:$0xff] }
  0xfd   : > { %1544 = vperm.xlu2 %4296, %v1453_v11  }
 0x100   : > { %3755 = vmatmul.msk.f32.gmra.mxu0 %vm555_vm0, %v3734_v13  ;;  %v3869_v13 = vld [vmem:[%s6350_s1 + $0x2a0] sm:$0xff] }
 0x104   : > { %3819 = vmatmul.msk.f32.gmra.mxu2 %vm555_vm0, %v3798_v15  ;;  %3860 = vmatmul.msk.f32.gmra.mxu3 %vm555_vm0, %v3839_v16  ;;  %v3870_v16 = vld [vmem:[%s6350_s1 + $0x2a8] sm:$0xff] }
 0x105   : > { %1559 = vperm.xlu2 %4296, %v1456_v14  }
 0x108   : > { %3756 = vmatmul.msk.f32.gmra.mxu0 %vm555_vm0, %v3735_v17 }
 0x10c   : > { %3820 = vmatmul.msk.f32.gmra.mxu2 %vm555_vm0, %v3799_v19  ;;  %3861 = vmatmul.msk.f32.gmra.mxu3 %vm555_vm0, %v3840_v20  ;;  %v3872_v20 = vld [vmem:[%s6350_s1 + $0x2b8] sm:$0xff] }
 0x110   : > { %3757 = vmatmul.msk.f32.gmra.mxu0 %vm555_vm0, %v3736_v21 }
 0x114   : > { %3821 = vmatmul.msk.f32.gmra.mxu2 %vm555_vm0, %v3800_v23  ;;  %3862 = vmatmul.msk.f32.gmra.mxu3 %vm555_vm0, %v3841_v24  ;;  %v3874_v24 = vld [vmem:[%s6350_s1 + $0x2c8] sm:$0xff] }
 0x118   : > { %3758 = vmatmul.msk.f32.gmra.mxu0 %vm555_vm0, %v3737_v29  ;;  %v779_v29 = vpop.f32.mrf.mxu1 }
 0x11c   : > { %3822 = vmatmul.msk.f32.gmra.mxu2 %vm555_vm0, %v3801_v31  ;;  %3863 = vmatmul.msk.f32.gmra.mxu3 %vm555_vm0, %v3842_v32  ;;  %v3877_v31 = vld [vmem:[%s6350_s1 + $0x2e0] sm:$0xff] }
 0x11d   : > { %v5001_v37 = vpop.f32.mrf.mxu0 }
 0x11e   : > { %v780_v4 = vadd.f32 %v779_v29, %v5001_v37  ;;  %v3886_v29 = vld [vmem:[%s6350_s1 + $0x328] sm:$0xff] }
 0x11f   : > { %v956_v39 = vpop.f32.mrf.mxu2 }
 0x120   : > { %3759 = vmatmul.msk.f32.gmra.mxu0 %vm555_vm0, %v3738_v38  ;;  %v782_v32 = vpop.f32.mrf.mxu1  ;;  %v3879_v38 = vld [vmem:[%s6350_s1 + $0x2f0] sm:$0xff] }
 0x124   : > { %3823 = vmatmul.msk.f32.gmra.mxu2 %vm555_vm0, %v3802_v43  ;;  %3864 = vmatmul.msk.f32.gmra.mxu3 %vm555_vm0, %v3843_v44  ;;  %v3880_v43 = vld [vmem:[%s6350_s1 + $0x2f8] sm:$0xff] }
 0x125   : > { %v5028_v50 = vpop.f32.mrf.mxu0 }
 0x126   : > { %v783_v14 = vadd.f32 %v782_v32, %v5028_v50  ;;  %v1465_v32 = vpop.permute.xlu0 %1464 }
 0x127   : > { %v1154_v40 = vpop.f32.mrf.mxu3  ;;  %v959_v44 = vpop.f32.mrf.mxu2 }
 0x128   : > { %3760 = vmatmul.msk.f32.gmra.mxu0 %vm555_vm0, %v3739_v51  ;;  %v785_v35 = vpop.f32.mrf.mxu1  ;;  %v1606_v51 = vld [vmem:[%s6318_s4 + $0x10] sm:$0xff] }
 0x129   : > { %1689 = vmatpush.msrb.mxu1 %v1606_v51  ;;  %v1470_v51 = vpop.permute.xlu1 %1469 }
 0x12b   : > { %1690 = vmatpush.msrb.mxu1 %v1605_v56 }
 0x12c   : > { %3824 = vmatmul.msk.f32.gmra.mxu2 %vm555_vm0, %v3803_v52  ;;  %3865 = vmatmul.msk.f32.gmra.mxu3 %vm555_vm0, %v3844_v53 }
 0x12d   : > { %v5051_v57 = vpop.f32.mrf.mxu0 }
 0x12f   : > { %v1157_v45 = vpop.f32.mrf.mxu3  ;;  %v962_v52 = vpop.f32.mrf.mxu2 }
 0x130   : > { %3761 = vmatmul.msk.f32.gmra.mxu0 %vm555_vm0, %v3740_v58  ;;  %v5182_v41 = vpop.f32.mrf.mxu1  ;;  %v1604_v58 = vld [vmem:[%s6318_s4] sm:$0xff] }
 0x131   : > { %1691 = vmatpush.msrb.mxu1 %v1604_v58 }
 0x134   : > { %3825 = vmatmul.msk.f32.gmra.mxu2 %vm555_vm0, %v3804_v59  ;;  %3866 = vmatmul.msk.f32.gmra.mxu3 %vm555_vm0, %v3845_v60 }
 0x135   : > { %v5074_v0 = vpop.f32.mrf.mxu0 }
 0x137   : > { %v1160_v53 = vpop.f32.mrf.mxu3  ;;  %v965_v60 = vpop.f32.mrf.mxu2 }
 0x138   : > { %3762 = vmatmul.msk.f32.gmra.mxu0 %vm555_vm0, %v3741_v1  ;;  %v5195_v48 = vpop.f32.mrf.mxu1 }
 0x13c   : > { %3826 = vmatmul.msk.f32.gmra.mxu2 %vm555_vm0, %v3805_v2  ;;  %3867 = vmatmul.msk.f32.gmra.mxu3 %vm555_vm0, %v3846_v3  ;;  %v3884_v3 = vld [vmem:[%s6350_s1 + $0x318] sm:$0xff] }
 0x13d   : > { %v5097_v7 = vpop.f32.mrf.mxu0 }
 0x13f   : > { %v1163_v63 = vpop.f32.mrf.mxu3  ;;  %v968_v5 = vpop.f32.mrf.mxu2 }
 0x140   : > { %3763 = vmatmul.msk.f32.gmra.mxu0 %vm555_vm0, %v3742_v8  ;;  %v5216_v59 = vpop.f32.mrf.mxu1  ;;  %v1019_v8 = vadd.f32 %v956_v39, %v780_v4  ;;  %v3888_v4 = vld [vmem:[%s6350_s1 + $0x338] sm:$0xff] }
 0x144   : > { %3868 = vmatmul.msk.f32.gmra.mxu3 %vm555_vm0, %v3847_v9  ;;  %v1217_v9 = vadd.f32 %v1154_v40, %v1019_v8 }
 0x145   : > { %v5113_v12 = vpop.f32.mrf.mxu0 }
 0x147   : > { %v1166_v6 = vpop.f32.mrf.mxu3  ;;  %v971_v37 = vpop.f32.mrf.mxu2 }
 0x148   : > { %3890 = vmatmul.msk.f32.vlgmr.msrb.gmra.mxu0 %vm555_vm0, %v3869_v13  ;;  %v5225_v1 = vpop.f32.mrf.mxu1  ;;  %v3885_v13 = vld [vmem:[%s6350_s1 + $0x320] sm:$0xff] }
 0x14d   : > { %v5122_v15 = vpop.f32.mrf.mxu0 }
 0x150   : > { %3891 = vmatmul.msk.f32.gmra.mxu0 %vm555_vm0, %v3870_v16  ;;  %v5234_v10 = vpop.f32.mrf.mxu1 }
 0x155   : > { %v5128_v17 = vpop.f32.mrf.mxu0 }
 0x158   : > { %3892 = vmatmul.msk.f32.gmra.mxu0 %vm555_vm0, %v3871_v18  ;;  %v1460_v18 = vpop.permute.xlu2 %1459 }
 0x15d   : > { %v5134_v19 = vpop.f32.mrf.mxu0 }
 0x160   : > { %3893 = vmatmul.msk.f32.gmra.mxu0 %vm555_vm0, %v3872_v20 }
 0x165   : > { %v5140_v21 = vpop.f32.mrf.mxu0 }
 0x168   : > { %3894 = vmatmul.msk.f32.gmra.mxu0 %vm555_vm0, %v3873_v22  ;;  %v1020_v22 = vadd.f32 %v959_v44, %v783_v14 }
 0x16d   : > { %v5146_v23 = vpop.f32.mrf.mxu0 }
 0x170   : > { %3895 = vmatmul.msk.f32.gmra.mxu0 %vm555_vm0, %v3874_v24  ;;  %v1169_v24 = vpop.f32.mrf.mxu3 }
 0x175   : > { %v5152_v25 = vpop.f32.mrf.mxu0 }
 0x178   : > { %3896 = vmatmul.msk.f32.gmra.mxu0 %vm555_vm0, %v3875_v26  ;;  %v1218_v26 = vadd.f32 %v1157_v45, %v1020_v22  ;;  %v1172_v45 = vpop.f32.mrf.mxu3  ;;  %v1480_v22 = vpop.permute.xlu1 %1479 }
 0x17d   : > { %v5158_v27 = vpop.f32.mrf.mxu0 }
 0x180   : > { %3897 = vmatmul.msk.f32.gmra.mxu0 %vm555_vm0, %v3876_v28  ;;  %v1175_v8 = vpop.f32.mrf.mxu3 }
 0x185   : > { %v5164_v30 = vpop.f32.mrf.mxu0 }
 0x188   : > { %3898 = vmatmul.msk.f32.gmra.mxu0 %vm555_vm0, %v3877_v31  ;;  %v786_v31 = vadd.f32 %v785_v35, %v5051_v57  ;;  %v3887_v57 = vld [vmem:[%s6350_s1 + $0x330] sm:$0xff]  ;;  %v789_v35 = vadd.f32 %v5182_v41, %v5074_v0  ;;  %v792_v0 = vadd.f32 %v5195_v48, %v5097_v7  ;;  %v795_v7 = vadd.f32 %v5216_v59, %v5113_v12 }
 0x18a   : > { %v1021_v40 = vadd.f32 %v962_v52, %v786_v31  ;;  %v1022_v52 = vadd.f32 %v965_v60, %v789_v35  ;;  %v1023_v60 = vadd.f32 %v968_v5, %v792_v0  ;;  %v1178_v5 = vpop.f32.mrf.mxu3 }
 0x18c   : > { %v1219_v44 = vadd.f32 %v1160_v53, %v1021_v40  ;;  %v1220_v53 = vadd.f32 %v1163_v63, %v1022_v52  ;;  %v1221_v14 = vadd.f32 %v1166_v6, %v1023_v60 }
 0x18d   : > { %v5170_v33 = vpop.f32.mrf.mxu0 }
 0x190   : > { %3899 = vmatmul.msk.f32.gmra.mxu0 %vm555_vm0, %v3878_v34  ;;  %v5245_v34 = vpop.f32.mrf.mxu1 }
 0x195   : > { %v5176_v36 = vpop.f32.mrf.mxu0 }
 0x198   : > { %3900 = vmatmul.msk.f32.gmra.mxu0 %vm555_vm0, %v3879_v38  ;;  %v5254_v56 = vpop.f32.mrf.mxu1 }
 0x19d   : > { %v5184_v42 = vpop.f32.mrf.mxu0 }
 0x1a0   : > { %3901 = vmatmul.msk.f32.gmra.mxu0 %vm555_vm0, %v3880_v43  ;;  %v974_v43 = vpop.f32.mrf.mxu2  ;;  %v5265_v63 = vpop.f32.mrf.mxu1 }
 0x1a5   : > { %v5190_v46 = vpop.f32.mrf.mxu0 }
 0x1a8   : > { %3902 = vmatmul.msk.f32.gmra.mxu0 %vm555_vm0, %v3881_v47  ;;  %v5274_v31 = vpop.f32.mrf.mxu1 }
 0x1ad   : > { %v5205_v54 = vpop.f32.mrf.mxu0 }
 0x1b0   : > { %3903 = vmatmul.msk.f32.gmra.mxu0 %vm555_vm0, %v3882_v55  ;;  %v815_v35 = vpop.f32.mrf.mxu1 }
 0x1b5   : > { %v5219_v61 = vpop.f32.mrf.mxu0 }
 0x1b8   : > { %3904 = vmatmul.msk.f32.gmra.mxu0 %vm555_vm0, %v3883_v62  ;;  %v977_v62 = vpop.f32.mrf.mxu2 }
 0x1bd   : > { %v5227_v2 = vpop.f32.mrf.mxu0 }
 0x1c0   : > { %3905 = vmatmul.msk.f32.gmra.mxu0 %vm555_vm0, %v3884_v3 }
 0x1c5   : > { %v1352_v11 = vpop.f32.mrf.mxu0 }
 0x1c6   : > { %v1415_v16 = vadd.f32 %v1352_v11, %v1217_v9  ;;  %v1475_v9 = vpop.permute.xlu2 %1474 }
 0x1c8   : > { %v1562_v20 = vadd.f32 %v1460_v18, %v1415_v16  ;;  %3906 = vmatmul.msk.f32.gmra.mxu0 %vm555_vm0, %v3885_v13  ;;  %v3889_v18 = vld [vmem:[%s6350_s1 + $0x340] sm:$0xff]  ;;  %s4499_s1 = sshra.s32 %s3662_s26, 4  ;;  %s4500_s1 = int_to_ptr.hbm [resolvable:$true] %s4499_s1 }
 0x1c9   : > { %s4501_s2 = scalar_lea.hbm %s4500_s1, 1  ;;  %p4506_p0 = scmp.lt.s32.totalorder %s4500_s1, %s6329_s15 }
 0x1ca   : > { %4399 = vtanh.f32 %v1562_v20  ;;  %v980_v20 = vpop.f32.mrf.mxu2  ;;  %p4502_p11 = scmp.ne.s32.totalorder %s4500_s1, %s4501_s2 }
 0x1cc   : > { %p4503_p12 = pnand %p4502_p11, %p4672_p5 }
 0x1cd   : > { %v1355_v28 = vpop.f32.mrf.mxu0 }
 0x1ce   : > { %v1416_v50 = vadd.f32 %v1355_v28, %v1218_v26  ;;  %v1485_v59 = vpop.permute.xlu2 %1484  ;;  %p4504_p13 = pneg %p4503_p12 }
 0x1d0   : > { %v4400_v38 = vpop.eup %4399  ;;  %v1563_v39 = vadd.f32 %v1465_v32, %v1416_v50  ;;  %3907 = vmatmul.msk.f32.gmra.mxu0 %vm555_vm0, %v3886_v29  ;;  %v1024_v29 = vadd.f32 %v971_v37, %v795_v7  ;;  %v798_v32 = vadd.f32 %v5225_v1, %v5122_v15 }
 0x1d1   : > { %3912 = vmatmul.msk.f32.vlgmr.msrb.gmra.mxu1 %vm1608_vm2, %v4400_v38 }
 0x1d2   : > { %4401 = vtanh.f32 %v1563_v39  ;;  %v1222_v6 = vadd.f32 %v1169_v24, %v1024_v29  ;;  %v983_v40 = vpop.f32.mrf.mxu2  ;;  %v801_v24 = vadd.f32 %v5234_v10, %v5128_v17  ;;  %v818_v17 = vpop.f32.mrf.mxu1 }
 0x1d4   : > { %v1026_v1 = vadd.f32 %v977_v62, %v801_v24 }
 0x1d5   : > { %v1358_v47 = vpop.f32.mrf.mxu0 }
 0x1d6   : > { %v1417_v49 = vadd.f32 %v1358_v47, %v1219_v44  ;;  %v1025_v44 = vadd.f32 %v974_v43, %v798_v32  ;;  %v1181_v47 = vpop.f32.mrf.mxu3  ;;  %v1224_v52 = vadd.f32 %v1175_v8, %v1026_v1  ;;  %v807_v8 = vadd.f32 %v5254_v56, %v5140_v21 }
 0x1d8   : > { %v4402_v55 = vpop.eup %4401  ;;  %v1564_v58 = vadd.f32 %v1470_v51, %v1417_v49  ;;  %3908 = vmatmul.msk.f32.gmra.mxu0 %vm555_vm0, %v3887_v57  ;;  %v1223_v57 = vadd.f32 %v1172_v45, %v1025_v44  ;;  %v1490_v51 = vpop.permute.xlu0 %1489  ;;  %v804_v45 = vadd.f32 %v5245_v34, %v5134_v19  ;;  %v1028_v34 = vadd.f32 %v983_v40, %v807_v8 }
 0x1d9   : > { %3913 = vmatmul.msk.f32.gmra.mxu1 %vm1608_vm2, %v4402_v55 }
 0x1da   : > { %4403 = vtanh.f32 %v1564_v58  ;;  %v986_v58 = vpop.f32.mrf.mxu2  ;;  %v1226_v7 = vadd.f32 %v1181_v47, %v1028_v34 }
 0x1dd   : > { %v1361_v3 = vpop.f32.mrf.mxu0 }
 0x1de   : > { %v1418_v41 = vadd.f32 %v1361_v3, %v1220_v53  ;;  %v1184_v53 = vpop.f32.mrf.mxu3 }
 0x1e0   : > { %v4404_v11 = vpop.eup %4403  ;;  %v1565_v13 = vadd.f32 %v1475_v9, %v1418_v41  ;;  %3909 = vmatmul.msk.f32.gmra.mxu0 %vm555_vm0, %v3888_v4  ;;  %v1495_v4 = vpop.permute.xlu1 %1494  ;;  %v1027_v41 = vadd.f32 %v980_v20, %v804_v45  ;;  %v810_v20 = vadd.f32 %v5265_v63, %v5146_v23 }
 0x1e1   : > { %3914 = vmatmul.msk.f32.gmra.mxu1 %vm1608_vm2, %v4404_v11 }
 0x1e2   : > { %4405 = vtanh.f32 %v1565_v13  ;;  %v1225_v9 = vadd.f32 %v1178_v5, %v1027_v41  ;;  %v989_v11 = vpop.f32.mrf.mxu2  ;;  %v1029_v29 = vadd.f32 %v986_v58, %v810_v20 }
 0x1e5   : > { %v1364_v16 = vpop.f32.mrf.mxu0 }
 0x1e6   : > { %v1419_v48 = vadd.f32 %v1364_v16, %v1221_v14  ;;  %v1187_v60 = vpop.f32.mrf.mxu3  ;;  %v1500_v14 = vpop.permute.xlu2 %1499 }
 0x1e8   : > { %v4406_v26 = vpop.eup %4405  ;;  %v1566_v28 = vadd.f32 %v1480_v22, %v1419_v48  ;;  %3910 = vmatmul.msk.f32.gmra.mxu0 %vm555_vm0, %v3889_v18  ;;  %v821_v18 = vpop.f32.mrf.mxu1 }
 0x1e9   : > { %3915 = vmatmul.msk.f32.gmra.mxu1 %vm1608_vm2, %v4406_v26 }
 0x1ea   : > { %4407 = vtanh.f32 %v1566_v28  ;;  %v992_v26 = vpop.f32.mrf.mxu2  ;;  %v1505_v28 = vpop.permute.xlu0 %1504 }
 0x1ed   : > { %v1367_v50 = vpop.f32.mrf.mxu0 }
 0x1ee   : > { %v1420_v12 = vadd.f32 %v1367_v50, %v1222_v6  ;;  %v1190_v56 = vpop.f32.mrf.mxu3  ;;  %v1227_v6 = vadd.f32 %v1184_v53, %v1029_v29  ;;  %v819_v53 = vadd.f32 %v818_v17, %v5164_v30 }
 0x1f0   : > { %v4408_v38 = vpop.eup %4407  ;;  %v1567_v39 = vadd.f32 %v1485_v59, %v1420_v12  ;;  %v824_v50 = vpop.f32.mrf.mxu1  ;;  %v813_v12 = vadd.f32 %v5274_v31, %v5152_v25 }
 0x1f1   : > { %3916 = vmatmul.msk.f32.gmra.mxu1 %vm1608_vm2, %v4408_v38  ;;  %v1510_v38 = vpop.permute.xlu1 %1509 }
 0x1f2   : > { %4409 = vtanh.f32 %v1567_v39  ;;  %v995_v63 = vpop.f32.mrf.mxu2  ;;  %v1030_v40 = vadd.f32 %v989_v11, %v813_v12  ;;  %v1520_v45 = vpop.permute.xlu0 %1519 }
 0x1f4   : > { %v1228_v47 = vadd.f32 %v1187_v60, %v1030_v40 }
 0x1f5   : > { %v1370_v37 = vpop.f32.mrf.mxu0 }
 0x1f6   : > { %v1421_v49 = vadd.f32 %v1370_v37, %v1223_v57  ;;  %v1193_v44 = vpop.f32.mrf.mxu3  ;;  %v816_v37 = vadd.f32 %v815_v35, %v5158_v27  ;;  %v1032_v35 = vadd.f32 %v995_v63, %v819_v53 }
 0x1f8   : > { %v4410_v55 = vpop.eup %4409  ;;  %v1568_v15 = vadd.f32 %v1490_v51, %v1421_v49  ;;  %v827_v24 = vpop.f32.mrf.mxu1  ;;  %v1031_v25 = vadd.f32 %v992_v26, %v816_v37 }
 0x1f9   : > { %3917 = vmatmul.msk.f32.gmra.mxu1 %vm1608_vm2, %v4410_v55  ;;  %v1515_v51 = vpop.permute.xlu2 %1514  ;;  %v1525_v8 = vpop.permute.xlu1 %1524 }
 0x1fa   : > { %4411 = vtanh.f32 %v1568_v15  ;;  %v998_v31 = vpop.f32.mrf.mxu2  ;;  %v1229_v1 = vadd.f32 %v1190_v56, %v1031_v25  ;;  %v1535_v29 = vpop.permute.xlu0 %1534 }
 0x1fd   : > { %v1373_v43 = vpop.f32.mrf.mxu0 }
 0x1fe   : > { %v1422_v3 = vadd.f32 %v1373_v43, %v1224_v52  ;;  %v1196_v58 = vpop.f32.mrf.mxu3 }
 0x200   : > { %v4412_v0 = vpop.eup %4411  ;;  %v1569_v10 = vadd.f32 %v1495_v4, %v1422_v3  ;;  %v830_v4 = vpop.f32.mrf.mxu1 }
 0x201   : > { %3918 = vmatmul.msk.f32.gmra.mxu1 %vm1608_vm2, %v4412_v0  ;;  %v1230_v0 = vadd.f32 %v1193_v44, %v1032_v35  ;;  %v1540_v40 = vpop.permute.xlu1 %1539 }
 0x202   : > { %4413 = vtanh.f32 %v1569_v10  ;;  %v1001_v10 = vpop.f32.mrf.mxu2 }
 0x205   : > { %v1376_v62 = vpop.f32.mrf.mxu0 }
 0x206   : > { %v1423_v13 = vadd.f32 %v1376_v62, %v1225_v9  ;;  %v822_v9 = vadd.f32 %v821_v18, %v5170_v33  ;;  %v1199_v62 = vpop.f32.mrf.mxu3 }
 0x208   : > { %v4414_v16 = vpop.eup %4413  ;;  %v1570_v19 = vadd.f32 %v1500_v14, %v1423_v13  ;;  %v1033_v30 = vadd.f32 %v998_v31, %v822_v9  ;;  %v833_v17 = vpop.f32.mrf.mxu1 }
 0x209   : > { %3919 = vmatmul.msk.f32.gmra.mxu1 %vm1608_vm2, %v4414_v16 }
 0x20a   : > { %4415 = vtanh.f32 %v1570_v19  ;;  %v1231_v14 = vadd.f32 %v1196_v58, %v1033_v30  ;;  %v825_v19 = vadd.f32 %v824_v50, %v5176_v36 }
 0x20c   : > { %v1034_v18 = vadd.f32 %v1001_v10, %v825_v19 }
 0x20d   : > { %v1379_v48 = vpop.f32.mrf.mxu0 }
 0x20e   : > { %v1424_v22 = vadd.f32 %v1379_v48, %v1226_v7  ;;  %v1004_v7 = vpop.f32.mrf.mxu2  ;;  %v1530_v48 = vpop.permute.xlu2 %1529  ;;  %v1232_v26 = vadd.f32 %v1199_v62, %v1034_v18 }
 0x20f   : > { %v1202_v33 = vpop.f32.mrf.mxu3 }
 0x210   : > { %v4416_v5 = vpop.eup %4415  ;;  %v1571_v21 = vadd.f32 %v1505_v28, %v1424_v22  ;;  %v836_v28 = vpop.f32.mrf.mxu1 }
 0x211   : > { %3920 = vmatmul.msk.f32.gmra.mxu1 %vm1608_vm2, %v4416_v5 }
 0x212   : > { %4417 = vtanh.f32 %v1571_v21  ;;  %v828_v21 = vadd.f32 %v827_v24, %v5184_v42 }
 0x214   : > { %v1035_v50 = vadd.f32 %v1004_v7, %v828_v21 }
 0x215   : > { %v1382_v32 = vpop.f32.mrf.mxu0 }
 0x216   : > { %v1425_v59 = vadd.f32 %v1382_v32, %v1227_v6  ;;  %v1007_v36 = vpop.f32.mrf.mxu2  ;;  %v1545_v25 = vpop.permute.xlu2 %1544 }
 0x217   : > { %v1205_v12 = vpop.f32.mrf.mxu3 }
 0x218   : > { %v4418_v39 = vpop.eup %4417  ;;  %v1572_v23 = vadd.f32 %v1510_v38, %v1425_v59  ;;  %v1233_v59 = vadd.f32 %v1202_v33, %v1035_v50 }
 0x219   : > { %3921 = vmatmul.msk.f32.gmra.mxu1 %vm1608_vm2, %v4418_v39  ;;  %v831_v39 = vadd.f32 %v830_v4, %v5190_v46 }
 0x21a   : > { %4419 = vtanh.f32 %v1572_v23  ;;  %v839_v23 = vpop.f32.mrf.mxu1 }
 0x21b   : > { %v1036_v42 = vadd.f32 %v1007_v36, %v831_v39  ;;  %v840_v9 = vadd.f32 %v839_v23, %v5227_v2  ;;  %v1758_v23 = vld [vmem:[%s6317_s3 + $0x10] sm:$0xff] }
 0x21d   : > { %v1385_v57 = vpop.f32.mrf.mxu0  ;;  %v1234_v37 = vadd.f32 %v1205_v12, %v1036_v42  ;;  %v1759_v42 = vld [vmem:[%s6317_s3 + $0x18] sm:$0xff] }
 0x21e   : > { %v1426_v49 = vadd.f32 %v1385_v57, %v1228_v47  ;;  %v1010_v57 = vpop.f32.mrf.mxu2  ;;  %v1560_v7 = vpop.permute.xlu2 %1559 }
 0x21f   : > { %v1208_v24 = vpop.f32.mrf.mxu3 }
 0x220   : > { %v4420_v55 = vpop.eup %4419  ;;  %v1573_v15 = vadd.f32 %v1515_v51, %v1426_v49  ;;  %v834_v51 = vadd.f32 %v833_v17, %v5205_v54 }
 0x221   : > { %3922 = vmatmul.msk.f32.gmra.mxu1 %vm1608_vm2, %v4420_v55 }
 0x222   : > { %4421 = vtanh.f32 %v1573_v15 }
 0x225   : > { %v1388_v52 = vpop.f32.mrf.mxu0 }
 0x226   : > { %v1427_v43 = vadd.f32 %v1388_v52, %v1229_v1  ;;  %v1037_v1 = vadd.f32 %v1010_v57, %v834_v51  ;;  %v1013_v52 = vpop.f32.mrf.mxu2  ;;  %v1764_v57 = vld [vmem:[%s6317_s3 + $0x40] sm:$0xff] }
 0x227   : > { %v1211_v4 = vpop.f32.mrf.mxu3  ;;  %v1768_v51 = vld [vmem:[%s6317_s3 + $0x60] sm:$0xff] }
 0x228   : > { %v4422_v3 = vpop.eup %4421  ;;  %v1574_v27 = vadd.f32 %v1520_v45, %v1427_v43  ;;  %v1235_v58 = vadd.f32 %v1208_v24, %v1037_v1  ;;  %v837_v43 = vadd.f32 %v836_v28, %v5219_v61  ;;  %v1766_v24 = vld [vmem:[%s6317_s3 + $0x50] sm:$0xff] }
 0x229   : > { %3923 = vmatmul.msk.f32.gmra.mxu1 %vm1608_vm2, %v4422_v3  ;;  %v1774_v1 = vld [vmem:[%s6317_s3 + $0x90] sm:$0xff] }
 0x22a   : > { %4423 = vtanh.f32 %v1574_v27  ;;  %v1550_v27 = vpop.permute.xlu0 %1549 }
 0x22d   : > { %v1391_v41 = vpop.f32.mrf.mxu0 }
 0x22e   : > { %v1428_v11 = vadd.f32 %v1391_v41, %v1230_v0  ;;  %v1038_v0 = vadd.f32 %v1013_v52, %v837_v43  ;;  %v1776_v52 = vld [vmem:[%s6317_s3 + $0xa0] sm:$0xf]  ;;  %v1775_v43 = vld [vmem:[%s6317_s3 + $0x98] sm:$0xff] }
 0x22f   : > { %v1214_v30 = vpop.f32.mrf.mxu3 }
 0x230   : > { %v4424_v13 = vpop.eup %4423  ;;  %v1575_v60 = vadd.f32 %v1525_v8, %v1428_v11  ;;  %v1236_v10 = vadd.f32 %v1211_v4, %v1038_v0  ;;  %v1016_v8 = vpop.f32.mrf.mxu2 }
 0x231   : > { %3924 = vmatmul.msk.f32.gmra.mxu1 %vm1608_vm2, %v4424_v13  ;;  %v1555_v13 = vpop.permute.xlu1 %1554  ;;  %v1039_v17 = vadd.f32 %v1016_v8, %v840_v9 }
 0x232   : > { %4425 = vtanh.f32 %v1575_v60 }
 0x235   : > { %v1394_v16 = vpop.f32.mrf.mxu0 }
 0x236   : > { %v1429_v34 = vadd.f32 %v1394_v16, %v1231_v14  ;;  %v1237_v14 = vadd.f32 %v1214_v30, %v1039_v17 }
 0x238   : > { %v4426_v20 = vpop.eup %4425  ;;  %v1576_v22 = vadd.f32 %v1530_v48, %v1429_v34 }
 0x239   : > { %3925 = vmatmul.msk.f32.gmra.mxu1 %vm1608_vm2, %v4426_v20 }
 0x23a   : > { %4427 = vtanh.f32 %v1576_v22 }
 0x23d   : > { %v1397_v5 = vpop.f32.mrf.mxu0 }
 0x23e   : > { %v1430_v56 = vadd.f32 %v1397_v5, %v1232_v26 }
 0x240   : > { %v4428_v6 = vpop.eup %4427  ;;  %v1577_v32 = vadd.f32 %v1535_v29, %v1430_v56 }
 0x241   : > { %3926 = vmatmul.msk.f32.gmra.mxu1 %vm1608_vm2, %v4428_v6 }
 0x242   : > { %4429 = vtanh.f32 %v1577_v32 }
 0x245   : > { %v1400_v38 = vpop.f32.mrf.mxu0 }
 0x246   : > { %v1431_v63 = vadd.f32 %v1400_v38, %v1233_v59  ;;  %v1756_v38 = vld [vmem:[%s6317_s3] sm:$0xff] }
 0x248   : > { %v4430_v44 = vpop.eup %4429  ;;  %v1578_v47 = vadd.f32 %v1540_v40, %v1431_v63  ;;  %v1760_v40 = vld [vmem:[%s6317_s3 + $0x20] sm:$0xff] }
 0x249   : > { %3927 = vmatmul.msk.f32.gmra.mxu1 %vm1608_vm2, %v4430_v44  ;;  %v1757_v44 = vld [vmem:[%s6317_s3 + $0x8] sm:$0xff] }
 0x24a   : > { %4431 = vtanh.f32 %v1578_v47  ;;  %v1762_v47 = vld [vmem:[%s6317_s3 + $0x30] sm:$0xff] }
 0x24d   : > { %v1403_v49 = vpop.f32.mrf.mxu0 }
 0x24e   : > { %v1432_v55 = vadd.f32 %v1403_v49, %v1234_v37  ;;  %v5307_v15 = vpop.f32.mrf.mxu1  ;;  %v1761_v37 = vld [vmem:[%s6317_s3 + $0x28] sm:$0xff]  ;;  %v1763_v49 = vld [vmem:[%s6317_s3 + $0x38] sm:$0xff] }
 0x250   : > { %v4432_v46 = vpop.eup %4431  ;;  %v1579_v31 = vadd.f32 %v1545_v25, %v1432_v55  ;;  %v1765_v55 = vld [vmem:[%s6317_s3 + $0x48] sm:$0xff]  ;;  %v1767_v25 = vld [vmem:[%s6317_s3 + $0x58] sm:$0xff] }
 0x251   : > { %3928 = vmatmul.msk.f32.gmra.mxu1 %vm1608_vm2, %v4432_v46  ;;  %v1772_v46 = vld [vmem:[%s6317_s3 + $0x80] sm:$0xff] }
 0x252   : > { %4433 = vtanh.f32 %v1579_v31  ;;  %v1769_v31 = vld [vmem:[%s6317_s3 + $0x68] sm:$0xff] }
 0x255   : > { %v1406_v53 = vpop.f32.mrf.mxu0 }
 0x256   : > { %v1433_v45 = vadd.f32 %v1406_v53, %v1235_v58  ;;  %v1696_v3 = vpop.f32.mrf.mxu1  ;;  %v1771_v58 = vld [vmem:[%s6317_s3 + $0x78] sm:$0xff]  ;;  %v1773_v53 = vld [vmem:[%s6317_s3 + $0x88] sm:$0xff] }
 0x258   : > { %v4434_v54 = vpop.eup %4433  ;;  %v1580_v35 = vadd.f32 %v1550_v27, %v1433_v45  ;;  %v1777_v45 = vld [vmem:[%s6317_s3 + $0xa8] sm:$0xf] }
 0x259   : > { %3929 = vmatmul.msk.f32.gmra.mxu1 %vm1608_vm2, %v4434_v54 }
 0x25a   : > { %4435 = vtanh.f32 %v1580_v35 }
 0x25d   : > { %v1409_v41 = vpop.f32.mrf.mxu0 }
 0x25e   : > { %v1434_v11 = vadd.f32 %v1409_v41, %v1236_v10  ;;  %v1699_v62 = vpop.f32.mrf.mxu1 }
 0x260   : > { %v4436_v60 = vpop.eup %4435  ;;  %v1581_v61 = vadd.f32 %v1555_v13, %v1434_v11 }
 0x261   : > { %3930 = vmatmul.msk.f32.gmra.mxu1 %vm1608_vm2, %v4436_v60 }
 0x262   : > { %4437 = vtanh.f32 %v1581_v61 }
 0x265   : > { %v1412_v16 = vpop.f32.mrf.mxu0 }
 0x266   : > { %v1435_v19 = vadd.f32 %v1412_v16, %v1237_v14  ;;  %v1702_v34 = vpop.f32.mrf.mxu1 }
 0x268   : > { %v4438_v48 = vpop.eup %4437  ;;  %v1582_v20 = vadd.f32 %v1560_v7, %v1435_v19 }
 0x269   : > { %3931 = vmatmul.msk.f32.gmra.mxu1 %vm1608_vm2, %v4438_v48 }
 0x26a   : > { %4439 = vtanh.f32 %v1582_v20 }
 0x26e   : > { %v1705_v2 = vpop.f32.mrf.mxu1 }
 0x270   : > { %v4440_v22 = vpop.eup %4439 }
 0x271   : > { %3932 = vmatmul.msk.f32.gmra.mxu1 %vm1608_vm2, %v4440_v22 }
 0x276   : > { %v1708_v33 = vpop.f32.mrf.mxu1 }
 0x27e   : > { %v1711_v18 = vpop.f32.mrf.mxu1 }
 0x286   : > { %v1714_v26 = vpop.f32.mrf.mxu1 }
 0x28e   : > { %v1717_v28 = vpop.f32.mrf.mxu1 }
 0x296   : > { %v1720_v5 = vpop.f32.mrf.mxu1 }
 0x29e   : > { %v1723_v21 = vpop.f32.mrf.mxu1 }
 0x2a6   : > { %v1726_v56 = vpop.f32.mrf.mxu1 }
 0x2ae   : > { %v1729_v29 = vpop.f32.mrf.mxu1 }
 0x2b6   : > { %v1732_v6 = vpop.f32.mrf.mxu1 }
 0x2be   : > { %v1735_v32 = vpop.f32.mrf.mxu1 }
 0x2c6   : > { %v1738_v36 = vpop.f32.mrf.mxu1 }
 0x2c7   : > { %1812 = vmatpush.msrb.mxu2 %v1738_v36 }
 0x2c9   : > { %1813 = vmatpush.msrb.mxu2 %v1735_v32 }
 0x2cb   : > { %1814 = vmatpush.msrb.mxu2 %v1732_v6 }
 0x2cd   : > { %1815 = vmatpush.msrb.mxu2 %v1729_v29 }
 0x2ce   : > { %v1741_v50 = vpop.f32.mrf.mxu1 }
 0x2cf   : > { %1816 = vmatpush.msrb.mxu2 %v1726_v56 }
 0x2d1   : > { %1817 = vmatpush.msrb.mxu2 %v1723_v21 }
 0x2d3   : > { %1818 = vmatpush.msrb.mxu2 %v1720_v5 }
 0x2d5   : > { %1819 = vmatpush.msrb.mxu2 %v1717_v28 }
 0x2d6   : > { %v1744_v12 = vpop.f32.mrf.mxu1 }
 0x2d7   : > { %1820 = vmatpush.msrb.mxu2 %v1714_v26 }
 0x2d9   : > { %1821 = vmatpush.msrb.mxu2 %v1711_v18 }
 0x2db   : > { %1822 = vmatpush.msrb.mxu2 %v1708_v33 }
 0x2dd   : > { %1823 = vmatpush.msrb.mxu2 %v1705_v2 }
 0x2de   : > { %v1747_v59 = vpop.f32.mrf.mxu1 }
 0x2df   : > { %1824 = vmatpush.msrb.mxu2 %v1702_v34 }
 0x2e1   : > { %1825 = vmatpush.msrb.mxu2 %v1699_v62 }
 0x2e3   : > { %1826 = vmatpush.msrb.mxu2 %v1696_v3 }
 0x2e5   : > { %1827 = vmatpush.msrb.mxu2 %v5307_v15  ;;  %v1770_v15 = vld [vmem:[%s6317_s3 + $0x70] sm:$0xff] }
 0x2e6   : > { %v1750_v39 = vpop.f32.mrf.mxu1  ;;  %1828 = vmatmul.f32.vlgmr.msrb.gmra.mxu2 %v1756_v38  ;;  %v2912_v38 = vld [vmem:[%s6320_s6 + $0x8] sm:$0xff] }
 0x2ee   : > { %v1753_v63 = vpop.f32.mrf.mxu1  ;;  %1831 = vmatmul.f32.gmra.mxu2 %v1758_v23  ;;  %v2911_v23 = vld [vmem:[%s6320_s6] sm:$0xff] }
 0x2ef   : > { %1873 = vmatpush.msrb.mxu3 %v1753_v63  ;;  %v2915_v63 = vld [vmem:[%s6320_s6 + $0x20] sm:$0xff] }
 0x2f1   : > { %1874 = vmatpush.msrb.mxu3 %v1750_v39  ;;  %v2919_v39 = vld [vmem:[%s6320_s6 + $0x40] sm:$0xff] }
 0x2f3   : > { %1875 = vmatpush.msrb.mxu3 %v1747_v59  ;;  %v2916_v59 = vld [vmem:[%s6320_s6 + $0x28] sm:$0xff] }
 0x2f5   : > { %1876 = vmatpush.msrb.mxu3 %v1744_v12  ;;  %v2913_v12 = vld [vmem:[%s6320_s6 + $0x10] sm:$0xff] }
 0x2f6   : > { %1834 = vmatmul.f32.gmra.mxu2 %v1760_v40  ;;  %v2922_v40 = vld [vmem:[%s6320_s6 + $0x58] sm:$0xff] }
 0x2f7   : > { %1877 = vmatpush.msrb.mxu3 %v1741_v50 }
 0x2f8   : > { %3933 = vmatmul.msk.f32.vlgmr.msrb.gmra.mxu3 %vm1778_vm3, %v1757_v44  ;;  %v2914_v44 = vld [vmem:[%s6320_s6 + $0x18] sm:$0xff] }
 0x2fe   : > { %1837 = vmatmul.f32.gmra.mxu2 %v1762_v47  ;;  %v2918_v47 = vld [vmem:[%s6320_s6 + $0x38] sm:$0xff] }
 0x300   : > { %3934 = vmatmul.msk.f32.gmra.mxu3 %vm1778_vm3, %v1759_v42  ;;  %v2925_v42 = vld [vmem:[%s6320_s6 + $0x70] sm:$0xff] }
 0x306   : > { %1840 = vmatmul.f32.gmra.mxu2 %v1764_v57  ;;  %v2917_v57 = vld [vmem:[%s6320_s6 + $0x30] sm:$0xff] }
 0x308   : > { %3935 = vmatmul.msk.f32.gmra.mxu3 %vm1778_vm3, %v1761_v37  ;;  %v2921_v37 = vld [vmem:[%s6320_s6 + $0x50] sm:$0xff] }
 0x30e   : > { %1843 = vmatmul.f32.gmra.mxu2 %v1766_v24  ;;  %v2928_v24 = vld [vmem:[%s6320_s6 + $0x88] sm:$0xff] }
 0x310   : > { %3936 = vmatmul.msk.f32.gmra.mxu3 %vm1778_vm3, %v1763_v49  ;;  %v2920_v49 = vld [vmem:[%s6320_s6 + $0x48] sm:$0xff] }
 0x316   : > { %1846 = vmatmul.f32.gmra.mxu2 %v1768_v51  ;;  %v2924_v51 = vld [vmem:[%s6320_s6 + $0x68] sm:$0xff] }
 0x318   : > { %3937 = vmatmul.msk.f32.gmra.mxu3 %vm1778_vm3, %v1765_v55 }
 0x31e   : > { %1849 = vmatmul.f32.gmra.mxu2 %v1770_v15  ;;  %v2923_v15 = vld [vmem:[%s6320_s6 + $0x60] sm:$0xff] }
 0x320   : > { %3938 = vmatmul.msk.f32.gmra.mxu3 %vm1778_vm3, %v1767_v25  ;;  %v2927_v25 = vld [vmem:[%s6320_s6 + $0x80] sm:$0xff] }
 0x326   : > { %1852 = vmatmul.f32.gmra.mxu2 %v1772_v46  ;;  %v2926_v46 = vld [vmem:[%s6320_s6 + $0x78] sm:$0xff] }
 0x328   : > { %3939 = vmatmul.msk.f32.gmra.mxu3 %vm1778_vm3, %v1769_v31 }
 0x32e   : > { %1855 = vmatmul.f32.gmra.mxu2 %v1774_v1  ;;  %v2930_v1 = vld [vmem:[%s6320_s6 + $0x98] sm:$0xff] }
 0x330   : > { %3940 = vmatmul.msk.f32.gmra.mxu3 %vm1778_vm3, %v1771_v58  ;;  %v1912_v58 = vld [vmem:[%s6319_s5] sm:$0xff] }
 0x336   : > { %1858 = vmatmul.f32.gmra.mxu2 %v1776_v52 }
 0x338   : > { %3941 = vmatmul.msk.f32.gmra.mxu3 %vm1778_vm3, %v1773_v53  ;;  %v2929_v53 = vld [vmem:[%s6320_s6 + $0x90] sm:$0xff] }
 0x340   : > { %3942 = vmatmul.msk.f32.gmra.mxu3 %vm1778_vm3, %v1775_v43  ;;  %v1913_v43 = vld [vmem:[%s6319_s5 + $0x8] sm:$0xff] }
 0x348   : > { %3943 = vmatmul.msk.f32.gmra.mxu3 %vm1778_vm3, %v1777_v45 }
 0x369   : > { %v1829_v3 = vpop.f32.mrf.mxu2 }
 0x371   : > { %v1832_v4 = vpop.f32.mrf.mxu2 }
 0x379   : > { %v1835_v27 = vpop.f32.mrf.mxu2 }
 0x37b   : > { %v1879_v54 = vpop.f32.mrf.mxu3 }
 0x37c   : > { %v1880_v48 = vadd.f32 %v1879_v54, %v1829_v3 }
 0x381   : > { %v1838_v0 = vpop.f32.mrf.mxu2 }
 0x383   : > { %v1882_v35 = vpop.f32.mrf.mxu3 }
 0x384   : > { %v1883_v34 = vadd.f32 %v1882_v35, %v1832_v4 }
 0x386   : > { %v4319_v20 = vpack.i.bf16 %v1880_v48, %v1883_v34 }
 0x389   : > { %v1841_v41 = vpop.f32.mrf.mxu2 }
 0x38b   : > { %v1885_v10 = vpop.f32.mrf.mxu3 }
 0x38c   : > { %v1886_v56 = vadd.f32 %v1885_v10, %v1835_v27 }
 0x391   : > { %v1844_v11 = vpop.f32.mrf.mxu2 }
 0x393   : > { %v1888_v9 = vpop.f32.mrf.mxu3 }
 0x394   : > { %v1889_v5 = vadd.f32 %v1888_v9, %v1838_v0  ;;  %v1914_v0 = vld [vmem:[%s6319_s5 + $0x10] sm:$0xff] }
 0x396   : > { %v4314_v6 = vpack.i.bf16 %v1886_v56, %v1889_v5 }
 0x399   : > { %v1847_v8 = vpop.f32.mrf.mxu2 }
 0x39b   : > { %v1891_v62 = vpop.f32.mrf.mxu3 }
 0x39c   : > { %v1892_v36 = vadd.f32 %v1891_v62, %v1841_v41 }
 0x3a1   : > { %v1850_v61 = vpop.f32.mrf.mxu2 }
 0x3a3   : > { %v1894_v13 = vpop.f32.mrf.mxu3 }
 0x3a4   : > { %v1895_v32 = vadd.f32 %v1894_v13, %v1844_v11 }
 0x3a6   : > { %v4309_v50 = vpack.i.bf16 %v1892_v36, %v1895_v32 }
 0x3a9   : > { %v1853_v16 = vpop.f32.mrf.mxu2 }
 0x3ab   : > { %v1897_v60 = vpop.f32.mrf.mxu3 }
 0x3ac   : > { %v1898_v17 = vadd.f32 %v1897_v60, %v1847_v8  ;;  %v1915_v60 = vld [vmem:[%s6319_s5 + $0x18] sm:$0xff] }
 0x3b1   : > { %v1856_v2 = vpop.f32.mrf.mxu2 }
 0x3b3   : > { %v1900_v30 = vpop.f32.mrf.mxu3 }
 0x3b4   : > { %v1901_v14 = vadd.f32 %v1900_v30, %v1850_v61 }
 0x3b6   : > { %v4304_v19 = vpack.i.bf16 %v1898_v17, %v1901_v14 }
 0x3b8   : > { %4305 = vrot.lane.b32.xlu2 %v4304_v19, %s6352_s20 }
 0x3b9   : > { %v1859_v28 = vpop.f32.mrf.mxu2 }
 0x3bb   : > { %v1903_v7 = vpop.f32.mrf.mxu3 }
 0x3bc   : > { %v1904_v33 = vadd.f32 %v1903_v7, %v1853_v16  ;;  %v1916_v7 = vld [vmem:[%s6319_s5 + $0x20] sm:$0xff] }
 0x3c0   : > { %4320 = vrot.lane.b32.xlu2 %v4319_v20, %s6352_s20 }
 0x3c3   : > { %v1906_v22 = vpop.f32.mrf.mxu3 }
 0x3c4   : > { %v1907_v18 = vadd.f32 %v1906_v22, %v1856_v2  ;;  %v3945_v22 = vld [vmem:[%s6319_s5 + $0xa8] sm:$0xff] }
 0x3c6   : > { %v4299_v26 = vpack.i.bf16 %v1904_v33, %v1907_v18 }
 0x3c8   : > { %4300 = vrot.lane.b32.xlu1 %v4299_v26, %s6352_s20  ;;  %4325 = vrot.lane.b32.xlu2 %v4299_v26, %s6353_s24 }
 0x3cb   : > { %v1909_v21 = vpop.f32.mrf.mxu3 }
 0x3cc   : > { %v1910_v29 = vadd.f32 %v1909_v21, %v1859_v28 }
 0x3ce   : > { %1984 = vrot.lane.b32.xlu0 %v1910_v29, %s6352_s20  ;;  %3985 = vmatpush.msk.msra.mxu3 %vm1672_vm1, %v1910_v29 }
 0x3d0   : > { %2204 = vmatpush.msra.mxu3 %v1907_v18  ;;  %4315 = vrot.lane.b32.xlu1 %v4314_v6, %s6352_s20 }
 0x3d1   : > { %4335 = vrot.lane.b32.xlu2 %v4299_v26, %s6354_s17 }
 0x3d2   : > { %2205 = vmatpush.msra.mxu3 %v1904_v33 }
 0x3d4   : > { %2206 = vmatpush.msra.mxu3 %v1901_v14 }
 0x3d6   : > { %2207 = vmatpush.msra.mxu3 %v1898_v17  ;;  %4310 = vrot.lane.b32.xlu0 %v4309_v50, %s6352_s20  ;;  %s486_s20 = scalar_lea.vmem [#allocation2], %s485_s25 }
 0x3d8   : > { %2208 = vmatpush.msra.mxu3 %v1895_v32  ;;  %4345 = vrot.lane.b32.xlu1 %v4304_v19, %s6355_s30 }
 0x3d9   : > { %4350 = vrot.lane.b32.xlu2 %v4304_v19, %s6354_s17 }
 0x3da   : > { %2209 = vmatpush.msra.mxu3 %v1892_v36 }
 0x3dc   : > { %2210 = vmatpush.msra.mxu3 %v1889_v5 }
 0x3de   : > { %4330 = vrot.lane.b32.xlu0 %v4299_v26, %s6355_s30  ;;  %2211 = vmatpush.msra.mxu3 %v1886_v56  ;;  %v1917_v26 = vld [vmem:[%s6319_s5 + $0x28] sm:$0xff] }
 0x3e0   : > { %4360 = vrot.lane.b32.xlu1 %v4309_v50, %s6355_s30  ;;  %2212 = vmatpush.msra.mxu3 %v1883_v34  ;;  %v3944_v34 = vld [vmem:[%s6319_s5 + $0xa0] sm:$0xff] }
 0x3e1   : > { %4365 = vrot.lane.b32.xlu2 %v4309_v50, %s6354_s17 }
 0x3e2   : > { %2213 = vmatpush.msra.mxu3 %v1880_v48 }
 0x3e3   : > { %3986 = vmatmul.msk.f32.vlgmr.msra.gmra.mxu3 %vm1996_vm4, %v1912_v58 }
 0x3e6   : > { %4340 = vrot.lane.b32.xlu0 %v4304_v19, %s6353_s24 }
 0x3e8   : > { %2316 = vrot.lane.b32.xlu1 %v1910_v29, %s6355_s30 }
 0x3e9   : > { %4380 = vrot.lane.b32.xlu2 %v4314_v6, %s6354_s17 }
 0x3eb   : > { %3987 = vmatmul.msk.f32.gmra.mxu3 %vm1996_vm4, %v1913_v43 }
 0x3ee   : > { %2740 = vrot.lane.b32.xlu0 %v1910_v29, %s6353_s24 }
 0x3f0   : > { %2528 = vrot.lane.b32.xlu1 %v1910_v29, %s6354_s17 }
 0x3f1   : > { %4395 = vrot.lane.b32.xlu2 %v4319_v20, %s6354_s17  ;;  %s3659_s17 = sshll.u32 %s486_s20, 4  ;;  %s3660_s17 = int_to_ptr.vmem [resolvable:$true] %s3659_s17 }
 0x3f3   : > { %3988 = vmatmul.msk.f32.gmra.mxu3 %vm1996_vm4, %v1914_v0  ;;  %v4047_v0 = vld [vmem:[%s6319_s5 + $0x1e0] sm:$0xff] }
 0x3f6   : > { %4355 = vrot.lane.b32.xlu0 %v4309_v50, %s6353_s24  ;;  %v3946_v50 = vld [vmem:[%s6319_s5 + $0xb0] sm:$0xff] }
 0x3f8   : > { %4375 = vrot.lane.b32.xlu1 %v4314_v6, %s6355_s30 }
 0x3f9   : > { %2943 = vperm.xlu2 %4296, %v2913_v12  }
 0x3fb   : > { %3989 = vmatmul.msk.f32.gmra.mxu3 %vm1996_vm4, %v1915_v60  ;;  %v1921_v60 = vld [vmem:[%s6319_s5 + $0x48] sm:$0xff] }
 0x3fe   : > { %4370 = vrot.lane.b32.xlu0 %v4314_v6, %s6353_s24 }
 0x400   : > { %4390 = vrot.lane.b32.xlu1 %v4319_v20, %s6355_s30  ;;  %s4505_s30 = scalar_lea.hbm %s6329_s15, 2 }
 0x401   : > { %2958 = vperm.xlu2 %4296, %v2916_v59   ;;  %p4507_p1 = scmp.lt.s32.totalorder %s4505_s30, %s4501_s2 }
 0x403   : > { %3990 = vmatmul.msk.f32.gmra.mxu3 %vm1996_vm4, %v1916_v7  ;;  %v1923_v7 = vld [vmem:[%s6319_s5 + $0x58] sm:$0xff]  ;;  %p4508_p2 = por %p4507_p1, %p4506_p0 }
 0x405   : > { %p4509_p3 = pnand %p4508_p2, %p4504_p13 }
 0x406   : > { %4385 = vrot.lane.b32.xlu0 %v4319_v20, %s6353_s24 }
 0x408   : > { %2938 = vperm.xlu1 %4298, %v2912_v38  }
 0x409   : > { %2973 = vperm.xlu2 %4296, %v2919_v39   ;;  %v1918_v39 = vld [vmem:[%s6319_s5 + $0x30] sm:$0xff] }
 0x40b   : > { %3991 = vmatmul.msk.f32.gmra.mxu3 %vm1996_vm4, %v1917_v26  ;;  %v4052_v26 = vld [vmem:[%s6319_s5 + $0x208] sm:$0xff] }
 0x40e   : > { %2933 = vperm.xlu0 %4297, %v2911_v23  }
 0x410   : > { %2953 = vperm.xlu1 %4298, %v2915_v63  }
 0x411   : > { %2988 = vperm.xlu2 %4296, %v2922_v40  }
 0x412   : > { %v4306_v55 = vpop.permute.xlu2 %4305 }
 0x413   : > { %v4307_v35 = vunpack.i.l.bf16 %v4306_v55  ;;  %v4308_v10 = vunpack.i.h.bf16 %v4306_v55  ;;  %3992 = vmatmul.msk.f32.gmra.mxu3 %vm1996_vm4, %v1918_v39  ;;  %v1928_v39 = vld [vmem:[%s6319_s5 + $0x80] sm:$0xff] }
 0x416   : > { %2948 = vperm.xlu0 %4297, %v2914_v44  }
 0x418   : > { %2968 = vperm.xlu1 %4298, %v2918_v47  }
 0x419   : > { %3003 = vperm.xlu2 %4296, %v2925_v42  }
 0x41a   : > { %v4321_v31 = vpop.permute.xlu2 %4320 }
 0x41b   : > { %v4322_v17 = vunpack.i.l.bf16 %v4321_v31  ;;  %v4323_v16 = vunpack.i.h.bf16 %v4321_v31 }
 0x41e   : > { %2963 = vperm.xlu0 %4297, %v2917_v57  }
 0x420   : > { %2983 = vperm.xlu1 %4298, %v2921_v37  }
 0x421   : > { %3018 = vperm.xlu2 %4296, %v2928_v24  }
 0x422   : > { %v5486_v45 = vpop.permute.xlu2 %4325 }
 0x423   : > { %v4327_v56 = vunpack.i.l.bf16 %v5486_v45  ;;  %v4328_v36 = vunpack.i.h.bf16 %v5486_v45 }
 0x426   : > { %2978 = vperm.xlu0 %4297, %v2920_v49  }
 0x428   : > { %2998 = vperm.xlu1 %4298, %v2924_v51   ;;  %v3947_v51 = vld [vmem:[%s6319_s5 + $0xb8] sm:$0xff] }
 0x42b   : > { %v4336_v9 = vpop.permute.xlu2 %4335 }
 0x42c   : > { %v4337_v6 = vunpack.i.l.bf16 %v4336_v9  ;;  %v4338_v59 = vunpack.i.h.bf16 %v4336_v9 }
 0x42e   : > { %2993 = vperm.xlu0 %4297, %v2923_v15  }
 0x430   : > { %3013 = vperm.xlu1 %4298, %v2927_v25   ;;  %v1919_v25 = vld [vmem:[%s6319_s5 + $0x38] sm:$0xff] }
 0x431   : > { %3993 = vmatmul.msk.f32.gmra.mxu3 %vm1996_vm4, %v1919_v25  ;;  %v4018_v25 = vld [vmem:[%s6319_s5 + $0x1a0] sm:$0xff] }
 0x433   : > { %v4351_v19 = vpop.permute.xlu2 %4350 }
 0x434   : > { %v4352_v63 = vunpack.i.l.bf16 %v4351_v19  ;;  %v4353_v42 = vunpack.i.h.bf16 %v4351_v19  ;;  %v4009_v19 = vld [vmem:[%s6319_s5 + $0x158] sm:$0xff] }
 0x436   : > { %3008 = vperm.xlu0 %4297, %v2926_v46  }
 0x438   : > { %3028 = vperm.xlu1 %4298, %v2930_v1  }
 0x43a   : > { %v4301_v52 = vpop.permute.xlu1 %4300 }
 0x43b   : > { %v4302_v4 = vunpack.i.l.bf16 %v4301_v52  ;;  %v4303_v54 = vunpack.i.h.bf16 %v4301_v52  ;;  %v4366_v33 = vpop.permute.xlu2 %4365 }
 0x43c   : > { %v4367_v24 = vunpack.i.l.bf16 %v4366_v33  ;;  %v4368_v15 = vunpack.i.h.bf16 %v4366_v33  ;;  %v3953_v33 = vld [vmem:[%s6319_s5 + $0xe8] sm:$0xff] }
 0x43e   : > { %3023 = vperm.xlu0 %4297, %v2929_v53  }
 0x440   : > { %v1985_v3 = vpop.permute.xlu0 %1984 }
 0x441   : > { %3964 = vmatpush.msk.msra.mxu2 %vm1672_vm1, %v1985_v3 }
 0x442   : > { %v4316_v27 = vpop.permute.xlu1 %4315 }
 0x443   : > { %2065 = vmatpush.msra.mxu2 %v4302_v4  ;;  %v4317_v13 = vunpack.i.l.bf16 %v4316_v27  ;;  %v4318_v61 = vunpack.i.h.bf16 %v4316_v27  ;;  %v4381_v23 = vpop.permute.xlu2 %4380  ;;  %v3948_v4 = vld [vmem:[%s6319_s5 + $0xc0] sm:$0xff] }
 0x444   : > { %v4382_v46 = vunpack.i.l.bf16 %v4381_v23  ;;  %v4383_v52 = vunpack.i.h.bf16 %v4381_v23  ;;  %v3957_v23 = vld [vmem:[%s6319_s5 + $0x108] sm:$0xff] }
 0x445   : > { %2066 = vmatpush.msra.mxu2 %v4303_v54  ;;  %v4006_v54 = vld [vmem:[%s6319_s5 + $0x140] sm:$0xff] }
 0x447   : > { %2067 = vmatpush.msra.mxu2 %v4307_v35 }
 0x448   : > { %v4311_v41 = vpop.permute.xlu0 %4310 }
 0x449   : > { %v4312_v11 = vunpack.i.l.bf16 %v4311_v41  ;;  %2068 = vmatpush.msra.mxu2 %v4308_v10  ;;  %v4313_v8 = vunpack.i.h.bf16 %v4311_v41  ;;  %v1920_v10 = vld [vmem:[%s6319_s5 + $0x40] sm:$0xff] }
 0x44a   : > { %v4346_v62 = vpop.permute.xlu1 %4345  ;;  %3994 = vmatmul.msk.f32.gmra.mxu3 %vm1996_vm4, %v1920_v10  ;;  %v4088_v10 = vld [vmem:[%s6319_s5 + $0x280] sm:$0xff] }
 0x44b   : > { %2069 = vmatpush.msra.mxu2 %v4312_v11  ;;  %v4347_v28 = vunpack.i.l.bf16 %v4346_v62  ;;  %v4348_v21 = vunpack.i.h.bf16 %v4346_v62  ;;  %v4396_v1 = vpop.permute.xlu2 %4395  ;;  %v3949_v62 = vld [vmem:[%s6319_s5 + $0xc8] sm:$0xff] }
 0x44c   : > { %v4397_v3 = vunpack.i.l.bf16 %v4396_v1  ;;  %v4398_v35 = vunpack.i.h.bf16 %v4396_v1  ;;  %v3961_v1 = vld [vmem:[%s6319_s5 + $0x128] sm:$0xff] }
 0x44d   : > { %2070 = vmatpush.msra.mxu2 %v4313_v8  ;;  %v4007_v8 = vld [vmem:[%s6319_s5 + $0x148] sm:$0xff] }
 0x44f   : > { %2071 = vmatpush.msra.mxu2 %v4317_v13  ;;  %v4048_v13 = vld [vmem:[%s6319_s5 + $0x1e8] sm:$0xff] }
 0x450   : > { %v4331_v30 = vpop.permute.xlu0 %4330 }
 0x451   : > { %2072 = vmatpush.msra.mxu2 %v4318_v61  ;;  %v4332_v2 = vunpack.i.l.bf16 %v4331_v30  ;;  %v4333_v18 = vunpack.i.h.bf16 %v4331_v30  ;;  %v3950_v61 = vld [vmem:[%s6319_s5 + $0xd0] sm:$0xff] }
 0x452   : > { %v4361_v14 = vpop.permute.xlu1 %4360  ;;  %3995 = vmatmul.msk.f32.gmra.mxu3 %vm1996_vm4, %v1921_v60  ;;  %v4008_v30 = vld [vmem:[%s6319_s5 + $0x150] sm:$0xff] }
 0x453   : > { %2073 = vmatpush.msra.mxu2 %v4322_v17  ;;  %v4362_v32 = vunpack.i.l.bf16 %v4361_v14  ;;  %v4363_v12 = vunpack.i.h.bf16 %v4361_v14  ;;  %v4049_v17 = vld [vmem:[%s6319_s5 + $0x1f0] sm:$0xff] }
 0x454   : > { %v1922_v14 = vld [vmem:[%s6319_s5 + $0x50] sm:$0xff] }
 0x455   : > { %2074 = vmatpush.msra.mxu2 %v4323_v16  ;;  %v3951_v16 = vld [vmem:[%s6319_s5 + $0xd8] sm:$0xff] }
 0x456   : > { %3965 = vmatmul.msk.f32.vlgmr.msra.gmra.mxu2 %vm1996_vm4, %v3944_v34  ;;  %v4050_v34 = vld [vmem:[%s6319_s5 + $0x1f8] sm:$0xff] }
 0x458   : > { %v4341_v48 = vpop.permute.xlu0 %4340 }
 0x459   : > { %v4342_v38 = vunpack.i.l.bf16 %v4341_v48  ;;  %v4343_v40 = vunpack.i.h.bf16 %v4341_v48  ;;  %v3952_v48 = vld [vmem:[%s6319_s5 + $0xe0] sm:$0xff] }
 0x45a   : > { %v2317_v20 = vpop.permute.xlu1 %2316  ;;  %3996 = vmatmul.msk.f32.gmra.mxu3 %vm1996_vm4, %v1922_v14 }
 0x45b   : > { %4026 = vmatpush.msk.msra.mxu0 %vm1672_vm1, %v2317_v20  ;;  %v4010_v20 = vld [vmem:[%s6319_s5 + $0x160] sm:$0xff] }
 0x45d   : > { %2396 = vmatpush.msra.mxu0 %v4332_v2  ;;  %v4051_v2 = vld [vmem:[%s6319_s5 + $0x200] sm:$0xff] }
 0x45e   : > { %3966 = vmatmul.msk.f32.gmra.mxu2 %vm1996_vm4, %v3945_v22  ;;  %v1924_v22 = vld [vmem:[%s6319_s5 + $0x60] sm:$0xff] }
 0x45f   : > { %2397 = vmatpush.msra.mxu0 %v4333_v18  ;;  %v4011_v18 = vld [vmem:[%s6319_s5 + $0x168] sm:$0xff] }
 0x460   : > { %v2741_v5 = vpop.permute.xlu0 %2740 }
 0x461   : > { %2398 = vmatpush.msra.mxu0 %v4347_v28  ;;  %4108 = vmatpush.msk.msrb.mxu2 %vm1672_vm1, %v2741_v5  ;;  %v1925_v28 = vld [vmem:[%s6319_s5 + $0x68] sm:$0xff]  ;;  %v3954_v5 = vld [vmem:[%s6319_s5 + $0xf0] sm:$0xff] }
 0x462   : > { %v2529_v29 = vpop.permute.xlu1 %2528  ;;  %3997 = vmatmul.msk.f32.gmra.mxu3 %vm1996_vm4, %v1923_v7 }
 0x463   : > { %2399 = vmatpush.msra.mxu0 %v4348_v21  ;;  %4067 = vmatpush.msk.msra.mxu1 %vm1672_vm1, %v2529_v29  ;;  %v4012_v21 = vld [vmem:[%s6319_s5 + $0x170] sm:$0xff] }
 0x464   : > { %2820 = vmatpush.msrb.mxu2 %v4327_v56  ;;  %v4053_v56 = vld [vmem:[%s6319_s5 + $0x210] sm:$0xff] }
 0x465   : > { %2400 = vmatpush.msra.mxu0 %v4362_v32  ;;  %2608 = vmatpush.msra.mxu1 %v4337_v6  ;;  %v1926_v29 = vld [vmem:[%s6319_s5 + $0x70] sm:$0xff]  ;;  %v3955_v6 = vld [vmem:[%s6319_s5 + $0xf8] sm:$0xff] }
 0x466   : > { %2821 = vmatpush.msrb.mxu2 %v4328_v36  ;;  %v4013_v32 = vld [vmem:[%s6319_s5 + $0x178] sm:$0xff] }
 0x467   : > { %3967 = vmatmul.msk.f32.gmra.mxu2 %vm1996_vm4, %v3946_v50  ;;  %2401 = vmatpush.msra.mxu0 %v4363_v12  ;;  %v4054_v36 = vld [vmem:[%s6319_s5 + $0x218] sm:$0xff]  ;;  %v3956_v12 = vld [vmem:[%s6319_s5 + $0x100] sm:$0xff] }
 0x468   : > { %2609 = vmatpush.msra.mxu1 %v4338_v59  ;;  %2822 = vmatpush.msrb.mxu2 %v4342_v38  ;;  %v4356_v44 = vpop.permute.xlu0 %4355  ;;  %v1927_v50 = vld [vmem:[%s6319_s5 + $0x78] sm:$0xff]  ;;  %v4014_v59 = vld [vmem:[%s6319_s5 + $0x180] sm:$0xff] }
 0x469   : > { %v4357_v47 = vunpack.i.l.bf16 %v4356_v44  ;;  %v4358_v49 = vunpack.i.h.bf16 %v4356_v44  ;;  %v4055_v38 = vld [vmem:[%s6319_s5 + $0x220] sm:$0xff]  ;;  %v1929_v44 = vld [vmem:[%s6319_s5 + $0x88] sm:$0xff] }
 0x46a   : > { %2610 = vmatpush.msra.mxu1 %v4352_v63  ;;  %2823 = vmatpush.msrb.mxu2 %v4343_v40  ;;  %v4376_v57 = vpop.permute.xlu1 %4375  ;;  %v4015_v63 = vld [vmem:[%s6319_s5 + $0x188] sm:$0xff] }
 0x46b   : > { %v4377_v37 = vunpack.i.l.bf16 %v4376_v57  ;;  %v4378_v55 = vunpack.i.h.bf16 %v4376_v57  ;;  %3998 = vmatmul.msk.f32.gmra.mxu3 %vm1996_vm4, %v1924_v22  ;;  %v4056_v40 = vld [vmem:[%s6319_s5 + $0x228] sm:$0xff]  ;;  %v4057_v57 = vld [vmem:[%s6319_s5 + $0x230] sm:$0xff] }
 0x46c   : > { %2611 = vmatpush.msra.mxu1 %v4353_v42  ;;  %2824 = vmatpush.msrb.mxu2 %v4357_v47  ;;  %v3958_v47 = vld [vmem:[%s6319_s5 + $0x110] sm:$0xff] }
 0x46d   : > { %2402 = vmatpush.msra.mxu0 %v4377_v37  ;;  %v4016_v42 = vld [vmem:[%s6319_s5 + $0x190] sm:$0xff] }
 0x46e   : > { %2612 = vmatpush.msra.mxu1 %v4367_v24  ;;  %2825 = vmatpush.msrb.mxu2 %v4358_v49  ;;  %v1930_v37 = vld [vmem:[%s6319_s5 + $0x90] sm:$0xff]  ;;  %v3959_v24 = vld [vmem:[%s6319_s5 + $0x118] sm:$0xff] }
 0x46f   : > { %3968 = vmatmul.msk.f32.gmra.mxu2 %vm1996_vm4, %v3947_v51  ;;  %2403 = vmatpush.msra.mxu0 %v4378_v55  ;;  %v4017_v49 = vld [vmem:[%s6319_s5 + $0x198] sm:$0xff] }
 0x470   : > { %2613 = vmatpush.msra.mxu1 %v4368_v15  ;;  %v4371_v31 = vpop.permute.xlu0 %4370  ;;  %v4058_v51 = vld [vmem:[%s6319_s5 + $0x238] sm:$0xff]  ;;  %v3960_v15 = vld [vmem:[%s6319_s5 + $0x120] sm:$0xff] }
 0x471   : > { %v4372_v58 = vunpack.i.l.bf16 %v4371_v31  ;;  %v4373_v43 = vunpack.i.h.bf16 %v4371_v31  ;;  %v1931_v55 = vld [vmem:[%s6319_s5 + $0x98] sm:$0xff] }
 0x472   : > { %2614 = vmatpush.msra.mxu1 %v4382_v46  ;;  %v4391_v53 = vpop.permute.xlu1 %4390  ;;  %v4059_v46 = vld [vmem:[%s6319_s5 + $0x240] sm:$0xff] }
 0x473   : > { %v4392_v45 = vunpack.i.l.bf16 %v4391_v53  ;;  %2826 = vmatpush.msrb.mxu2 %v4372_v58  ;;  %v4393_v27 = vunpack.i.h.bf16 %v4391_v53  ;;  %3999 = vmatmul.msk.f32.gmra.mxu3 %vm1996_vm4, %v1925_v28  ;;  %v4019_v58 = vld [vmem:[%s6319_s5 + $0x1a8] sm:$0xff] }
 0x474   : > { %2615 = vmatpush.msra.mxu1 %v4383_v52  ;;  %v4060_v52 = vld [vmem:[%s6319_s5 + $0x248] sm:$0xff] }
 0x475   : > { %2404 = vmatpush.msra.mxu0 %v4392_v45  ;;  %2827 = vmatpush.msrb.mxu2 %v4373_v43  ;;  %v3962_v43 = vld [vmem:[%s6319_s5 + $0x130] sm:$0xff] }
 0x476   : > { %2616 = vmatpush.msra.mxu1 %v4397_v3  ;;  %v4020_v45 = vld [vmem:[%s6319_s5 + $0x1b0] sm:$0xff] }
 0x477   : > { %3969 = vmatmul.msk.f32.gmra.mxu2 %vm1996_vm4, %v3948_v4  ;;  %2405 = vmatpush.msra.mxu0 %v4393_v27  ;;  %v4061_v3 = vld [vmem:[%s6319_s5 + $0x250] sm:$0xff]  ;;  %v3963_v27 = vld [vmem:[%s6319_s5 + $0x138] sm:$0xff] }
 0x478   : > { %2617 = vmatpush.msra.mxu1 %v4398_v35  ;;  %4027 = vmatmul.msk.f32.vlgmr.msra.gmra.mxu0 %vm1996_vm4, %v4006_v54  ;;  %v4386_v41 = vpop.permute.xlu0 %4385  ;;  %v4021_v54 = vld [vmem:[%s6319_s5 + $0x1b8] sm:$0xff] }
 0x479   : > { %v4387_v9 = vunpack.i.l.bf16 %v4386_v41  ;;  %4068 = vmatmul.msk.f32.vlgmr.msra.gmra.mxu1 %vm1996_vm4, %v4047_v0  ;;  %v4388_v11 = vunpack.i.h.bf16 %v4386_v41  ;;  %v4062_v35 = vld [vmem:[%s6319_s5 + $0x258] sm:$0xff]  ;;  %v4022_v41 = vld [vmem:[%s6319_s5 + $0x1c0] sm:$0xff] }
 0x47b   : > { %2828 = vmatpush.msrb.mxu2 %v4387_v9  ;;  %4000 = vmatmul.msk.f32.gmra.mxu3 %vm1996_vm4, %v1926_v29  ;;  %v4063_v9 = vld [vmem:[%s6319_s5 + $0x260] sm:$0xff] }
 0x47d   : > { %2829 = vmatpush.msrb.mxu2 %v4388_v11 }
 0x47f   : > { %3970 = vmatmul.msk.f32.gmra.mxu2 %vm1996_vm4, %v3949_v62  ;;  %v4089_v62 = vld [vmem:[%s6319_s5 + $0x288] sm:$0xff] }
 0x480   : > { %4028 = vmatmul.msk.f32.gmra.mxu0 %vm1996_vm4, %v4007_v8  ;;  %v4023_v8 = vld [vmem:[%s6319_s5 + $0x1c8] sm:$0xff] }
 0x481   : > { %4069 = vmatmul.msk.f32.gmra.mxu1 %vm1996_vm4, %v4048_v13  ;;  %v4064_v13 = vld [vmem:[%s6319_s5 + $0x268] sm:$0xff] }
 0x483   : > { %4001 = vmatmul.msk.f32.gmra.mxu3 %vm1996_vm4, %v1927_v50 }
 0x487   : > { %3971 = vmatmul.msk.f32.gmra.mxu2 %vm1996_vm4, %v3950_v61  ;;  %v4090_v61 = vld [vmem:[%s6319_s5 + $0x290] sm:$0xff] }
 0x488   : > { %4029 = vmatmul.msk.f32.gmra.mxu0 %vm1996_vm4, %v4008_v30  ;;  %v4024_v30 = vld [vmem:[%s6319_s5 + $0x1d0] sm:$0xff] }
 0x489   : > { %4070 = vmatmul.msk.f32.gmra.mxu1 %vm1996_vm4, %v4049_v17  ;;  %v4065_v17 = vld [vmem:[%s6319_s5 + $0x270] sm:$0xff] }
 0x48b   : > { %4002 = vmatmul.msk.f32.gmra.mxu3 %vm1996_vm4, %v1928_v39 }
 0x48f   : > { %3972 = vmatmul.msk.f32.gmra.mxu2 %vm1996_vm4, %v3951_v16  ;;  %v4091_v16 = vld [vmem:[%s6319_s5 + $0x298] sm:$0xff] }
 0x490   : > { %4030 = vmatmul.msk.f32.gmra.mxu0 %vm1996_vm4, %v4009_v19  ;;  %v4025_v19 = vld [vmem:[%s6319_s5 + $0x1d8] sm:$0xff] }
 0x491   : > { %4071 = vmatmul.msk.f32.gmra.mxu1 %vm1996_vm4, %v4050_v34  ;;  %v4066_v34 = vld [vmem:[%s6319_s5 + $0x278] sm:$0xff] }
 0x493   : > { %4003 = vmatmul.msk.f32.gmra.mxu3 %vm1996_vm4, %v1929_v44 }
 0x497   : > { %3973 = vmatmul.msk.f32.gmra.mxu2 %vm1996_vm4, %v3952_v48  ;;  %v4092_v48 = vld [vmem:[%s6319_s5 + $0x2a0] sm:$0xff] }
 0x498   : > { %4031 = vmatmul.msk.f32.gmra.mxu0 %vm1996_vm4, %v4010_v20 }
 0x499   : > { %4072 = vmatmul.msk.f32.gmra.mxu1 %vm1996_vm4, %v4051_v2  ;;  %v4093_v2 = vld [vmem:[%s6319_s5 + $0x2a8] sm:$0xff] }
 0x49b   : > { %4004 = vmatmul.msk.f32.gmra.mxu3 %vm1996_vm4, %v1930_v37 }
 0x49f   : > { %3974 = vmatmul.msk.f32.gmra.mxu2 %vm1996_vm4, %v3953_v33  ;;  %v4094_v33 = vld [vmem:[%s6319_s5 + $0x2b0] sm:$0xff] }
 0x4a0   : > { %4032 = vmatmul.msk.f32.gmra.mxu0 %vm1996_vm4, %v4011_v18 }
 0x4a1   : > { %4073 = vmatmul.msk.f32.gmra.mxu1 %vm1996_vm4, %v4052_v26  ;;  %v4095_v26 = vld [vmem:[%s6319_s5 + $0x2b8] sm:$0xff] }
 0x4a3   : > { %4005 = vmatmul.msk.f32.gmra.mxu3 %vm1996_vm4, %v1931_v55  ;;  %v4102_v55 = vld [vmem:[%s6319_s5 + $0x2f0] sm:$0xff] }
 0x4a7   : > { %3975 = vmatmul.msk.f32.gmra.mxu2 %vm1996_vm4, %v3954_v5  ;;  %v4096_v5 = vld [vmem:[%s6319_s5 + $0x2c0] sm:$0xff] }
 0x4a8   : > { %4033 = vmatmul.msk.f32.gmra.mxu0 %vm1996_vm4, %v4012_v21 }
 0x4a9   : > { %4074 = vmatmul.msk.f32.gmra.mxu1 %vm1996_vm4, %v4053_v56  ;;  %v4097_v56 = vld [vmem:[%s6319_s5 + $0x2c8] sm:$0xff] }
 0x4af   : > { %3976 = vmatmul.msk.f32.gmra.mxu2 %vm1996_vm4, %v3955_v6  ;;  %v2215_v6 = vpop.f32.mrf.mxu3 }
 0x4b0   : > { %4034 = vmatmul.msk.f32.gmra.mxu0 %vm1996_vm4, %v4013_v32  ;;  %v4098_v32 = vld [vmem:[%s6319_s5 + $0x2d0] sm:$0xff] }
 0x4b1   : > { %4075 = vmatmul.msk.f32.gmra.mxu1 %vm1996_vm4, %v4054_v36 }
 0x4b7   : > { %3977 = vmatmul.msk.f32.gmra.mxu2 %vm1996_vm4, %v3956_v12  ;;  %v4099_v12 = vld [vmem:[%s6319_s5 + $0x2d8] sm:$0xff] }
 0x4b8   : > { %4035 = vmatmul.msk.f32.gmra.mxu0 %vm1996_vm4, %v4014_v59  ;;  %v2218_v59 = vpop.f32.mrf.mxu3 }
 0x4b9   : > { %4076 = vmatmul.msk.f32.gmra.mxu1 %vm1996_vm4, %v4055_v38 }
 0x4bf   : > { %3978 = vmatmul.msk.f32.gmra.mxu2 %vm1996_vm4, %v3957_v23  ;;  %v4100_v23 = vld [vmem:[%s6319_s5 + $0x2e0] sm:$0xff] }
 0x4c0   : > { %4036 = vmatmul.msk.f32.gmra.mxu0 %vm1996_vm4, %v4015_v63 }
 0x4c1   : > { %4077 = vmatmul.msk.f32.gmra.mxu1 %vm1996_vm4, %v4056_v40  ;;  %v2221_v40 = vpop.f32.mrf.mxu3 }
 0x4c7   : > { %3979 = vmatmul.msk.f32.gmra.mxu2 %vm1996_vm4, %v3958_v47 }
 0x4c8   : > { %4037 = vmatmul.msk.f32.gmra.mxu0 %vm1996_vm4, %v4016_v42  ;;  %v4101_v42 = vld [vmem:[%s6319_s5 + $0x2e8] sm:$0xff] }
 0x4c9   : > { %4078 = vmatmul.msk.f32.gmra.mxu1 %vm1996_vm4, %v4057_v57  ;;  %v2224_v37 = vpop.f32.mrf.mxu3 }
 0x4cf   : > { %3980 = vmatmul.msk.f32.gmra.mxu2 %vm1996_vm4, %v3959_v24 }
 0x4d0   : > { %4038 = vmatmul.msk.f32.gmra.mxu0 %vm1996_vm4, %v4017_v49  ;;  %v3072_v49 = vld [vmem:[%s6322_s8 + $0x8] sm:$0x3] }
 0x4d1   : > { %4079 = vmatmul.msk.f32.gmra.mxu1 %vm1996_vm4, %v4058_v51  ;;  %4129 = vmatpush.msk.msrb.mxu3 %vm3134_vm5, %v3072_v49 }
 0x4d7   : > { %3981 = vmatmul.msk.f32.gmra.mxu2 %vm1996_vm4, %v3960_v15  ;;  %v3071_v15 = vld [vmem:[%s6322_s8] sm:$0xff] }
 0x4d8   : > { %4039 = vmatmul.msk.f32.gmra.mxu0 %vm1996_vm4, %v4018_v25  ;;  %3153 = vmatpush.msrb.mxu3 %v3071_v15 }
 0x4d9   : > { %v5738_v31 = vpop.f32.mrf.mxu2  ;;  %4080 = vmatmul.msk.f32.gmra.mxu1 %vm1996_vm4, %v4059_v46 }
 0x4df   : > { %3982 = vmatmul.msk.f32.gmra.mxu2 %vm1996_vm4, %v3961_v1  ;;  %v2227_v1 = vpop.f32.mrf.mxu3 }
 0x4e0   : > { %4040 = vmatmul.msk.f32.gmra.mxu0 %vm1996_vm4, %v4019_v58  ;;  %v4103_v58 = vld [vmem:[%s6319_s5 + $0x2f8] sm:$0xff] }
 0x4e1   : > { %v5752_v53 = vpop.f32.mrf.mxu2  ;;  %4081 = vmatmul.msk.f32.gmra.mxu1 %vm1996_vm4, %v4060_v52 }
 0x4e7   : > { %3983 = vmatmul.msk.f32.gmra.mxu2 %vm1996_vm4, %v3962_v43 }
 0x4e8   : > { %4041 = vmatmul.msk.f32.gmra.mxu0 %vm1996_vm4, %v4020_v45  ;;  %v2216_v45 = vadd.f32 %v2215_v6, %v5738_v31  ;;  %v4105_v31 = vld [vmem:[%s6319_s5 + $0x308] sm:$0xff] }
 0x4e9   : > { %4082 = vmatmul.msk.f32.gmra.mxu1 %vm1996_vm4, %v4061_v3 }
 0x4ea   : > { %v5767_v4 = vpop.f32.mrf.mxu2 }
 0x4ef   : > { %3984 = vmatmul.msk.f32.gmra.mxu2 %vm1996_vm4, %v3963_v27  ;;  %v4104_v27 = vld [vmem:[%s6319_s5 + $0x300] sm:$0xff] }
 0x4f0   : > { %4042 = vmatmul.msk.f32.gmra.mxu0 %vm1996_vm4, %v4021_v54 }
 0x4f1   : > { %4083 = vmatmul.msk.f32.gmra.mxu1 %vm1996_vm4, %v4062_v35  ;;  %v2230_v35 = vpop.f32.mrf.mxu3 }
 0x4f2   : > { %v5781_v0 = vpop.f32.mrf.mxu2 }
 0x4f5   : > { %v2407_v50 = vpop.f32.mrf.mxu0 }
 0x4f6   : > { %v2619_v38 = vpop.f32.mrf.mxu1  ;;  %v2467_v54 = vadd.f32 %v2407_v50, %v2216_v45 }
 0x4f7   : > { %4109 = vmatmul.msk.f32.vlgmr.msrb.gmra.mxu2 %vm1996_vm4, %v4088_v10 }
 0x4f8   : > { %4043 = vmatmul.msk.f32.gmra.mxu0 %vm1996_vm4, %v4022_v41  ;;  %v2679_v41 = vadd.f32 %v2619_v38, %v2467_v54 }
 0x4f9   : > { %4084 = vmatmul.msk.f32.gmra.mxu1 %vm1996_vm4, %v4063_v9 }
 0x4fa   : > { %v5795_v11 = vpop.f32.mrf.mxu2 }
 0x4fd   : > { %v2410_v63 = vpop.f32.mrf.mxu0 }
 0x4fe   : > { %v2622_v44 = vpop.f32.mrf.mxu1 }
 0x4ff   : > { %4110 = vmatmul.msk.f32.gmra.mxu2 %vm1996_vm4, %v4089_v62  ;;  %v2219_v62 = vadd.f32 %v2218_v59, %v5752_v53  ;;  %v2939_v53 = vpop.permute.xlu1 %2938 }
 0x500   : > { %4044 = vmatmul.msk.f32.gmra.mxu0 %vm1996_vm4, %v4023_v8 }
 0x501   : > { %4085 = vmatmul.msk.f32.gmra.mxu1 %vm1996_vm4, %v4064_v13  ;;  %v2934_v13 = vpop.permute.xlu0 %2933 }
 0x502   : > { %v5809_v60 = vpop.f32.mrf.mxu2 }
 0x505   : > { %v2413_v57 = vpop.f32.mrf.mxu0 }
 0x506   : > { %v2625_v51 = vpop.f32.mrf.mxu1 }
 0x507   : > { %4111 = vmatmul.msk.f32.gmra.mxu2 %vm1996_vm4, %v4090_v61  ;;  %v2468_v61 = vadd.f32 %v2410_v63, %v2219_v62  ;;  %v2231_v62 = vadd.f32 %v2230_v35, %v5809_v60 }
 0x508   : > { %4045 = vmatmul.msk.f32.gmra.mxu0 %vm1996_vm4, %v4024_v30 }
 0x509   : > { %4086 = vmatmul.msk.f32.gmra.mxu1 %vm1996_vm4, %v4065_v17 }
 0x50a   : > { %v5823_v14 = vpop.f32.mrf.mxu2 }
 0x50d   : > { %v2416_v25 = vpop.f32.mrf.mxu0 }
 0x50e   : > { %v2628_v52 = vpop.f32.mrf.mxu1 }
 0x50f   : > { %4112 = vmatmul.msk.f32.gmra.mxu2 %vm1996_vm4, %v4091_v16  ;;  %v2233_v16 = vpop.f32.mrf.mxu3 }
 0x510   : > { %4046 = vmatmul.msk.f32.gmra.mxu0 %vm1996_vm4, %v4025_v19  ;;  %v2680_v19 = vadd.f32 %v2622_v44, %v2468_v61 }
 0x511   : > { %4087 = vmatmul.msk.f32.gmra.mxu1 %vm1996_vm4, %v4066_v34 }
 0x512   : > { %v5837_v7 = vpop.f32.mrf.mxu2 }
 0x515   : > { %v2419_v3 = vpop.f32.mrf.mxu0 }
 0x516   : > { %v2631_v10 = vpop.f32.mrf.mxu1 }
 0x517   : > { %4113 = vmatmul.msk.f32.gmra.mxu2 %vm1996_vm4, %v4092_v48 }
 0x51a   : > { %v5843_v20 = vpop.f32.mrf.mxu2 }
 0x51d   : > { %v2422_v17 = vpop.f32.mrf.mxu0 }
 0x51e   : > { %v2634_v34 = vpop.f32.mrf.mxu1  ;;  %v2472_v61 = vadd.f32 %v2422_v17, %v2231_v62 }
 0x51f   : > { %4114 = vmatmul.msk.f32.gmra.mxu2 %vm1996_vm4, %v4093_v2  ;;  %v2222_v2 = vadd.f32 %v2221_v40, %v5767_v4  ;;  %v2225_v4 = vadd.f32 %v2224_v37, %v5781_v0  ;;  %v4107_v40 = vld [vmem:[%s6319_s5 + $0x318] sm:$0xff]  ;;  %v2228_v0 = vadd.f32 %v2227_v1, %v5795_v11 }
 0x522   : > { %v5849_v22 = vpop.f32.mrf.mxu2 }
 0x526   : > { %v2637_v63 = vpop.f32.mrf.mxu1 }
 0x527   : > { %4115 = vmatmul.msk.f32.gmra.mxu2 %vm1996_vm4, %v4094_v33 }
 0x52a   : > { %v5855_v18 = vpop.f32.mrf.mxu2 }
 0x52f   : > { %4116 = vmatmul.msk.f32.gmra.mxu2 %vm1996_vm4, %v4095_v26  ;;  %v4106_v26 = vld [vmem:[%s6319_s5 + $0x310] sm:$0xff] }
 0x532   : > { %v5861_v28 = vpop.f32.mrf.mxu2 }
 0x537   : > { %4117 = vmatmul.msk.f32.gmra.mxu2 %vm1996_vm4, %v4096_v5 }
 0x53a   : > { %v5867_v21 = vpop.f32.mrf.mxu2 }
 0x53f   : > { %4118 = vmatmul.msk.f32.gmra.mxu2 %vm1996_vm4, %v4097_v56  ;;  %v2469_v56 = vadd.f32 %v2413_v57, %v2222_v2 }
 0x541   : > { %v2681_v50 = vadd.f32 %v2625_v51, %v2469_v56 }
 0x542   : > { %v5873_v29 = vpop.f32.mrf.mxu2 }
 0x547   : > { %4119 = vmatmul.msk.f32.gmra.mxu2 %vm1996_vm4, %v4098_v32  ;;  %v2425_v32 = vpop.f32.mrf.mxu0 }
 0x54a   : > { %v5879_v36 = vpop.f32.mrf.mxu2 }
 0x54f   : > { %4120 = vmatmul.msk.f32.gmra.mxu2 %vm1996_vm4, %v4099_v12  ;;  %v2236_v12 = vpop.f32.mrf.mxu3  ;;  %v2428_v51 = vpop.f32.mrf.mxu0 }
 0x552   : > { %v5885_v39 = vpop.f32.mrf.mxu2 }
 0x557   : > { %4121 = vmatmul.msk.f32.gmra.mxu2 %vm1996_vm4, %v4100_v23  ;;  %v2944_v23 = vpop.permute.xlu2 %2943  ;;  %v2239_v37 = vpop.f32.mrf.mxu3 }
 0x55a   : > { %v5891_v47 = vpop.f32.mrf.mxu2 }
 0x55f   : > { %4122 = vmatmul.msk.f32.gmra.mxu2 %vm1996_vm4, %v4101_v42  ;;  %v2470_v42 = vadd.f32 %v2416_v25, %v2225_v4  ;;  %v2242_v11 = vpop.f32.mrf.mxu3 }
 0x561   : > { %v2682_v49 = vadd.f32 %v2628_v52, %v2470_v42  ;;  %v2954_v52 = vpop.permute.xlu1 %2953 }
 0x562   : > { %v5897_v24 = vpop.f32.mrf.mxu2 }
 0x567   : > { %4123 = vmatmul.msk.f32.gmra.mxu2 %vm1996_vm4, %v4102_v55 }
 0x56a   : > { %v5909_v46 = vpop.f32.mrf.mxu2 }
 0x56f   : > { %4124 = vmatmul.msk.f32.gmra.mxu2 %vm1996_vm4, %v4103_v58  ;;  %v2949_v58 = vpop.permute.xlu0 %2948 }
 0x572   : > { %v5915_v43 = vpop.f32.mrf.mxu2 }
 0x577   : > { %4125 = vmatmul.msk.f32.gmra.mxu2 %vm1996_vm4, %v4104_v27  ;;  %v2471_v27 = vadd.f32 %v2419_v3, %v2228_v0  ;;  %v2243_v0 = vadd.f32 %v2242_v11, %v5849_v22 }
 0x579   : > { %v2683_v25 = vadd.f32 %v2631_v10, %v2471_v27  ;;  %v2959_v10 = vpop.permute.xlu2 %2958 }
 0x57a   : > { %v2831_v9 = vpop.f32.mrf.mxu2 }
 0x57b   : > { %v2891_v8 = vadd.f32 %v2831_v9, %v2679_v41  ;;  %v2640_v41 = vpop.f32.mrf.mxu1 }
 0x57d   : > { %v3031_v30 = vadd.f32 %v2934_v13, %v2891_v8  ;;  %v2431_v13 = vpop.f32.mrf.mxu0 }
 0x57f   : > { %4441 = vtanh.f32 %v3031_v30  ;;  %4126 = vmatmul.msk.f32.gmra.mxu2 %vm1996_vm4, %v4105_v31  ;;  %v2684_v30 = vadd.f32 %v2634_v34, %v2472_v61  ;;  %v2964_v34 = vpop.permute.xlu0 %2963 }
 0x582   : > { %v2834_v48 = vpop.f32.mrf.mxu2 }
 0x583   : > { %v2892_v33 = vadd.f32 %v2834_v48, %v2680_v19  ;;  %v2643_v3 = vpop.f32.mrf.mxu1  ;;  %v2234_v48 = vadd.f32 %v2233_v16, %v5823_v14 }
 0x585   : > { %v4442_v5 = vpop.eup %4441  ;;  %v3032_v6 = vadd.f32 %v2939_v53, %v2892_v33  ;;  %v2473_v53 = vadd.f32 %v2425_v32, %v2234_v48  ;;  %v2434_v35 = vpop.f32.mrf.mxu0 }
 0x586   : > { %4130 = vmatmul.msk.f32.vlgmr.msrb.gmra.mxu3 %vm3073_vm6, %v4442_v5 }
 0x587   : > { %4443 = vtanh.f32 %v3032_v6  ;;  %4127 = vmatmul.msk.f32.gmra.mxu2 %vm1996_vm4, %v4106_v26  ;;  %v2245_v26 = vpop.f32.mrf.mxu3  ;;  %v2685_v17 = vadd.f32 %v2637_v63, %v2473_v53  ;;  %v2237_v6 = vadd.f32 %v2236_v12, %v5837_v7  ;;  %v2969_v63 = vpop.permute.xlu1 %2968 }
 0x589   : > { %v2474_v4 = vadd.f32 %v2428_v51, %v2237_v6 }
 0x58a   : > { %v2837_v59 = vpop.f32.mrf.mxu2 }
 0x58b   : > { %v2893_v38 = vadd.f32 %v2837_v59, %v2681_v50  ;;  %v2646_v5 = vpop.f32.mrf.mxu1  ;;  %v2686_v32 = vadd.f32 %v2640_v41, %v2474_v4 }
 0x58d   : > { %v4444_v44 = vpop.eup %4443  ;;  %v3033_v57 = vadd.f32 %v2944_v23, %v2893_v38  ;;  %v2437_v16 = vpop.f32.mrf.mxu0 }
 0x58e   : > { %4131 = vmatmul.msk.f32.gmra.mxu3 %vm3073_vm6, %v4444_v44 }
 0x58f   : > { %4445 = vtanh.f32 %v3033_v57  ;;  %4128 = vmatmul.msk.f32.gmra.mxu2 %vm1996_vm4, %v4107_v40  ;;  %v2248_v38 = vpop.f32.mrf.mxu3  ;;  %v2240_v40 = vadd.f32 %v2239_v37, %v5843_v20  ;;  %v2984_v48 = vpop.permute.xlu1 %2983 }
 0x592   : > { %v2840_v55 = vpop.f32.mrf.mxu2 }
 0x593   : > { %v2894_v15 = vadd.f32 %v2840_v55, %v2682_v49  ;;  %v2649_v42 = vpop.f32.mrf.mxu1  ;;  %v2475_v49 = vadd.f32 %v2431_v13, %v2240_v40 }
 0x595   : > { %v4446_v45 = vpop.eup %4445  ;;  %v3034_v54 = vadd.f32 %v2949_v58, %v2894_v15  ;;  %v2687_v12 = vadd.f32 %v2643_v3, %v2475_v49  ;;  %v2440_v51 = vpop.f32.mrf.mxu0 }
 0x596   : > { %4132 = vmatmul.msk.f32.gmra.mxu3 %vm3073_vm6, %v4446_v45  ;;  %v2974_v45 = vpop.permute.xlu2 %2973 }
 0x597   : > { %4447 = vtanh.f32 %v3034_v54  ;;  %v2251_v15 = vpop.f32.mrf.mxu3  ;;  %v2476_v54 = vadd.f32 %v2434_v35, %v2243_v0 }
 0x599   : > { %v2688_v41 = vadd.f32 %v2646_v5, %v2476_v54 }
 0x59a   : > { %v2843_v9 = vpop.f32.mrf.mxu2 }
 0x59b   : > { %v2895_v8 = vadd.f32 %v2843_v9, %v2683_v25  ;;  %v2652_v37 = vpop.f32.mrf.mxu1  ;;  %v2246_v9 = vadd.f32 %v2245_v26, %v5855_v18 }
 0x59d   : > { %v4448_v31 = vpop.eup %4447  ;;  %v3035_v1 = vadd.f32 %v2954_v52, %v2895_v8  ;;  %v2979_v8 = vpop.permute.xlu0 %2978 }
 0x59e   : > { %4133 = vmatmul.msk.f32.gmra.mxu3 %vm3073_vm6, %v4448_v31  ;;  %v2443_v52 = vpop.f32.mrf.mxu0  ;;  %v2477_v31 = vadd.f32 %v2437_v16, %v2246_v9 }
 0x59f   : > { %4449 = vtanh.f32 %v3035_v1  ;;  %v2254_v22 = vpop.f32.mrf.mxu3 }
 0x5a0   : > { %v2689_v1 = vadd.f32 %v2649_v42, %v2477_v31  ;;  %v2255_v16 = vadd.f32 %v2254_v22, %v5873_v29 }
 0x5a2   : > { %v2846_v19 = vpop.f32.mrf.mxu2 }
 0x5a3   : > { %v2896_v2 = vadd.f32 %v2846_v19, %v2684_v30  ;;  %v2655_v11 = vpop.f32.mrf.mxu1  ;;  %v2249_v30 = vadd.f32 %v2248_v38, %v5861_v28 }
 0x5a5   : > { %v4450_v33 = vpop.eup %4449  ;;  %v3036_v60 = vadd.f32 %v2959_v10, %v2896_v2  ;;  %v2478_v10 = vadd.f32 %v2440_v51, %v2249_v30  ;;  %v2994_v38 = vpop.permute.xlu0 %2993 }
 0x5a6   : > { %4134 = vmatmul.msk.f32.gmra.mxu3 %vm3073_vm6, %v4450_v33  ;;  %v2446_v33 = vpop.f32.mrf.mxu0  ;;  %v2999_v51 = vpop.permute.xlu1 %2998 }
 0x5a7   : > { %4451 = vtanh.f32 %v3036_v60  ;;  %v2257_v53 = vpop.f32.mrf.mxu3  ;;  %v2690_v60 = vadd.f32 %v2652_v37, %v2478_v10 }
 0x5a8   : > { %v2258_v49 = vadd.f32 %v2257_v53, %v5879_v36 }
 0x5aa   : > { %v2849_v56 = vpop.f32.mrf.mxu2 }
 0x5ab   : > { %v2897_v50 = vadd.f32 %v2849_v56, %v2685_v17  ;;  %v2658_v35 = vpop.f32.mrf.mxu1  ;;  %v2252_v17 = vadd.f32 %v2251_v15, %v5867_v21  ;;  %v2989_v56 = vpop.permute.xlu2 %2988 }
 0x5ad   : > { %v4452_v59 = vpop.eup %4451  ;;  %v3037_v14 = vadd.f32 %v2964_v34, %v2897_v50  ;;  %v2479_v50 = vadd.f32 %v2443_v52, %v2252_v17  ;;  %v3009_v22 = vpop.permute.xlu0 %3008 }
 0x5ae   : > { %4135 = vmatmul.msk.f32.gmra.mxu3 %vm3073_vm6, %v4452_v59  ;;  %v2449_v34 = vpop.f32.mrf.mxu0 }
 0x5af   : > { %4453 = vtanh.f32 %v3037_v14  ;;  %v2260_v59 = vpop.f32.mrf.mxu3  ;;  %v2691_v4 = vadd.f32 %v2655_v11, %v2479_v50  ;;  %v2481_v0 = vadd.f32 %v2449_v34, %v2258_v49 }
 0x5b2   : > { %v2852_v23 = vpop.f32.mrf.mxu2 }
 0x5b3   : > { %v2898_v44 = vadd.f32 %v2852_v23, %v2686_v32  ;;  %v2661_v23 = vpop.f32.mrf.mxu1 }
 0x5b5   : > { %v4454_v57 = vpop.eup %4453  ;;  %v3038_v7 = vadd.f32 %v2969_v63, %v2898_v44  ;;  %v2480_v44 = vadd.f32 %v2446_v33, %v2255_v16 }
 0x5b6   : > { %4136 = vmatmul.msk.f32.gmra.mxu3 %vm3073_vm6, %v4454_v57  ;;  %v2452_v42 = vpop.f32.mrf.mxu0 }
 0x5b7   : > { %4455 = vtanh.f32 %v3038_v7  ;;  %v2692_v63 = vadd.f32 %v2658_v35, %v2480_v44  ;;  %v2263_v7 = vpop.f32.mrf.mxu3 }
 0x5ba   : > { %v2855_v55 = vpop.f32.mrf.mxu2 }
 0x5bb   : > { %v2899_v58 = vadd.f32 %v2855_v55, %v2687_v12  ;;  %v2664_v15 = vpop.f32.mrf.mxu1 }
 0x5bd   : > { %v4456_v27 = vpop.eup %4455  ;;  %v3039_v20 = vadd.f32 %v2974_v45, %v2899_v58  ;;  %v2693_v58 = vadd.f32 %v2661_v23, %v2481_v0  ;;  %v3024_v23 = vpop.permute.xlu0 %3023 }
 0x5be   : > { %4137 = vmatmul.msk.f32.gmra.mxu3 %vm3073_vm6, %v4456_v27  ;;  %v2261_v27 = vadd.f32 %v2260_v59, %v5885_v39  ;;  %v2455_v37 = vpop.f32.mrf.mxu0 }
 0x5bf   : > { %4457 = vtanh.f32 %v3039_v20  ;;  %v3004_v20 = vpop.permute.xlu2 %3003 }
 0x5c0   : > { %v2482_v36 = vadd.f32 %v2452_v42, %v2261_v27 }
 0x5c2   : > { %v2858_v25 = vpop.f32.mrf.mxu2 }
 0x5c3   : > { %v2900_v62 = vadd.f32 %v2858_v25, %v2688_v41  ;;  %v2266_v25 = vpop.f32.mrf.mxu3 }
 0x5c5   : > { %v4458_v13 = vpop.eup %4457  ;;  %v3040_v61 = vadd.f32 %v2979_v8, %v2900_v62  ;;  %v2667_v62 = vpop.f32.mrf.mxu1  ;;  %v2694_v8 = vadd.f32 %v2664_v15, %v2482_v36 }
 0x5c6   : > { %4138 = vmatmul.msk.f32.gmra.mxu3 %vm3073_vm6, %v4458_v13  ;;  %v2264_v13 = vadd.f32 %v2263_v7, %v5891_v47 }
 0x5c7   : > { %4459 = vtanh.f32 %v3040_v61 }
 0x5c8   : > { %v2483_v11 = vadd.f32 %v2455_v37, %v2264_v13  ;;  %v3215_v13 = vld [vmem:[%s6321_s7] sm:$0xff] }
 0x5ca   : > { %v2861_v3 = vpop.f32.mrf.mxu2  ;;  %v2695_v30 = vadd.f32 %v2667_v62, %v2483_v11  ;;  %v3218_v11 = vld [vmem:[%s6321_s7 + $0x18] sm:$0xff] }
 0x5cb   : > { %v2901_v19 = vadd.f32 %v2861_v3, %v2689_v1  ;;  %v2458_v1 = vpop.f32.mrf.mxu0  ;;  %v2269_v3 = vpop.f32.mrf.mxu3 }
 0x5cd   : > { %v4460_v2 = vpop.eup %4459  ;;  %v3041_v18 = vadd.f32 %v2984_v48, %v2901_v19  ;;  %v2670_v19 = vpop.f32.mrf.mxu1 }
 0x5ce   : > { %4139 = vmatmul.msk.f32.gmra.mxu3 %vm3073_vm6, %v4460_v2  ;;  %v2267_v2 = vadd.f32 %v2266_v25, %v5897_v24 }
 0x5cf   : > { %4461 = vtanh.f32 %v3041_v18  ;;  %v3014_v18 = vpop.permute.xlu1 %3013 }
 0x5d0   : > { %v2484_v53 = vadd.f32 %v2458_v1, %v2267_v2  ;;  %v3220_v1 = vld [vmem:[%s6321_s7 + $0x28] sm:$0xff]  ;;  %v3225_v2 = vld [vmem:[%s6321_s7 + $0x50] sm:$0xff] }
 0x5d2   : > { %v2864_v26 = vpop.f32.mrf.mxu2 }
 0x5d3   : > { %v2902_v5 = vadd.f32 %v2864_v26, %v2690_v60  ;;  %v2461_v60 = vpop.f32.mrf.mxu0  ;;  %v2272_v35 = vpop.f32.mrf.mxu3  ;;  %v2696_v26 = vadd.f32 %v2670_v19, %v2484_v53  ;;  %v3223_v19 = vld [vmem:[%s6321_s7 + $0x40] sm:$0xff]  ;;  %v3229_v53 = vld [vmem:[%s6321_s7 + $0x70] sm:$0xff] }
 0x5d5   : > { %v4462_v6 = vpop.eup %4461  ;;  %v3042_v28 = vadd.f32 %v2989_v56, %v2902_v5  ;;  %v2270_v5 = vadd.f32 %v2269_v3, %v5909_v46  ;;  %v2673_v50 = vpop.f32.mrf.mxu1  ;;  %v3221_v3 = vld [vmem:[%s6321_s7 + $0x30] sm:$0xff] }
 0x5d6   : > { %4140 = vmatmul.msk.f32.gmra.mxu3 %vm3073_vm6, %v4462_v6  ;;  %v3019_v6 = vpop.permute.xlu2 %3018 }
 0x5d7   : > { %4463 = vtanh.f32 %v3042_v28  ;;  %v2485_v34 = vadd.f32 %v2461_v60, %v2270_v5  ;;  %v3029_v7 = vpop.permute.xlu1 %3028  ;;  %v3231_v60 = vld [vmem:[%s6321_s7 + $0x80] sm:$0xff]  ;;  %v3400_v5 = vld [vmem:[%s6323_s9 + $0x48] sm:$0xff] }
 0x5d8   : > { %3445 = vmatpush.msra.mxu3 %v3400_v5 }
 0x5d9   : > { %v2697_v59 = vadd.f32 %v2673_v50, %v2485_v34  ;;  %v3399_v50 = vld [vmem:[%s6323_s9 + $0x40] sm:$0xff] }
 0x5da   : > { %v2867_v14 = vpop.f32.mrf.mxu2  ;;  %3446 = vmatpush.msra.mxu3 %v3399_v50  ;;  %v4201_v50 = vld [vmem:[%s6323_s9 + $0x178] sm:$0xff] }
 0x5db   : > { %v2903_v32 = vadd.f32 %v2867_v14, %v2691_v4  ;;  %v2464_v14 = vpop.f32.mrf.mxu0 }
 0x5dd   : > { %v4464_v40 = vpop.eup %4463  ;;  %v3043_v21 = vadd.f32 %v2994_v38, %v2903_v32  ;;  %v2273_v32 = vadd.f32 %v2272_v35, %v5915_v43  ;;  %v3232_v35 = vld [vmem:[%s6321_s7 + $0x88] sm:$0xff] }
 0x5de   : > { %4141 = vmatmul.msk.f32.gmra.mxu3 %vm3073_vm6, %v4464_v40 }
 0x5df   : > { %4465 = vtanh.f32 %v3043_v21  ;;  %v2486_v44 = vadd.f32 %v2464_v14, %v2273_v32  ;;  %v2676_v21 = vpop.f32.mrf.mxu1  ;;  %v3398_v32 = vld [vmem:[%s6323_s9 + $0x38] sm:$0xff] }
 0x5e0   : > { %3447 = vmatpush.msra.mxu3 %v3398_v32  ;;  %v4197_v32 = vld [vmem:[%s6323_s9 + $0x158] sm:$0xff] }
 0x5e2   : > { %v2870_v57 = vpop.f32.mrf.mxu2 }
 0x5e3   : > { %v2904_v12 = vadd.f32 %v2870_v57, %v2692_v63  ;;  %v2698_v63 = vadd.f32 %v2676_v21, %v2486_v44  ;;  %v4179_v44 = vld [vmem:[%s6323_s9 + $0xd8] sm:$0xff] }
 0x5e5   : > { %v4466_v55 = vpop.eup %4465  ;;  %v3044_v29 = vadd.f32 %v2999_v51, %v2904_v12 }
 0x5e6   : > { %4142 = vmatmul.msk.f32.gmra.mxu3 %vm3073_vm6, %v4466_v55 }
 0x5e7   : > { %4467 = vtanh.f32 %v3044_v29 }
 0x5ea   : > { %v2873_v45 = vpop.f32.mrf.mxu2 }
 0x5eb   : > { %v2905_v54 = vadd.f32 %v2873_v45, %v2693_v58 }
 0x5ed   : > { %v4468_v41 = vpop.eup %4467  ;;  %v3045_v9 = vadd.f32 %v3004_v20, %v2905_v54 }
 0x5ee   : > { %4143 = vmatmul.msk.f32.gmra.mxu3 %vm3073_vm6, %v4468_v41 }
 0x5ef   : > { %4469 = vtanh.f32 %v3045_v9 }
 0x5f2   : > { %v2876_v52 = vpop.f32.mrf.mxu2 }
 0x5f3   : > { %v2906_v31 = vadd.f32 %v2876_v52, %v2694_v8 }
 0x5f5   : > { %v4470_v61 = vpop.eup %4469  ;;  %v3046_v39 = vadd.f32 %v3009_v22, %v2906_v31  ;;  %v3216_v22 = vld [vmem:[%s6321_s7 + $0x8] sm:$0xff] }
 0x5f6   : > { %4144 = vmatmul.msk.f32.gmra.mxu3 %vm3073_vm6, %v4470_v61  ;;  %v3217_v61 = vld [vmem:[%s6321_s7 + $0x10] sm:$0xff] }
 0x5f7   : > { %4471 = vtanh.f32 %v3046_v39  ;;  %v3219_v39 = vld [vmem:[%s6321_s7 + $0x20] sm:$0xff] }
 0x5fa   : > { %v2879_v48 = vpop.f32.mrf.mxu2 }
 0x5fb   : > { %v2907_v10 = vadd.f32 %v2879_v48, %v2695_v30  ;;  %v3222_v30 = vld [vmem:[%s6321_s7 + $0x38] sm:$0xff]  ;;  %v3224_v48 = vld [vmem:[%s6321_s7 + $0x48] sm:$0xff] }
 0x5fd   : > { %v4472_v33 = vpop.eup %4471  ;;  %v3047_v47 = vadd.f32 %v3014_v18, %v2907_v10  ;;  %v3226_v10 = vld [vmem:[%s6321_s7 + $0x58] sm:$0xff]  ;;  %v3227_v18 = vld [vmem:[%s6321_s7 + $0x60] sm:$0xff] }
 0x5fe   : > { %4145 = vmatmul.msk.f32.gmra.mxu3 %vm3073_vm6, %v4472_v33  ;;  %v3228_v33 = vld [vmem:[%s6321_s7 + $0x68] sm:$0xff] }
 0x5ff   : > { %4473 = vtanh.f32 %v3047_v47  ;;  %v3230_v47 = vld [vmem:[%s6321_s7 + $0x78] sm:$0xff] }
 0x602   : > { %v2882_v17 = vpop.f32.mrf.mxu2 }
 0x603   : > { %v2908_v56 = vadd.f32 %v2882_v17, %v2696_v26  ;;  %v3233_v26 = vld [vmem:[%s6321_s7 + $0x90] sm:$0xff]  ;;  %v3234_v17 = vld [vmem:[%s6321_s7 + $0x98] sm:$0xff] }
 0x605   : > { %v4474_v28 = vpop.eup %4473  ;;  %v3048_v24 = vadd.f32 %v3019_v6, %v2908_v56  ;;  %v4181_v56 = vld [vmem:[%s6323_s9 + $0xe8] sm:$0xff] }
 0x606   : > { %4146 = vmatmul.msk.f32.gmra.mxu3 %vm3073_vm6, %v4474_v28  ;;  %3479 = vmatpush.msra.mxu2 %v4181_v56 }
 0x607   : > { %4475 = vtanh.f32 %v3048_v24 }
 0x609   : > { %v3155_v4 = vpop.f32.mrf.mxu3 }
 0x60a   : > { %v2885_v16 = vpop.f32.mrf.mxu2 }
 0x60b   : > { %v2909_v38 = vadd.f32 %v2885_v16, %v2697_v59  ;;  %v4180_v59 = vld [vmem:[%s6323_s9 + $0xe0] sm:$0xff] }
 0x60c   : > { %3480 = vmatpush.msra.mxu2 %v4180_v59  ;;  %v4185_v59 = vld [vmem:[%s6323_s9 + $0x100] sm:$0xff] }
 0x60d   : > { %v4476_v40 = vpop.eup %4475  ;;  %v3049_v46 = vadd.f32 %v3024_v23, %v2909_v38 }
 0x60e   : > { %4147 = vmatmul.msk.f32.gmra.mxu3 %vm3073_vm6, %v4476_v40  ;;  %3481 = vmatpush.msra.mxu2 %v4179_v44  ;;  %v4194_v44 = vld [vmem:[%s6323_s9 + $0x140] sm:$0xff] }
 0x60f   : > { %4477 = vtanh.f32 %v3049_v46 }
 0x611   : > { %v3158_v42 = vpop.f32.mrf.mxu3 }
 0x612   : > { %v2888_v57 = vpop.f32.mrf.mxu2 }
 0x613   : > { %v2910_v49 = vadd.f32 %v2888_v57, %v2698_v63 }
 0x615   : > { %v4478_v12 = vpop.eup %4477  ;;  %v3050_v51 = vadd.f32 %v3029_v7, %v2910_v49 }
 0x616   : > { %4148 = vmatmul.msk.f32.gmra.mxu3 %vm3073_vm6, %v4478_v12  ;;  %v4178_v12 = vld [vmem:[%s6323_s9 + $0xd0] sm:$0xff] }
 0x617   : > { %4479 = vtanh.f32 %v3050_v51  ;;  %3482 = vmatpush.msra.mxu2 %v4178_v12  ;;  %v3574_v12 = vld [vmem:[%s6325_s11 + $0x38] sm:$0xff] }
 0x619   : > { %v3161_v43 = vpop.f32.mrf.mxu3 }
 0x61d   : > { %v4480_v55 = vpop.eup %4479 }
 0x61e   : > { %4149 = vmatmul.msk.f32.gmra.mxu3 %vm3073_vm6, %v4480_v55 }
 0x621   : > { %v3164_v0 = vpop.f32.mrf.mxu3 }
 0x629   : > { %v3167_v29 = vpop.f32.mrf.mxu3 }
 0x631   : > { %v3170_v15 = vpop.f32.mrf.mxu3 }
 0x639   : > { %v3173_v58 = vpop.f32.mrf.mxu3 }
 0x641   : > { %v3176_v45 = vpop.f32.mrf.mxu3 }
 0x649   : > { %v3179_v27 = vpop.f32.mrf.mxu3 }
 0x651   : > { %v3182_v54 = vpop.f32.mrf.mxu3 }
 0x659   : > { %v3185_v20 = vpop.f32.mrf.mxu3 }
 0x661   : > { %v3188_v37 = vpop.f32.mrf.mxu3 }
 0x669   : > { %v3191_v41 = vpop.f32.mrf.mxu3 }
 0x671   : > { %v3194_v25 = vpop.f32.mrf.mxu3 }
 0x679   : > { %v3197_v36 = vpop.f32.mrf.mxu3 }
 0x681   : > { %v3200_v9 = vpop.f32.mrf.mxu3 }
 0x682   : > { %3265 = vmatpush.msrb.mxu0 %v3200_v9 }
 0x684   : > { %3266 = vmatpush.msrb.mxu0 %v3197_v36  ;;  %v3392_v36 = vld [vmem:[%s6323_s9 + $0x8] sm:$0xff] }
 0x686   : > { %3267 = vmatpush.msrb.mxu0 %v3194_v25  ;;  %v4174_v25 = vld [vmem:[%s6323_s9 + $0xb0] sm:$0xff] }
 0x688   : > { %3268 = vmatpush.msrb.mxu0 %v3191_v41  ;;  %v3393_v41 = vld [vmem:[%s6323_s9 + $0x10] sm:$0xff] }
 0x689   : > { %v3203_v62 = vpop.f32.mrf.mxu3 }
 0x68a   : > { %3269 = vmatpush.msrb.mxu0 %v3188_v37  ;;  %v4167_v37 = vld [vmem:[%s6323_s9 + $0x88] sm:$0xff] }
 0x68c   : > { %3270 = vmatpush.msrb.mxu0 %v3185_v20  ;;  %v4175_v20 = vld [vmem:[%s6323_s9 + $0xb8] sm:$0xff] }
 0x68e   : > { %3271 = vmatpush.msrb.mxu0 %v3182_v54  ;;  %v3394_v54 = vld [vmem:[%s6323_s9 + $0x18] sm:$0xff] }
 0x690   : > { %3272 = vmatpush.msrb.mxu0 %v3179_v27  ;;  %v4168_v27 = vld [vmem:[%s6323_s9 + $0x90] sm:$0xff] }
 0x691   : > { %v3206_v8 = vpop.f32.mrf.mxu3 }
 0x692   : > { %3273 = vmatpush.msrb.mxu0 %v3176_v45  ;;  %v4169_v45 = vld [vmem:[%s6323_s9 + $0x98] sm:$0xff] }
 0x694   : > { %3274 = vmatpush.msrb.mxu0 %v3173_v58  ;;  %v4176_v58 = vld [vmem:[%s6323_s9 + $0xc0] sm:$0xff] }
 0x696   : > { %3275 = vmatpush.msrb.mxu0 %v3170_v15  ;;  %v3395_v15 = vld [vmem:[%s6323_s9 + $0x20] sm:$0xff] }
 0x698   : > { %3276 = vmatpush.msrb.mxu0 %v3167_v29  ;;  %v4177_v29 = vld [vmem:[%s6323_s9 + $0xc8] sm:$0xff] }
 0x699   : > { %v3209_v52 = vpop.f32.mrf.mxu3  ;;  %3483 = vmatpush.msra.mxu2 %v4177_v29 }
 0x69a   : > { %3277 = vmatpush.msrb.mxu0 %v3164_v0  ;;  %v3396_v0 = vld [vmem:[%s6323_s9 + $0x28] sm:$0xff] }
 0x69b   : > { %3484 = vmatpush.msra.mxu2 %v4176_v58  ;;  %v3572_v58 = vld [vmem:[%s6325_s11 + $0x28] sm:$0xff] }
 0x69c   : > { %3278 = vmatpush.msrb.mxu0 %v3161_v43 }
 0x69d   : > { %3485 = vmatpush.msra.mxu2 %v4175_v20  ;;  %v3568_v20 = vld [vmem:[%s6325_s11 + $0x8] sm:$0xff] }
 0x69e   : > { %3279 = vmatpush.msrb.mxu0 %v3158_v42  ;;  %v3397_v42 = vld [vmem:[%s6323_s9 + $0x30] sm:$0xff] }
 0x69f   : > { %3448 = vmatpush.msra.mxu3 %v3397_v42  ;;  %3486 = vmatpush.msra.mxu2 %v4174_v25  ;;  %v3578_v42 = vld [vmem:[%s6325_s11 + $0x58] sm:$0xff]  ;;  %v3617_v25 = vld [vmem:[%s6327_s13 + $0x48] sm:$0xff] }
 0x6a0   : > { %3280 = vmatpush.msrb.mxu0 %v3155_v4 }
 0x6a1   : > { %v3212_v31 = vpop.f32.mrf.mxu3  ;;  %3281 = vmatmul.f32.vlgmr.msrb.gmra.mxu0 %v3215_v13  ;;  %3449 = vmatpush.msra.mxu3 %v3396_v0  ;;  %v4173_v13 = vld [vmem:[%s6323_s9 + $0xa8] sm:$0xff] }
 0x6a2   : > { %3324 = vmatpush.msrb.mxu1 %v3212_v31  ;;  %3423 = vmatpush.msra.mxu0 %v4169_v45  ;;  %v3571_v45 = vld [vmem:[%s6325_s11 + $0x20] sm:$0xff] }
 0x6a3   : > { %3450 = vmatpush.msra.mxu3 %v3395_v15  ;;  %3487 = vmatpush.msra.mxu2 %v4173_v13 }
 0x6a4   : > { %3325 = vmatpush.msrb.mxu1 %v3209_v52  ;;  %3424 = vmatpush.msra.mxu0 %v4168_v27  ;;  %v3391_v52 = vld [vmem:[%s6323_s9] sm:$0xff]  ;;  %v3570_v27 = vld [vmem:[%s6325_s11 + $0x18] sm:$0xff] }
 0x6a5   : > { %3451 = vmatpush.msra.mxu3 %v3394_v54  ;;  %v3569_v54 = vld [vmem:[%s6325_s11 + $0x10] sm:$0xff] }
 0x6a6   : > { %3326 = vmatpush.msrb.mxu1 %v3206_v8  ;;  %3425 = vmatpush.msra.mxu0 %v4167_v37  ;;  %v3567_v37 = vld [vmem:[%s6325_s11] sm:$0xff] }
 0x6a7   : > { %3452 = vmatpush.msra.mxu3 %v3393_v41  ;;  %v3618_v41 = vld [vmem:[%s6327_s13 + $0x50] sm:$0xf] }
 0x6a8   : > { %3327 = vmatpush.msrb.mxu1 %v3203_v62  ;;  %v4166_v62 = vld [vmem:[%s6323_s9 + $0x80] sm:$0xff] }
 0x6a9   : > { %4150 = vmatmul.msk.f32.vlgmr.msrb.gmra.mxu1 %vm555_vm0, %v3216_v22  ;;  %3284 = vmatmul.f32.gmra.mxu0 %v3217_v61  ;;  %v4165_v22 = vld [vmem:[%s6323_s9 + $0x78] sm:$0xff] }
 0x6aa   : > { %3453 = vmatpush.msra.mxu3 %v3392_v36  ;;  %v4192_v61 = vld [vmem:[%s6323_s9 + $0x138] sm:$0xff]  ;;  %3426 = vmatpush.msra.mxu0 %v4166_v62  ;;  %v3616_v36 = vld [vmem:[%s6327_s13 + $0x40] sm:$0xff]  ;;  %v3614_v62 = vld [vmem:[%s6327_s13 + $0x30] sm:$0xff] }
 0x6ac   : > { %3454 = vmatpush.msra.mxu3 %v3391_v52  ;;  %3427 = vmatpush.msra.mxu0 %v4165_v22 }
 0x6ae   : > { %3514 = vmatpush.msrb.mxu3 %v4192_v61 }
 0x6b1   : > { %4151 = vmatmul.msk.f32.gmra.mxu1 %vm555_vm0, %v3218_v11  ;;  %3287 = vmatmul.f32.gmra.mxu0 %v3219_v39  ;;  %v4164_v11 = vld [vmem:[%s6323_s9 + $0x70] sm:$0xff] }
 0x6b2   : > { %v4191_v39 = vld [vmem:[%s6323_s9 + $0x130] sm:$0xff]  ;;  %3428 = vmatpush.msra.mxu0 %v4164_v11 }
 0x6b3   : > { %3515 = vmatpush.msrb.mxu3 %v4191_v39 }
 0x6b9   : > { %4152 = vmatmul.msk.f32.gmra.mxu1 %vm555_vm0, %v3220_v1  ;;  %3290 = vmatmul.f32.gmra.mxu0 %v3221_v3  ;;  %v4163_v1 = vld [vmem:[%s6323_s9 + $0x68] sm:$0xff] }
 0x6ba   : > { %v4190_v3 = vld [vmem:[%s6323_s9 + $0x128] sm:$0xff]  ;;  %3429 = vmatpush.msra.mxu0 %v4163_v1 }
 0x6bb   : > { %3516 = vmatpush.msrb.mxu3 %v4190_v3  ;;  %v3564_v3 = vld [vmem:[%s6324_s10] sm:$0x1] }
 0x6c1   : > { %4153 = vmatmul.msk.f32.gmra.mxu1 %vm555_vm0, %v3222_v30  ;;  %3293 = vmatmul.f32.gmra.mxu0 %v3223_v19  ;;  %v4162_v19 = vld [vmem:[%s6323_s9 + $0x60] sm:$0xff] }
 0x6c2   : > { %3430 = vmatpush.msra.mxu0 %v4162_v19 }
 0x6c9   : > { %4154 = vmatmul.msk.f32.gmra.mxu1 %vm555_vm0, %v3224_v48  ;;  %3296 = vmatmul.f32.gmra.mxu0 %v3225_v2  ;;  %v4189_v2 = vld [vmem:[%s6323_s9 + $0x120] sm:$0xff] }
 0x6ca   : > { %3517 = vmatpush.msrb.mxu3 %v4189_v2  ;;  %v3612_v2 = vld [vmem:[%s6327_s13 + $0x20] sm:$0xff] }
 0x6d1   : > { %4155 = vmatmul.msk.f32.gmra.mxu1 %vm555_vm0, %v3226_v10  ;;  %3299 = vmatmul.f32.gmra.mxu0 %v3227_v18  ;;  %v4161_v10 = vld [vmem:[%s6323_s9 + $0x58] sm:$0xff] }
 0x6d2   : > { %v4188_v18 = vld [vmem:[%s6323_s9 + $0x118] sm:$0xff]  ;;  %3431 = vmatpush.msra.mxu0 %v4161_v10 }
 0x6d3   : > { %3518 = vmatpush.msrb.mxu3 %v4188_v18  ;;  %v3611_v10 = vld [vmem:[%s6327_s13 + $0x18] sm:$0xff]  ;;  %v3610_v18 = vld [vmem:[%s6327_s13 + $0x10] sm:$0xff] }
 0x6d9   : > { %4156 = vmatmul.msk.f32.gmra.mxu1 %vm555_vm0, %v3228_v33  ;;  %3302 = vmatmul.f32.gmra.mxu0 %v3229_v53  ;;  %v4160_v53 = vld [vmem:[%s6323_s9 + $0x50] sm:$0xff] }
 0x6da   : > { %3432 = vmatpush.msra.mxu0 %v4160_v53  ;;  %v3608_v53 = vld [vmem:[%s6327_s13] sm:$0xff] }
 0x6e1   : > { %4157 = vmatmul.msk.f32.gmra.mxu1 %vm555_vm0, %v3230_v47  ;;  %3305 = vmatmul.f32.gmra.mxu0 %v3231_v60  ;;  %v4203_v47 = vld [vmem:[%s6323_s9 + $0x188] sm:$0xff]  ;;  %v4187_v60 = vld [vmem:[%s6323_s9 + $0x110] sm:$0xff] }
 0x6e2   : > { %3549 = vmatpush.msrb.mxu0 %v4203_v47  ;;  %3519 = vmatpush.msrb.mxu3 %v4187_v60  ;;  %v3582_v47 = vld [vmem:[%s6326_s12] sm:$0x1] }
 0x6e9   : > { %4158 = vmatmul.msk.f32.gmra.mxu1 %vm555_vm0, %v3232_v35  ;;  %3308 = vmatmul.f32.gmra.mxu0 %v3233_v26  ;;  %v4202_v35 = vld [vmem:[%s6323_s9 + $0x180] sm:$0xff] }
 0x6ea   : > { %3550 = vmatpush.msrb.mxu0 %v4202_v35 }
 0x6ec   : > { %3551 = vmatpush.msrb.mxu0 %v4201_v50 }
 0x6f1   : > { %4159 = vmatmul.msk.f32.gmra.mxu1 %vm555_vm0, %v3234_v17 }
 0x71e   : > { %v3282_v6 = vpop.f32.mrf.mxu0 }
 0x726   : > { %v3329_v28 = vpop.f32.mrf.mxu1  ;;  %v3285_v34 = vpop.f32.mrf.mxu0 }
 0x727   : > { %v3330_v24 = vadd.f32 %v3329_v28, %v3282_v6  ;;  %v4200_v28 = vld [vmem:[%s6323_s9 + $0x170] sm:$0xff] }
 0x728   : > { %3552 = vmatpush.msrb.mxu0 %v4200_v28 }
 0x729   : > { %3359 = vxpose.xlu2.b32.start [1/10] (short) (narrow) %v3330_v24, 8  ;;  %v4186_v24 = vld [vmem:[%s6323_s9 + $0x108] sm:$0xff] }
 0x72a   : > { %3520 = vmatpush.msrb.mxu3 %v4186_v24 }
 0x72c   : > { %3521 = vmatpush.msrb.mxu3 %v4185_v59 }
 0x72e   : > { %v3332_v4 = vpop.f32.mrf.mxu1  ;;  %v3288_v14 = vpop.f32.mrf.mxu0 }
 0x72f   : > { %v3333_v16 = vadd.f32 %v3332_v4, %v3285_v34  ;;  %v4199_v34 = vld [vmem:[%s6323_s9 + $0x168] sm:$0xff]  ;;  %v4172_v4 = vld [vmem:[%s6323_s9 + $0xa0] sm:$0xff] }
 0x730   : > { %3553 = vmatpush.msrb.mxu0 %v4199_v34  ;;  %3488 = vmatpush.msra.mxu2 %v4172_v4 }
 0x731   : > { %3360 = vxpose.xlu2.b32.cont [2/10] (short) (narrow) %v3333_v16, 8  ;;  %v4184_v16 = vld [vmem:[%s6323_s9 + $0xf8] sm:$0xff] }
 0x732   : > { %3522 = vmatpush.msrb.mxu3 %v4184_v16  ;;  %4206 = vmatpush.msk.msrb.mxu2 %vm1672_vm1, %v3618_v41 }
 0x734   : > { %3632 = vmatpush.msrb.mxu2 %v3617_v25 }
 0x736   : > { %v3335_v38 = vpop.f32.mrf.mxu1  ;;  %v3291_v23 = vpop.f32.mrf.mxu0  ;;  %3633 = vmatpush.msrb.mxu2 %v3616_v36 }
 0x737   : > { %v3336_v40 = vadd.f32 %v3335_v38, %v3288_v14  ;;  %v4198_v14 = vld [vmem:[%s6323_s9 + $0x160] sm:$0xff]  ;;  %v4183_v38 = vld [vmem:[%s6323_s9 + $0xf0] sm:$0xff] }
 0x738   : > { %3554 = vmatpush.msrb.mxu0 %v4198_v14  ;;  %3523 = vmatpush.msrb.mxu3 %v4183_v38 }
 0x739   : > { %3361 = vxpose.xlu2.b32.cont [3/10] (short) (narrow) %v3336_v40, 8  ;;  %v4195_v40 = vld [vmem:[%s6323_s9 + $0x148] sm:$0xff] }
 0x73a   : > { %3555 = vmatpush.msrb.mxu0 %v4197_v32 }
 0x73e   : > { %v3338_v46 = vpop.f32.mrf.mxu1  ;;  %v3294_v21 = vpop.f32.mrf.mxu0 }
 0x73f   : > { %v3339_v63 = vadd.f32 %v3338_v46, %v3291_v23  ;;  %v4196_v23 = vld [vmem:[%s6323_s9 + $0x150] sm:$0xff] }
 0x740   : > { %3556 = vmatpush.msrb.mxu0 %v4196_v23  ;;  %v3581_v46 = vld [vmem:[%s6325_s11 + $0x70] sm:$0xff] }
 0x741   : > { %3362 = vxpose.xlu2.b32.cont [4/10] (short) (narrow) %v3339_v63, 8  ;;  %3588 = vmatpush.msra.mxu1 %v3581_v46  ;;  %v3579_v63 = vld [vmem:[%s6325_s11 + $0x60] sm:$0xff] }
 0x742   : > { %3557 = vmatpush.msrb.mxu0 %v4195_v40 }
 0x744   : > { %3558 = vmatpush.msrb.mxu0 %v4194_v44 }
 0x746   : > { %v3341_v57 = vpop.f32.mrf.mxu1  ;;  %v3297_v49 = vpop.f32.mrf.mxu0 }
 0x747   : > { %v3342_v7 = vadd.f32 %v3341_v57, %v3294_v21  ;;  %v3580_v21 = vld [vmem:[%s6325_s11 + $0x68] sm:$0xff]  ;;  %v3577_v57 = vld [vmem:[%s6325_s11 + $0x50] sm:$0xff] }
 0x748   : > { %3589 = vmatpush.msra.mxu1 %v3580_v21 }
 0x749   : > { %3363 = vxpose.xlu2.b32.cont [5/10] (short) (narrow) %v3342_v7, 8  ;;  %v3575_v7 = vld [vmem:[%s6325_s11 + $0x40] sm:$0xff] }
 0x74a   : > { %3590 = vmatpush.msra.mxu1 %v3579_v63 }
 0x74c   : > { %3591 = vmatpush.msra.mxu1 %v3578_v42 }
 0x74e   : > { %v3344_v51 = vpop.f32.mrf.mxu1  ;;  %v3300_v43 = vpop.f32.mrf.mxu0  ;;  %3592 = vmatpush.msra.mxu1 %v3577_v57 }
 0x74f   : > { %v3345_v55 = vadd.f32 %v3344_v51, %v3297_v49  ;;  %v3576_v49 = vld [vmem:[%s6325_s11 + $0x48] sm:$0xff]  ;;  %v3573_v51 = vld [vmem:[%s6325_s11 + $0x30] sm:$0xff] }
 0x750   : > { %3593 = vmatpush.msra.mxu1 %v3576_v49 }
 0x751   : > { %3364 = vxpose.xlu2.b32.cont [6/10] (short) (narrow) %v3345_v55, 8 }
 0x752   : > { %3594 = vmatpush.msra.mxu1 %v3575_v7 }
 0x754   : > { %3595 = vmatpush.msra.mxu1 %v3574_v12 }
 0x756   : > { %v3347_v9 = vpop.f32.mrf.mxu1  ;;  %v3303_v31 = vpop.f32.mrf.mxu0  ;;  %3596 = vmatpush.msra.mxu1 %v3573_v51 }
 0x757   : > { %v3348_v8 = vadd.f32 %v3347_v9, %v3300_v43  ;;  %v3615_v9 = vld [vmem:[%s6327_s13 + $0x38] sm:$0xff] }
 0x758   : > { %3597 = vmatpush.msra.mxu1 %v3572_v58  ;;  %3634 = vmatpush.msrb.mxu2 %v3615_v9 }
 0x759   : > { %3365 = vxpose.xlu2.b32.cont [7/10] (short) (narrow) %v3348_v8, 8  ;;  %v3613_v8 = vld [vmem:[%s6327_s13 + $0x28] sm:$0xff] }
 0x75a   : > { %3598 = vmatpush.msra.mxu1 %v3571_v45  ;;  %3635 = vmatpush.msrb.mxu2 %v3614_v62 }
 0x75c   : > { %3599 = vmatpush.msra.mxu1 %v3570_v27  ;;  %3636 = vmatpush.msrb.mxu2 %v3613_v8 }
 0x75e   : > { %v3350_v30 = vpop.f32.mrf.mxu1  ;;  %v3306_v33 = vpop.f32.mrf.mxu0  ;;  %3600 = vmatpush.msra.mxu1 %v3569_v54  ;;  %3637 = vmatpush.msrb.mxu2 %v3612_v2 }
 0x75f   : > { %v3351_v48 = vadd.f32 %v3350_v30, %v3303_v31 }
 0x760   : > { %3601 = vmatpush.msra.mxu1 %v3568_v20  ;;  %3638 = vmatpush.msrb.mxu2 %v3611_v10 }
 0x761   : > { %3366 = vxpose.xlu2.b32.cont [8/10] (short) (narrow) %v3351_v48, 8 }
 0x762   : > { %3602 = vmatpush.msra.mxu1 %v3567_v37  ;;  %3639 = vmatpush.msrb.mxu2 %v3610_v18 }
 0x766   : > { %v3353_v26 = vpop.f32.mrf.mxu1  ;;  %v3309_v5 = vpop.f32.mrf.mxu0 }
 0x767   : > { %v3354_v17 = vadd.f32 %v3353_v26, %v3306_v33  ;;  %v3609_v33 = vld [vmem:[%s6327_s13 + $0x8] sm:$0xff] }
 0x768   : > { %3640 = vmatpush.msrb.mxu2 %v3609_v33 }
 0x769   : > { %3367 = vxpose.xlu2.b32.cont [9/10] (short) (narrow) %v3354_v17, 8  ;;  %v3619_v17 = vld [vmem:[%s6328_s14] sm:$0x1] }
 0x76a   : > { %3641 = vmatpush.msrb.mxu2 %v3608_v53 }
 0x76e   : > { %v3356_v56 = vpop.f32.mrf.mxu1 }
 0x76f   : > { %v3357_v6 = vadd.f32 %v3356_v56, %v3309_v5 }
 0x771   : > { %3368 = vxpose.xlu2.b32.end [10/10] (short) (narrow) %v3357_v6, 8 }
 0x7c2   : > { %v3375_v43 = vpop.trf.xlu2 }
 0x7c3   : > { %v3413_v55 = vrot.slane %v3375_v43, 1  ;;  %v3470_v0 = vrot.slane %v3375_v43, 2  ;;  %4171 = vmatmul.msk.f32.vlgmr.msra.gmra.mxu3 %vm3414_vm7, %v3375_v43  ;;  %v3505_v29 = vrot.slane %v3375_v43, 3  ;;  %v3540_v15 = vrot.slane %v3375_v43, 4 }
 0x7c5   : > { %4182 = vmatmul.msk.f32.vlgmr.msra.gmra.mxu2 %vm3414_vm7, %v3470_v0  ;;  %4170 = vmatmul.msk.f32.vlgmr.msra.gmra.mxu0 %vm3414_vm7, %v3413_v55 }
 0x7cb   : > { %4193 = vmatmul.msk.f32.vlgmr.msrb.gmra.mxu3 %vm3414_vm7, %v3505_v29 }
 0x7cd   : > { %4204 = vmatmul.msk.f32.vlgmr.msrb.gmra.mxu0 %vm3414_vm7, %v3540_v15 }
 0x842   : > { %v3434_v13 = vpop.f32.mrf.mxu0 }
 0x846   : > { %v3456_v52 = vpop.f32.mrf.mxu3 }
 0x847   : > { %v3457_v31 = vadd.f32 %v3456_v52, %v3434_v13 }
 0x848   : > { %v3490_v22 = vpop.f32.mrf.mxu2 }
 0x849   : > { %v3493_v61 = vadd.f32 %v3490_v22, %v3457_v31 }
 0x84a   : > { %v3560_v1 = vpop.f32.mrf.mxu0 }
 0x84e   : > { %v3525_v11 = vpop.f32.mrf.mxu3 }
 0x84f   : > { %v3528_v39 = vadd.f32 %v3525_v11, %v3493_v61 }
 0x851   : > { %v3563_v30 = vadd.f32 %v3560_v1, %v3528_v39 }
 0x853   : > { %v3565_v19 = vadd.f32 %v3564_v3, %v3563_v30 }
 0x855   : > { %4481 = vtanh.f32 %v3565_v19 }
 0x85b   : > { %v4482_v48 = vpop.eup %4481 }
 0x85c   : > { %4205 = vmatmul.msk.f32.vlgmr.msra.gmra.mxu1 %vm3583_vm8, %v4482_v48 }
 0x8d9   : > { %v3604_v60 = vpop.f32.mrf.mxu1 }
 0x8da   : > { %v3605_v35 = vadd.f32 %v3604_v60, %v3582_v47 }
 0x8dc   : > { %4483 = vtanh.f32 %v3605_v35 }
 0x8e2   : > { %v4484_v26 = vpop.eup %4483 }
 0x8e3   : > { %4207 = vmatmul.msk.f32.vlgmr.msrb.gmra.mxu2 %vm1996_vm4, %v4484_v26 }
 0x966   : > { %v3643_v5 = vpop.f32.mrf.mxu2 }
 0x967   : > { %v3644_v56 = vadd.f32 %v3643_v5, %v3619_v17 }
 0x969   : > { %3647 = vst.msk [vmem:[%s486_s20] sm:$0x1] %vm3646_vm9, %v3644_v56 }
 0x96a   : > { %4512 = shalt.err (!%p4509_p3)
}
 0x96b   : > { %4211 = dma.vmem_to_hbm [thread:$0]  (%p4672_p5), %s3660_s17, 16, %s3662_s26, %s3649_s23  }
 0x96c PF: > { %p4217_p4 = scmp.ge.s32.totalorder %s4547_s21, 2  ;;  %s3673_s25 = sand.u32 1, %s4535_s18  }
 0x96d   : > { %s3674_s0 = scalar_lea.sflag [#allocation3], %s3673_s25 }
 0x96e   : > { %p4214_p7 = pnand %p4217_p4, %p4676_p6 }
 0x970   : > { %p4215_p8 = pneg %p4214_p7 }
 0x972   : > { %4530 = dma.done.wait (%p4215_p8), %s3674_s0, 16  }
 0x973   : > { %4532 = vsyncadd (%p4215_p8), %s3674_s0, 4294967280  ;;  %s6356_s21 = sld [smem:[#allocation6_spill]]  ;;  %s6359_s18 = smov %s4539_s19 }
 0x974   : > { %s6357_s1 = sld [smem:[#allocation5_spill]] }
 0x975   : > { %s6358_s20 = sld [smem:[#allocation7_spill]] }
 0x979   : > { %p25_p9 = scmp.ge.s32.totalorder %s6356_s21, 4  }
 0x97a   : > { %s6360_s19 = smov %s6357_s1 }
 0x97b   :  { %27 = sbr.rel (!%p25_p9) target bundleno = 7 (0x7), region = 127 }
 0x980   :  { %3679 = vsyncpa [#allocation3], 1 }
 0x981   :  { %3681 = vsyncpa [#allocation3 + $0x1], 1 }

</bundles_post_ra>
